<compile_context>
chip_gen: v7x
topology: tpu7x:2x2x1
jax: 0.10.0
libtpu: 0.0.40
codegen_flags: <defaults>
</compile_context>

<pallas_src>
import jax
import jax.numpy as jnp
from jax.experimental import pallas as pl
from jax.experimental.pallas import tpu as pltpu

KERNEL_SIZE = 4   # DreamerV1 encoder layer_args
STRIDE = 2

_MAX_TILE_ROWS = 1024  # row-tile cap; keeps per-block VMEM bounded for big inputs


def _round_up(n, m):
    return ((n + m - 1) // m) * m


# ---------------------------------------------------------------------------
# Pallas kernel: fused (patches @ W + b) -> ReLU  (one per conv layer)
# ---------------------------------------------------------------------------
def _gemm_bias_relu_kernel(p_ref, w_ref, b_ref, o_ref):
    acc = jnp.dot(p_ref[...], w_ref[...], preferred_element_type=jnp.float32)
    o_ref[...] = jnp.maximum(acc + b_ref[...], 0.0).astype(o_ref.dtype)


def conv2d_bias_relu_gemm(patches, w_mat, b_row):
    """Fused Conv-as-GEMM layer.

    patches: (N, K*K*Cin) im2col rows (one row per output spatial position)
    w_mat:   (K*K*Cin, Cout) weights, rows ordered (kh, kw, cin)
    b_row:   (1, Cout)
    returns: (N, Cout) = ReLU(patches @ w_mat + b)
    """
    N, KKC = patches.shape
    Cout = w_mat.shape[1]

    tile = min(_MAX_TILE_ROWS, _round_up(N, 8))
    Np = _round_up(N, tile)
    if Np != N:
        # zero-pad rows; padded rows are discarded after the call
        patches = jnp.pad(patches, ((0, Np - N), (0, 0)))

    out = pl.pallas_call(
        _gemm_bias_relu_kernel,
        out_shape=jax.ShapeDtypeStruct((Np, Cout), jnp.float32),
        grid_spec=pltpu.PrefetchScalarGridSpec(
            num_scalar_prefetch=0,
            grid=(Np // tile,),
            in_specs=[
                pl.BlockSpec((tile, KKC), lambda i: (i, 0)),   # row tile of patches
                pl.BlockSpec((KKC, Cout), lambda i: (0, 0)),   # resident weights
                pl.BlockSpec((1, Cout), lambda i: (0, 0)),     # resident bias
            ],
            out_specs=pl.BlockSpec((tile, Cout), lambda i: (i, 0)),
        ),
        compiler_params=pltpu.CompilerParams(
            dimension_semantics=("parallel",),   # independent row tiles
        ),
    )(patches, w_mat, b_row)
    return out[:N]


# ---------------------------------------------------------------------------
# Wrapper-side layout plumbing (no compute): im2col via strided slices
# ---------------------------------------------------------------------------
def _extract_patches_nhwc(x, k, s):
    """x: (B, H, W, C) -> (B*OH*OW, k*k*C); column order is (kh, kw, cin)."""
    B, H, W, C = x.shape
    OH = (H - k) // s + 1
    OW = (W - k) // s + 1
    cols = []
    for kh in range(k):
        for kw in range(k):
            sl = jax.lax.slice(
                x,
                (0, kh, kw, 0),
                (B, kh + s * (OH - 1) + 1, kw + s * (OW - 1) + 1, C),
                strides=(1, s, s, 1),
            )
            cols.append(sl)  # (B, OH, OW, C)
    patches = jnp.concatenate(cols, axis=-1)  # (B, OH, OW, k*k*C)
    return patches.reshape(B * OH * OW, k * k * C), OH, OW


@jax.jit
def encoder_forward(x_nchw, params):
    """x: (B, Cin, H, W) -> (B, Cout*OH*OW), matching Encoder.forward."""
    x = jnp.transpose(x_nchw, (0, 2, 3, 1))  # NHWC: channels on the lane dim
    B = x.shape[0]
    for layer in params["layers"]:
        patches, OH, OW = _extract_patches_nhwc(x, KERNEL_SIZE, STRIDE)
        y = conv2d_bias_relu_gemm(patches, layer["w_mat"], layer["b_row"])
        x = y.reshape(B, OH, OW, -1)
    # nn.Flatten(-3, -1) on the NCHW output => channel-major flatten
    return jnp.transpose(x, (0, 3, 1, 2)).reshape(B, -1)


# ---------------------------------------------------------------------------
# Parameters (PyTorch Conv2d-shaped OIHW weights + GEMM-packed copies)
# ---------------------------------------------------------------------------
def init_params(key, input_channels, hidden_channels, k=KERNEL_SIZE):
    layers_gemm = []
    layers_ref = []
    cin = input_channels
    for cout in hidden_channels:
        key, k_w, k_b = jax.random.split(key, 3)
        bound = float((cin * k * k) ** -0.5)
        w_oihw = jax.random.uniform(k_w, (cout, cin, k, k), jnp.float32, -bound, bound)
        b = jax.random.uniform(k_b, (cout,), jnp.float32, -bound, bound)
        # GEMM layout: row index = (kh*k + kw)*cin + c  (matches patch order)
        w_mat = jnp.transpose(w_oihw, (2, 3, 1, 0)).reshape(k * k * cin, cout)
        layers_gemm.append({"w_mat": w_mat, "b_row": b[None, :]})
        layers_ref.append({"w_oihw": w_oihw, "b": b})
        cin = cout
    return {"layers": layers_gemm}, layers_ref


# ---------------------------------------------------------------------------
# Pure-JAX reference (mirrors torch Conv2d(k=4, s=2) + ReLU stack + Flatten)
# ---------------------------------------------------------------------------
def reference_forward(x_nchw, layers_ref):
    x = x_nchw
    for layer in layers_ref:
        x = jax.lax.conv_general_dilated(
            x, layer["w_oihw"], window_strides=(STRIDE, STRIDE), padding="VALID",
            dimension_numbers=("NCHW", "OIHW", "NCHW"),
            precision=jax.lax.Precision.HIGHEST)
        x = jnp.maximum(x + layer["b"].reshape(1, -1, 1, 1), 0.0)
    return x.reshape(x.shape[0], -1)


if __name__ == "__main__":
    # Small shapes consistent with the module: observation_shape=(3, 64, 64),
    # 4 conv layers with kernel_size=4, stride=2 (DreamerV1 structure with a
    # reduced channel multiplier), batch=2.
    B = 2
    obs_shape = (3, 64, 64)
    hidden_channels = (16, 32, 64, 128)

    key = jax.random.PRNGKey(0)
    k_x, k_p = jax.random.split(key)
    x = jax.random.normal(k_x, (B,) + obs_shape, jnp.float32)
    params, layers_ref = init_params(k_p, obs_shape[0], hidden_channels)

    out = encoder_forward(x, params)
    out = jax.block_until_ready(out)

    # Numerical check against a plain-JAX conv reference.
    ref = reference_forward(x, layers_ref)
    expected_out_size = hidden_channels[-1] * 2 * 2  # 64 -> 31 -> 14 -> 6 -> 2
    assert out.shape == (B, expected_out_size), out.shape
    assert ref.shape == out.shape
    max_err = float(jnp.max(jnp.abs(out - ref)))
    assert jnp.allclose(out, ref, atol=1e-3, rtol=1e-3), max_err

    print("KERNEL_OK")
</pallas_src>

<mosaic_0001>
module attributes {stable_mosaic.version = 11 : i64} {
  func.func @_gemm_bias_relu_kernel(%arg0: i32, %arg1: memref<1024x48xf32, #tpu.memory_space<vmem>>, %arg2: memref<48x16xf32, #tpu.memory_space<vmem>>, %arg3: memref<1x16xf32, #tpu.memory_space<vmem>>, %arg4: memref<1024x16xf32, #tpu.memory_space<vmem>>) attributes {dimension_semantics = [#tpu.dimension_semantics<parallel>], iteration_bounds = array<i64: 2>, scalar_prefetch = 0 : i64, scratch_operands = 0 : i64, tpu.core_type = #tpu.core_type<tc>, window_params = [{transform_indices = @transform_0, window_bounds = array<i64: 1024, 48>}, {pipeline_mode = #tpu.pipeline_mode<synchronous>, transform_indices = @transform_1, window_bounds = array<i64: 48, 16>}, {pipeline_mode = #tpu.pipeline_mode<synchronous>, transform_indices = @transform_2, window_bounds = array<i64: 1, 16>}, {transform_indices = @transform_3, window_bounds = array<i64: 1024, 16>}]} {
    %c0 = arith.constant 0 : index
    %c0_0 = arith.constant 0 : index
    %0 = vector.load %arg1[%c0, %c0_0] : memref<1024x48xf32, #tpu.memory_space<vmem>>, vector<1024x48xf32>
    %c0_1 = arith.constant 0 : index
    %c0_2 = arith.constant 0 : index
    %1 = vector.load %arg2[%c0_1, %c0_2] : memref<48x16xf32, #tpu.memory_space<vmem>>, vector<48x16xf32>
    %cst = arith.constant dense<0.000000e+00> : vector<1024x16xf32>
    %2 = tpu.matmul %0, %1, %cst {dimension_numbers = #tpu.dot_dimension_numbers<[1], [0], [0], [1], [0, 0, 1, 1], [], []>} : vector<1024x48xf32>, vector<48x16xf32>, vector<1024x16xf32> -> vector<1024x16xf32>
    %c0_3 = arith.constant 0 : index
    %c0_4 = arith.constant 0 : index
    %3 = vector.load %arg3[%c0_3, %c0_4] : memref<1x16xf32, #tpu.memory_space<vmem>>, vector<1x16xf32>
    %4 = vector.broadcast %3 : vector<1x16xf32> to vector<1024x16xf32>
    %5 = arith.addf %2, %4 : vector<1024x16xf32>
    %cst_5 = arith.constant 0.000000e+00 : f32
    %6 = vector.broadcast %cst_5 : f32 to vector<1024x16xf32>
    %7 = arith.maximumf %5, %6 : vector<1024x16xf32>
    %c0_6 = arith.constant 0 : index
    %c0_7 = arith.constant 0 : index
    %8 = vector.load %arg4[%c0_6, %c0_7] : memref<1024x16xf32, #tpu.memory_space<vmem>>, vector<1024x16xf32>
    tpu.vector_store %arg4[%c0_6, %c0_7], %7 {strides = array<i32>} : memref<1024x16xf32, #tpu.memory_space<vmem>>, vector<1024x16xf32>,
    return
  }
  func.func @transform_0(%arg0: i32) -> (i32, i32) {
    %c0_i32 = arith.constant 0 : i32
    %c0_i32_0 = arith.constant 0 : i32
    return %arg0, %c0_i32 : i32, i32
  }
  func.func @transform_1(%arg0: i32) -> (i32, i32) {
    %c0_i32 = arith.constant 0 : i32
    %c0_i32_0 = arith.constant 0 : i32
    %c0_i32_1 = arith.constant 0 : i32
    return %c0_i32, %c0_i32_0 : i32, i32
  }
  func.func @transform_2(%arg0: i32) -> (i32, i32) {
    %c0_i32 = arith.constant 0 : i32
    %c0_i32_0 = arith.constant 0 : i32
    %c0_i32_1 = arith.constant 0 : i32
    return %c0_i32, %c0_i32_0 : i32, i32
  }
  func.func @transform_3(%arg0: i32) -> (i32, i32) {
    %c0_i32 = arith.constant 0 : i32
    %c0_i32_0 = arith.constant 0 : i32
    return %arg0, %c0_i32 : i32, i32
  }
}

module attributes {stable_mosaic.version = 11 : i64} {
  func.func @_gemm_bias_relu_kernel(%arg0: i32, %arg1: memref<392x256xf32, #tpu.memory_space<vmem>>, %arg2: memref<256x32xf32, #tpu.memory_space<vmem>>, %arg3: memref<1x32xf32, #tpu.memory_space<vmem>>, %arg4: memref<392x32xf32, #tpu.memory_space<vmem>>) attributes {dimension_semantics = [#tpu.dimension_semantics<parallel>], iteration_bounds = array<i64: 1>, scalar_prefetch = 0 : i64, scratch_operands = 0 : i64, tpu.core_type = #tpu.core_type<tc>, window_params = [{transform_indices = @transform_0, window_bounds = array<i64: 392, 256>}, {pipeline_mode = #tpu.pipeline_mode<synchronous>, transform_indices = @transform_1, window_bounds = array<i64: 256, 32>}, {pipeline_mode = #tpu.pipeline_mode<synchronous>, transform_indices = @transform_2, window_bounds = array<i64: 1, 32>}, {transform_indices = @transform_3, window_bounds = array<i64: 392, 32>}]} {
    %c0 = arith.constant 0 : index
    %c0_0 = arith.constant 0 : index
    %0 = vector.load %arg1[%c0, %c0_0] : memref<392x256xf32, #tpu.memory_space<vmem>>, vector<392x256xf32>
    %c0_1 = arith.constant 0 : index
    %c0_2 = arith.constant 0 : index
    %1 = vector.load %arg2[%c0_1, %c0_2] : memref<256x32xf32, #tpu.memory_space<vmem>>, vector<256x32xf32>
    %cst = arith.constant dense<0.000000e+00> : vector<392x32xf32>
    %2 = tpu.matmul %0, %1, %cst {dimension_numbers = #tpu.dot_dimension_numbers<[1], [0], [0], [1], [0, 0, 1, 1], [], []>} : vector<392x256xf32>, vector<256x32xf32>, vector<392x32xf32> -> vector<392x32xf32>
    %c0_3 = arith.constant 0 : index
    %c0_4 = arith.constant 0 : index
    %3 = vector.load %arg3[%c0_3, %c0_4] : memref<1x32xf32, #tpu.memory_space<vmem>>, vector<1x32xf32>
    %4 = vector.broadcast %3 : vector<1x32xf32> to vector<392x32xf32>
    %5 = arith.addf %2, %4 : vector<392x32xf32>
    %cst_5 = arith.constant 0.000000e+00 : f32
    %6 = vector.broadcast %cst_5 : f32 to vector<392x32xf32>
    %7 = arith.maximumf %5, %6 : vector<392x32xf32>
    %c0_6 = arith.constant 0 : index
    %c0_7 = arith.constant 0 : index
    %8 = vector.load %arg4[%c0_6, %c0_7] : memref<392x32xf32, #tpu.memory_space<vmem>>, vector<392x32xf32>
    tpu.vector_store %arg4[%c0_6, %c0_7], %7 {strides = array<i32>} : memref<392x32xf32, #tpu.memory_space<vmem>>, vector<392x32xf32>,
    return
  }
  func.func @transform_0(%arg0: i32) -> (i32, i32) {
    %c0_i32 = arith.constant 0 : i32
    %c0_i32_0 = arith.constant 0 : i32
    return %arg0, %c0_i32 : i32, i32
  }
  func.func @transform_1(%arg0: i32) -> (i32, i32) {
    %c0_i32 = arith.constant 0 : i32
    %c0_i32_0 = arith.constant 0 : i32
    %c0_i32_1 = arith.constant 0 : i32
    return %c0_i32, %c0_i32_0 : i32, i32
  }
  func.func @transform_2(%arg0: i32) -> (i32, i32) {
    %c0_i32 = arith.constant 0 : i32
    %c0_i32_0 = arith.constant 0 : i32
    %c0_i32_1 = arith.constant 0 : i32
    return %c0_i32, %c0_i32_0 : i32, i32
  }
  func.func @transform_3(%arg0: i32) -> (i32, i32) {
    %c0_i32 = arith.constant 0 : i32
    %c0_i32_0 = arith.constant 0 : i32
    return %arg0, %c0_i32 : i32, i32
  }
}

module attributes {stable_mosaic.version = 11 : i64} {
  func.func @_gemm_bias_relu_kernel(%arg0: i32, %arg1: memref<72x512xf32, #tpu.memory_space<vmem>>, %arg2: memref<512x64xf32, #tpu.memory_space<vmem>>, %arg3: memref<1x64xf32, #tpu.memory_space<vmem>>, %arg4: memref<72x64xf32, #tpu.memory_space<vmem>>) attributes {dimension_semantics = [#tpu.dimension_semantics<parallel>], iteration_bounds = array<i64: 1>, scalar_prefetch = 0 : i64, scratch_operands = 0 : i64, tpu.core_type = #tpu.core_type<tc>, window_params = [{transform_indices = @transform_0, window_bounds = array<i64: 72, 512>}, {pipeline_mode = #tpu.pipeline_mode<synchronous>, transform_indices = @transform_1, window_bounds = array<i64: 512, 64>}, {pipeline_mode = #tpu.pipeline_mode<synchronous>, transform_indices = @transform_2, window_bounds = array<i64: 1, 64>}, {transform_indices = @transform_3, window_bounds = array<i64: 72, 64>}]} {
    %c0 = arith.constant 0 : index
    %c0_0 = arith.constant 0 : index
    %0 = vector.load %arg1[%c0, %c0_0] : memref<72x512xf32, #tpu.memory_space<vmem>>, vector<72x512xf32>
    %c0_1 = arith.constant 0 : index
    %c0_2 = arith.constant 0 : index
    %1 = vector.load %arg2[%c0_1, %c0_2] : memref<512x64xf32, #tpu.memory_space<vmem>>, vector<512x64xf32>
    %cst = arith.constant dense<0.000000e+00> : vector<72x64xf32>
    %2 = tpu.matmul %0, %1, %cst {dimension_numbers = #tpu.dot_dimension_numbers<[1], [0], [0], [1], [0, 0, 1, 1], [], []>} : vector<72x512xf32>, vector<512x64xf32>, vector<72x64xf32> -> vector<72x64xf32>
    %c0_3 = arith.constant 0 : index
    %c0_4 = arith.constant 0 : index
    %3 = vector.load %arg3[%c0_3, %c0_4] : memref<1x64xf32, #tpu.memory_space<vmem>>, vector<1x64xf32>
    %4 = vector.broadcast %3 : vector<1x64xf32> to vector<72x64xf32>
    %5 = arith.addf %2, %4 : vector<72x64xf32>
    %cst_5 = arith.constant 0.000000e+00 : f32
    %6 = vector.broadcast %cst_5 : f32 to vector<72x64xf32>
    %7 = arith.maximumf %5, %6 : vector<72x64xf32>
    %c0_6 = arith.constant 0 : index
    %c0_7 = arith.constant 0 : index
    %8 = vector.load %arg4[%c0_6, %c0_7] : memref<72x64xf32, #tpu.memory_space<vmem>>, vector<72x64xf32>
    tpu.vector_store %arg4[%c0_6, %c0_7], %7 {strides = array<i32>} : memref<72x64xf32, #tpu.memory_space<vmem>>, vector<72x64xf32>,
    return
  }
  func.func @transform_0(%arg0: i32) -> (i32, i32) {
    %c0_i32 = arith.constant 0 : i32
    %c0_i32_0 = arith.constant 0 : i32
    return %arg0, %c0_i32 : i32, i32
  }
  func.func @transform_1(%arg0: i32) -> (i32, i32) {
    %c0_i32 = arith.constant 0 : i32
    %c0_i32_0 = arith.constant 0 : i32
    %c0_i32_1 = arith.constant 0 : i32
    return %c0_i32, %c0_i32_0 : i32, i32
  }
  func.func @transform_2(%arg0: i32) -> (i32, i32) {
    %c0_i32 = arith.constant 0 : i32
    %c0_i32_0 = arith.constant 0 : i32
    %c0_i32_1 = arith.constant 0 : i32
    return %c0_i32, %c0_i32_0 : i32, i32
  }
  func.func @transform_3(%arg0: i32) -> (i32, i32) {
    %c0_i32 = arith.constant 0 : i32
    %c0_i32_0 = arith.constant 0 : i32
    return %arg0, %c0_i32 : i32, i32
  }
}

module attributes {stable_mosaic.version = 11 : i64} {
  func.func @_gemm_bias_relu_kernel(%arg0: i32, %arg1: memref<8x1024xf32, #tpu.memory_space<vmem>>, %arg2: memref<1024x128xf32, #tpu.memory_space<vmem>>, %arg3: memref<1x128xf32, #tpu.memory_space<vmem>>, %arg4: memref<8x128xf32, #tpu.memory_space<vmem>>) attributes {dimension_semantics = [#tpu.dimension_semantics<parallel>], iteration_bounds = array<i64: 1>, scalar_prefetch = 0 : i64, scratch_operands = 0 : i64, tpu.core_type = #tpu.core_type<tc>, window_params = [{transform_indices = @transform_0, window_bounds = array<i64: 8, 1024>}, {pipeline_mode = #tpu.pipeline_mode<synchronous>, transform_indices = @transform_1, window_bounds = array<i64: 1024, 128>}, {pipeline_mode = #tpu.pipeline_mode<synchronous>, transform_indices = @transform_2, window_bounds = array<i64: 1, 128>}, {transform_indices = @transform_3, window_bounds = array<i64: 8, 128>}]} {
    %c0 = arith.constant 0 : index
    %c0_0 = arith.constant 0 : index
    %0 = vector.load %arg1[%c0, %c0_0] : memref<8x1024xf32, #tpu.memory_space<vmem>>, vector<8x1024xf32>
    %c0_1 = arith.constant 0 : index
    %c0_2 = arith.constant 0 : index
    %1 = vector.load %arg2[%c0_1, %c0_2] : memref<1024x128xf32, #tpu.memory_space<vmem>>, vector<1024x128xf32>
    %cst = arith.constant dense<0.000000e+00> : vector<8x128xf32>
    %2 = tpu.matmul %0, %1, %cst {dimension_numbers = #tpu.dot_dimension_numbers<[1], [0], [0], [1], [0, 0, 1, 1], [], []>} : vector<8x1024xf32>, vector<1024x128xf32>, vector<8x128xf32> -> vector<8x128xf32>
    %c0_3 = arith.constant 0 : index
    %c0_4 = arith.constant 0 : index
    %3 = vector.load %arg3[%c0_3, %c0_4] : memref<1x128xf32, #tpu.memory_space<vmem>>, vector<1x128xf32>
    %4 = vector.broadcast %3 : vector<1x128xf32> to vector<8x128xf32>
    %5 = arith.addf %2, %4 : vector<8x128xf32>
    %cst_5 = arith.constant 0.000000e+00 : f32
    %6 = vector.broadcast %cst_5 : f32 to vector<8x128xf32>
    %7 = arith.maximumf %5, %6 : vector<8x128xf32>
    %c0_6 = arith.constant 0 : index
    %c0_7 = arith.constant 0 : index
    %8 = vector.load %arg4[%c0_6, %c0_7] : memref<8x128xf32, #tpu.memory_space<vmem>>, vector<8x128xf32>
    tpu.vector_store %arg4[%c0_6, %c0_7], %7 {strides = array<i32>} : memref<8x128xf32, #tpu.memory_space<vmem>>, vector<8x128xf32>,
    return
  }
  func.func @transform_0(%arg0: i32) -> (i32, i32) {
    %c0_i32 = arith.constant 0 : i32
    %c0_i32_0 = arith.constant 0 : i32
    return %arg0, %c0_i32 : i32, i32
  }
  func.func @transform_1(%arg0: i32) -> (i32, i32) {
    %c0_i32 = arith.constant 0 : i32
    %c0_i32_0 = arith.constant 0 : i32
    %c0_i32_1 = arith.constant 0 : i32
    return %c0_i32, %c0_i32_0 : i32, i32
  }
  func.func @transform_2(%arg0: i32) -> (i32, i32) {
    %c0_i32 = arith.constant 0 : i32
    %c0_i32_0 = arith.constant 0 : i32
    %c0_i32_1 = arith.constant 0 : i32
    return %c0_i32, %c0_i32_0 : i32, i32
  }
  func.func @transform_3(%arg0: i32) -> (i32, i32) {
    %c0_i32 = arith.constant 0 : i32
    %c0_i32_0 = arith.constant 0 : i32
    return %arg0, %c0_i32 : i32, i32
  }
}

</mosaic_0001>

<bundles_post_ra>
// kernel: encoder_forward.4
= control target key start
LH: loop header
LB: loop body
LE: loop exit
PB: predicated region body
PF: predicated region fallthrough
CT: control target
= control target key end

     0   :  { %s2250_s12 = smov 0   ;;  %s2941_s0 = inlined_call_operand.vmem [shape: f32[2048,48], index: 0, kind: input, shape index: {}]   ;;  %s2942_s1 = inlined_call_operand.vmem [shape: f32[48,16], index: 1, kind: input, shape index: {}]   ;;  %s2943_s2 = inlined_call_operand.vmem [shape: f32[1,16], index: 2, kind: input, shape index: {}]   ;;  %s2944_s3 = inlined_call_operand.vmem [shape: f32[2048,16], index: 3, kind: output, shape index: {}]  }
   0x1 LB: > { %s1718_s13 = sadd.s32 4294967295, %s2228_s12   ;;  %p1722_p0 = scmp.ge.s32.totalorder %s2228_s12, 1  ;;  %s2228_s12 = sphi %s2250_s12, %s13_s12  }
   0x2   : > { %p138_p1 = scmp.lt.s32.totalorder %s2228_s12, 3 }
   0x4   : > { %p139_p2 = pnand %p1722_p0, %p138_p1 }
   0x5   : > { %v302_v0 = vld [vmem:[%s2942_s1] sm:$0xff] (!%p139_p2)  ;;  %v303_v1 = vld [vmem:[%s2942_s1 + $0x8] sm:$0xff] (!%p139_p2)  ;;  %v304_v2 = vld [vmem:[%s2942_s1 + $0x10] sm:$0xff] (!%p139_p2)  ;;  %s1723_s20 = sshll.u32 (!%p139_p2), %s1718_s13, 7  ;;  %vm315_vm0 = vcmask (!%p139_p2), 392192   ;;  %vm1533_vm1 = vcmask (!%p139_p2), 130048  }
   0x6   : > { %142 = sbr.rel (%p139_p2) target bundleno = 363 (0x16b), region = 32  ;;  %v2196_v3 = vpack.c.bf16 (!%p139_p2), %v303_v1, %v302_v0  ;;  %v305_v4 = vld [vmem:[%s2942_s1 + $0x18] sm:$0xff] (!%p139_p2)  ;;  %p163_p3 = scmp.lt.s32.totalorder (!%p139_p2), %s1723_s20, 255  ;;  %v306_v6 = vld [vmem:[%s2942_s1 + $0x20] sm:$0xff] (!%p139_p2)  ;;  %v307_v7 = vld [vmem:[%s2942_s1 + $0x28] sm:$0xff] (!%p139_p2) }
   0x7   : > { %v2200_v5 = vpack.c.bf16 (!%p139_p2), %v305_v4, %v304_v2  ;;  %v2204_v8 = vpack.c.bf16 (!%p139_p2), %v307_v7, %v306_v6 }
   0x8   : > { %2197 = vmatprep.subr.bf16.mxu0 (!%p139_p2), %v2196_v3  ;;  %2208 = vmatprep.subr.bf16.mxu1 (!%p139_p2), %v2196_v3 }
   0x9   : > { %2199 = vmatpush3.bf16.msra.mxu0 (!%p139_p2), %v2196_v3  ;;  %2211 = vmatpush3.bf16.msra.mxu1 (!%p139_p2), %v2196_v3 }
   0xa   : > { %2201 = vmatprep.subr.bf16.mxu0 (!%p139_p2), %v2200_v5  ;;  %2209 = vmatprep.subr.bf16.mxu1 (!%p139_p2), %v2200_v5 }
   0xd   : > { %s2946_s20 = smov (!%p163_p3, %s1723_s20), 255  ;;  %2203 = vmatpush3.bf16.msra.mxu0 %v2200_v5  ;;  %2212 = vmatpush3.bf16.msra.mxu1 %v2200_v5 }
   0xe   : > { %s1724_s27 = sshll.u32 %s2946_s20, 3  ;;  %2205 = vmatprep.subr.bf16.mxu0 %v2204_v8  ;;  %2210 = vmatprep.subr.bf16.mxu1 %v2204_v8 }
   0xf   : > { %s2284_s30 = scalar_lea.vmem %s2941_s0, %s1724_s27  ;;  %s2554_s8 = scalar_lea.vmem %s2944_s3, %s1724_s27 }
  0x10   : > { %v174_v9 = vld [vmem:[%s2284_s30] sm:$0xff]  ;;  %v175_v11 = vld [vmem:[%s2284_s30 + $0x8] sm:$0xff]  ;;  %v176_v13 = vld [vmem:[%s2284_s30 + $0x10] sm:$0xff] }
  0x11   : > { %v238_v10 = vld [vmem:[%s2284_s30 + $0x200] sm:$0xff]  ;;  %2004 = vmatprep.mubr.msk.f32.mxu0 %vm315_vm0, %v174_v9  ;;  %2207 = vmatpush3.bf16.msra.mxu0 %v2204_v8  ;;  %v239_v12 = vld [vmem:[%s2284_s30 + $0x208] sm:$0xff]  ;;  %v240_v14 = vld [vmem:[%s2284_s30 + $0x210] sm:$0xff] }
  0x12   : > { %2100 = vmatprep.mubr.msk.f32.mxu1 %vm315_vm0, %v238_v10  ;;  %2213 = vmatpush3.bf16.msra.mxu1 %v2204_v8  ;;  %v177_v15 = vld [vmem:[%s2284_s30 + $0x18] sm:$0xff]  ;;  %v178_v17 = vld [vmem:[%s2284_s30 + $0x20] sm:$0xff]  ;;  %v179_v19 = vld [vmem:[%s2284_s30 + $0x28] sm:$0xff] }
  0x13   : > { %v241_v16 = vld [vmem:[%s2284_s30 + $0x218] sm:$0xff]  ;;  %v242_v18 = vld [vmem:[%s2284_s30 + $0x220] sm:$0xff]  ;;  %v243_v20 = vld [vmem:[%s2284_s30 + $0x228] sm:$0xff] }
  0x14   : > { %2005 = vmatmul.mubr.msk.f32.vlgmr.msra.gmra.mrb[0].mxu0 %vm315_vm0, %v175_v11  ;;  %v180_v21 = vld [vmem:[%s2284_s30 + $0x30] sm:$0xff]  ;;  %v181_v23 = vld [vmem:[%s2284_s30 + $0x38] sm:$0xff]  ;;  %v182_v25 = vld [vmem:[%s2284_s30 + $0x40] sm:$0xff] }
  0x15   : > { %2101 = vmatmul.mubr.msk.f32.vlgmr.msra.gmra.mrb[0].mxu1 %vm315_vm0, %v239_v12  ;;  %2007 = vmatprep.mubr.msk.f32.mxu0 %vm315_vm0, %v176_v13  ;;  %v244_v22 = vld [vmem:[%s2284_s30 + $0x230] sm:$0xff]  ;;  %v245_v24 = vld [vmem:[%s2284_s30 + $0x238] sm:$0xff]  ;;  %v246_v26 = vld [vmem:[%s2284_s30 + $0x240] sm:$0xff] }
  0x16   : > { %2103 = vmatprep.mubr.msk.f32.mxu1 %vm315_vm0, %v240_v14  ;;  %v183_v27 = vld [vmem:[%s2284_s30 + $0x48] sm:$0xff]  ;;  %v184_v29 = vld [vmem:[%s2284_s30 + $0x50] sm:$0xff]  ;;  %v185_v31 = vld [vmem:[%s2284_s30 + $0x58] sm:$0xff] }
  0x17   : > { %v247_v28 = vld [vmem:[%s2284_s30 + $0x248] sm:$0xff]  ;;  %v248_v30 = vld [vmem:[%s2284_s30 + $0x250] sm:$0xff]  ;;  %v249_v32 = vld [vmem:[%s2284_s30 + $0x258] sm:$0xff] }
  0x18   : > { %2008 = vmatmul.mubr.msk.f32.gmra.mrb[2].mxu0 %vm315_vm0, %v177_v15  ;;  %v186_v33 = vld [vmem:[%s2284_s30 + $0x60] sm:$0xff]  ;;  %v187_v35 = vld [vmem:[%s2284_s30 + $0x68] sm:$0xff]  ;;  %v188_v37 = vld [vmem:[%s2284_s30 + $0x70] sm:$0xff] }
  0x19   : > { %2104 = vmatmul.mubr.msk.f32.gmra.mrb[2].mxu1 %vm315_vm0, %v241_v16  ;;  %2010 = vmatprep.mubr.msk.f32.mxu0 %vm315_vm0, %v178_v17  ;;  %v250_v34 = vld [vmem:[%s2284_s30 + $0x260] sm:$0xff]  ;;  %v251_v36 = vld [vmem:[%s2284_s30 + $0x268] sm:$0xff]  ;;  %v252_v38 = vld [vmem:[%s2284_s30 + $0x270] sm:$0xff] }
  0x1a   : > { %2106 = vmatprep.mubr.msk.f32.mxu1 %vm315_vm0, %v242_v18  ;;  %v189_v39 = vld [vmem:[%s2284_s30 + $0x78] sm:$0xff]  ;;  %v190_v41 = vld [vmem:[%s2284_s30 + $0x80] sm:$0xff]  ;;  %v191_v43 = vld [vmem:[%s2284_s30 + $0x88] sm:$0xff] }
  0x1b   : > { %v253_v40 = vld [vmem:[%s2284_s30 + $0x278] sm:$0xff]  ;;  %v254_v42 = vld [vmem:[%s2284_s30 + $0x280] sm:$0xff]  ;;  %v255_v44 = vld [vmem:[%s2284_s30 + $0x288] sm:$0xff] }
  0x1c   : > { %2011 = vmatmul.mubr.msk.f32.gmra.mrb[4].mxu0 %vm315_vm0, %v179_v19  ;;  %v192_v45 = vld [vmem:[%s2284_s30 + $0x90] sm:$0xff]  ;;  %v193_v47 = vld [vmem:[%s2284_s30 + $0x98] sm:$0xff]  ;;  %v194_v49 = vld [vmem:[%s2284_s30 + $0xa0] sm:$0xff] }
  0x1d   : > { %2107 = vmatmul.mubr.msk.f32.gmra.mrb[4].mxu1 %vm315_vm0, %v243_v20  ;;  %2013 = vmatprep.mubr.msk.f32.mxu0 %vm315_vm0, %v180_v21  ;;  %v256_v46 = vld [vmem:[%s2284_s30 + $0x290] sm:$0xff]  ;;  %v257_v48 = vld [vmem:[%s2284_s30 + $0x298] sm:$0xff]  ;;  %v258_v50 = vld [vmem:[%s2284_s30 + $0x2a0] sm:$0xff] }
  0x1e   : > { %2109 = vmatprep.mubr.msk.f32.mxu1 %vm315_vm0, %v244_v22  ;;  %v195_v51 = vld [vmem:[%s2284_s30 + $0xa8] sm:$0xff]  ;;  %v196_v53 = vld [vmem:[%s2284_s30 + $0xb0] sm:$0xff]  ;;  %v197_v55 = vld [vmem:[%s2284_s30 + $0xb8] sm:$0xff] }
  0x1f   : > { %v259_v52 = vld [vmem:[%s2284_s30 + $0x2a8] sm:$0xff]  ;;  %v260_v54 = vld [vmem:[%s2284_s30 + $0x2b0] sm:$0xff]  ;;  %v261_v56 = vld [vmem:[%s2284_s30 + $0x2b8] sm:$0xff] }
  0x20   : > { %2014 = vmatmul.mubr.msk.f32.gmra.mrb[6].mxu0 %vm315_vm0, %v181_v23  ;;  %v198_v57 = vld [vmem:[%s2284_s30 + $0xc0] sm:$0xff]  ;;  %v199_v59 = vld [vmem:[%s2284_s30 + $0xc8] sm:$0xff]  ;;  %v200_v61 = vld [vmem:[%s2284_s30 + $0xd0] sm:$0xff] }
  0x21   : > { %2110 = vmatmul.mubr.msk.f32.gmra.mrb[6].mxu1 %vm315_vm0, %v245_v24  ;;  %2016 = vmatprep.mubr.msk.f32.mxu0 %vm315_vm0, %v182_v25  ;;  %v262_v58 = vld [vmem:[%s2284_s30 + $0x2c0] sm:$0xff]  ;;  %v263_v60 = vld [vmem:[%s2284_s30 + $0x2c8] sm:$0xff]  ;;  %v264_v62 = vld [vmem:[%s2284_s30 + $0x2d0] sm:$0xff] }
  0x22   : > { %2112 = vmatprep.mubr.msk.f32.mxu1 %vm315_vm0, %v246_v26  ;;  %v201_v63 = vld [vmem:[%s2284_s30 + $0xd8] sm:$0xff]  ;;  %v202_v1 = vld [vmem:[%s2284_s30 + $0xe0] sm:$0xff]  ;;  %v203_v3 = vld [vmem:[%s2284_s30 + $0xe8] sm:$0xff] }
  0x23   : > { %v265_v0 = vld [vmem:[%s2284_s30 + $0x2d8] sm:$0xff]  ;;  %v266_v2 = vld [vmem:[%s2284_s30 + $0x2e0] sm:$0xff]  ;;  %v267_v4 = vld [vmem:[%s2284_s30 + $0x2e8] sm:$0xff] }
  0x24   : > { %2017 = vmatmul.mubr.msk.f32.gmra.mrb[8].mxu0 %vm315_vm0, %v183_v27  ;;  %v204_v5 = vld [vmem:[%s2284_s30 + $0xf0] sm:$0xff]  ;;  %v205_v7 = vld [vmem:[%s2284_s30 + $0xf8] sm:$0xff]  ;;  %v206_v9 = vld [vmem:[%s2284_s30 + $0x100] sm:$0xff] }
  0x25   : > { %2113 = vmatmul.mubr.msk.f32.gmra.mrb[8].mxu1 %vm315_vm0, %v247_v28  ;;  %2019 = vmatprep.mubr.msk.f32.mxu0 %vm315_vm0, %v184_v29  ;;  %v268_v6 = vld [vmem:[%s2284_s30 + $0x2f0] sm:$0xff]  ;;  %v269_v8 = vld [vmem:[%s2284_s30 + $0x2f8] sm:$0xff]  ;;  %v270_v10 = vld [vmem:[%s2284_s30 + $0x300] sm:$0xff] }
  0x26   : > { %2115 = vmatprep.mubr.msk.f32.mxu1 %vm315_vm0, %v248_v30  ;;  %v207_v11 = vld [vmem:[%s2284_s30 + $0x108] sm:$0xff]  ;;  %v208_v13 = vld [vmem:[%s2284_s30 + $0x110] sm:$0xff]  ;;  %v209_v15 = vld [vmem:[%s2284_s30 + $0x118] sm:$0xff] }
  0x27   : > { %v271_v12 = vld [vmem:[%s2284_s30 + $0x308] sm:$0xff]  ;;  %v272_v14 = vld [vmem:[%s2284_s30 + $0x310] sm:$0xff]  ;;  %v273_v16 = vld [vmem:[%s2284_s30 + $0x318] sm:$0xff] }
  0x28   : > { %2020 = vmatmul.mubr.msk.f32.gmra.mrb[10].mxu0 %vm315_vm0, %v185_v31  ;;  %v210_v17 = vld [vmem:[%s2284_s30 + $0x120] sm:$0xff]  ;;  %v211_v19 = vld [vmem:[%s2284_s30 + $0x128] sm:$0xff]  ;;  %v212_v21 = vld [vmem:[%s2284_s30 + $0x130] sm:$0xff] }
  0x29   : > { %2116 = vmatmul.mubr.msk.f32.gmra.mrb[10].mxu1 %vm315_vm0, %v249_v32  ;;  %2022 = vmatprep.mubr.msk.f32.mxu0 %vm315_vm0, %v186_v33  ;;  %v274_v18 = vld [vmem:[%s2284_s30 + $0x320] sm:$0xff]  ;;  %v275_v20 = vld [vmem:[%s2284_s30 + $0x328] sm:$0xff]  ;;  %v276_v22 = vld [vmem:[%s2284_s30 + $0x330] sm:$0xff] }
  0x2a   : > { %2118 = vmatprep.mubr.msk.f32.mxu1 %vm315_vm0, %v250_v34  ;;  %v213_v23 = vld [vmem:[%s2284_s30 + $0x138] sm:$0xff]  ;;  %v214_v25 = vld [vmem:[%s2284_s30 + $0x140] sm:$0xff]  ;;  %v215_v27 = vld [vmem:[%s2284_s30 + $0x148] sm:$0xff] }
  0x2b   : > { %v277_v24 = vld [vmem:[%s2284_s30 + $0x338] sm:$0xff]  ;;  %v278_v26 = vld [vmem:[%s2284_s30 + $0x340] sm:$0xff]  ;;  %v279_v28 = vld [vmem:[%s2284_s30 + $0x348] sm:$0xff] }
  0x2c   : > { %2023 = vmatmul.mubr.msk.f32.gmra.mrb[12].mxu0 %vm315_vm0, %v187_v35  ;;  %v216_v29 = vld [vmem:[%s2284_s30 + $0x150] sm:$0xff]  ;;  %v217_v31 = vld [vmem:[%s2284_s30 + $0x158] sm:$0xff]  ;;  %v218_v33 = vld [vmem:[%s2284_s30 + $0x160] sm:$0xff] }
  0x2d   : > { %2119 = vmatmul.mubr.msk.f32.gmra.mrb[12].mxu1 %vm315_vm0, %v251_v36  ;;  %2025 = vmatprep.mubr.msk.f32.mxu0 %vm315_vm0, %v188_v37  ;;  %v280_v30 = vld [vmem:[%s2284_s30 + $0x350] sm:$0xff]  ;;  %v281_v32 = vld [vmem:[%s2284_s30 + $0x358] sm:$0xff]  ;;  %v282_v34 = vld [vmem:[%s2284_s30 + $0x360] sm:$0xff] }
  0x2e   : > { %2121 = vmatprep.mubr.msk.f32.mxu1 %vm315_vm0, %v252_v38  ;;  %v219_v35 = vld [vmem:[%s2284_s30 + $0x168] sm:$0xff]  ;;  %v220_v37 = vld [vmem:[%s2284_s30 + $0x170] sm:$0xff] }
  0x2f   : > { %v283_v36 = vld [vmem:[%s2284_s30 + $0x368] sm:$0xff]  ;;  %v284_v38 = vld [vmem:[%s2284_s30 + $0x370] sm:$0xff] }
  0x30   : > { %2026 = vmatmul.mubr.msk.f32.gmra.mrb[14].mxu0 %vm315_vm0, %v189_v39  ;;  %v221_v39 = vld [vmem:[%s2284_s30 + $0x178] sm:$0xff] }
  0x31   : > { %2122 = vmatmul.mubr.msk.f32.gmra.mrb[14].mxu1 %vm315_vm0, %v253_v40  ;;  %2028 = vmatprep.mubr.msk.f32.mxu0 %vm315_vm0, %v190_v41  ;;  %v285_v40 = vld [vmem:[%s2284_s30 + $0x378] sm:$0xff]  ;;  %v222_v41 = vld [vmem:[%s2284_s30 + $0x180] sm:$0xff] }
  0x32   : > { %2124 = vmatprep.mubr.msk.f32.mxu1 %vm315_vm0, %v254_v42  ;;  %v286_v42 = vld [vmem:[%s2284_s30 + $0x380] sm:$0xff] }
  0x34   : > { %2029 = vmatmul.mubr.msk.f32.gmra.mrb[16].mxu0 %vm315_vm0, %v191_v43  ;;  %v223_v43 = vld [vmem:[%s2284_s30 + $0x188] sm:$0xff] }
  0x35   : > { %2125 = vmatmul.mubr.msk.f32.gmra.mrb[16].mxu1 %vm315_vm0, %v255_v44  ;;  %2031 = vmatprep.mubr.msk.f32.mxu0 %vm315_vm0, %v192_v45  ;;  %v287_v44 = vld [vmem:[%s2284_s30 + $0x388] sm:$0xff]  ;;  %v224_v45 = vld [vmem:[%s2284_s30 + $0x190] sm:$0xff] }
  0x36   : > { %2127 = vmatprep.mubr.msk.f32.mxu1 %vm315_vm0, %v256_v46  ;;  %v288_v46 = vld [vmem:[%s2284_s30 + $0x390] sm:$0xff] }
  0x38   : > { %2032 = vmatmul.mubr.msk.f32.gmra.mrb[18].mxu0 %vm315_vm0, %v193_v47  ;;  %v225_v47 = vld [vmem:[%s2284_s30 + $0x198] sm:$0xff] }
  0x39   : > { %2128 = vmatmul.mubr.msk.f32.gmra.mrb[18].mxu1 %vm315_vm0, %v257_v48  ;;  %2034 = vmatprep.mubr.msk.f32.mxu0 %vm315_vm0, %v194_v49  ;;  %v289_v48 = vld [vmem:[%s2284_s30 + $0x398] sm:$0xff]  ;;  %v226_v49 = vld [vmem:[%s2284_s30 + $0x1a0] sm:$0xff] }
  0x3a   : > { %2130 = vmatprep.mubr.msk.f32.mxu1 %vm315_vm0, %v258_v50  ;;  %v290_v50 = vld [vmem:[%s2284_s30 + $0x3a0] sm:$0xff] }
  0x3c   : > { %2035 = vmatmul.mubr.msk.f32.gmra.mrb[20].mxu0 %vm315_vm0, %v195_v51  ;;  %v227_v51 = vld [vmem:[%s2284_s30 + $0x1a8] sm:$0xff] }
  0x3d   : > { %2131 = vmatmul.mubr.msk.f32.gmra.mrb[20].mxu1 %vm315_vm0, %v259_v52  ;;  %2037 = vmatprep.mubr.msk.f32.mxu0 %vm315_vm0, %v196_v53  ;;  %v291_v52 = vld [vmem:[%s2284_s30 + $0x3a8] sm:$0xff]  ;;  %v228_v53 = vld [vmem:[%s2284_s30 + $0x1b0] sm:$0xff] }
  0x3e   : > { %2133 = vmatprep.mubr.msk.f32.mxu1 %vm315_vm0, %v260_v54  ;;  %v292_v54 = vld [vmem:[%s2284_s30 + $0x3b0] sm:$0xff] }
  0x40   : > { %2038 = vmatmul.mubr.msk.f32.gmra.mrb[22].mxu0 %vm315_vm0, %v197_v55  ;;  %v229_v55 = vld [vmem:[%s2284_s30 + $0x1b8] sm:$0xff] }
  0x41   : > { %2134 = vmatmul.mubr.msk.f32.gmra.mrb[22].mxu1 %vm315_vm0, %v261_v56  ;;  %2040 = vmatprep.mubr.msk.f32.mxu0 %vm315_vm0, %v198_v57  ;;  %v293_v56 = vld [vmem:[%s2284_s30 + $0x3b8] sm:$0xff]  ;;  %v230_v57 = vld [vmem:[%s2284_s30 + $0x1c0] sm:$0xff] }
  0x42   : > { %2136 = vmatprep.mubr.msk.f32.mxu1 %vm315_vm0, %v262_v58  ;;  %v294_v58 = vld [vmem:[%s2284_s30 + $0x3c0] sm:$0xff] }
  0x44   : > { %2041 = vmatmul.mubr.msk.f32.gmra.mrb[24].mxu0 %vm315_vm0, %v199_v59  ;;  %v231_v59 = vld [vmem:[%s2284_s30 + $0x1c8] sm:$0xff] }
  0x45   : > { %2137 = vmatmul.mubr.msk.f32.gmra.mrb[24].mxu1 %vm315_vm0, %v263_v60  ;;  %2043 = vmatprep.mubr.msk.f32.mxu0 %vm315_vm0, %v200_v61  ;;  %v295_v60 = vld [vmem:[%s2284_s30 + $0x3c8] sm:$0xff]  ;;  %v232_v61 = vld [vmem:[%s2284_s30 + $0x1d0] sm:$0xff] }
  0x46   : > { %2139 = vmatprep.mubr.msk.f32.mxu1 %vm315_vm0, %v264_v62  ;;  %v296_v62 = vld [vmem:[%s2284_s30 + $0x3d0] sm:$0xff] }
  0x48   : > { %2044 = vmatmul.mubr.msk.f32.gmra.mrb[26].mxu0 %vm315_vm0, %v201_v63  ;;  %v233_v63 = vld [vmem:[%s2284_s30 + $0x1d8] sm:$0xff] }
  0x49   : > { %2140 = vmatmul.mubr.msk.f32.gmra.mrb[26].mxu1 %vm315_vm0, %v265_v0  ;;  %2046 = vmatprep.mubr.msk.f32.mxu0 %vm315_vm0, %v202_v1  ;;  %v297_v0 = vld [vmem:[%s2284_s30 + $0x3d8] sm:$0xff]  ;;  %v234_v1 = vld [vmem:[%s2284_s30 + $0x1e0] sm:$0xff] }
  0x4a   : > { %2142 = vmatprep.mubr.msk.f32.mxu1 %vm315_vm0, %v266_v2  ;;  %v298_v2 = vld [vmem:[%s2284_s30 + $0x3e0] sm:$0xff] }
  0x4c   : > { %2047 = vmatmul.mubr.msk.f32.gmra.mrb[28].mxu0 %vm315_vm0, %v203_v3  ;;  %v235_v3 = vld [vmem:[%s2284_s30 + $0x1e8] sm:$0xff] }
  0x4d   : > { %2143 = vmatmul.mubr.msk.f32.gmra.mrb[28].mxu1 %vm315_vm0, %v267_v4  ;;  %2049 = vmatprep.mubr.msk.f32.mxu0 %vm315_vm0, %v204_v5  ;;  %v299_v4 = vld [vmem:[%s2284_s30 + $0x3e8] sm:$0xff]  ;;  %v236_v5 = vld [vmem:[%s2284_s30 + $0x1f0] sm:$0xff] }
  0x4e   : > { %2145 = vmatprep.mubr.msk.f32.mxu1 %vm315_vm0, %v268_v6  ;;  %v300_v6 = vld [vmem:[%s2284_s30 + $0x3f0] sm:$0xff] }
  0x50   : > { %2050 = vmatmul.mubr.msk.f32.gmra.mrb[30].mxu0 %vm315_vm0, %v205_v7  ;;  %v237_v7 = vld [vmem:[%s2284_s30 + $0x1f8] sm:$0xff] }
  0x51   : > { %2146 = vmatmul.mubr.msk.f32.gmra.mrb[30].mxu1 %vm315_vm0, %v269_v8  ;;  %2052 = vmatprep.mubr.msk.f32.mxu0 %vm315_vm0, %v206_v9  ;;  %v301_v8 = vld [vmem:[%s2284_s30 + $0x3f8] sm:$0xff]  ;;  %v2545_v9 = vld [vmem:[%s2943_s2] ss:$0 sm:$0xff] }
  0x52   : > { %2148 = vmatprep.mubr.msk.f32.mxu1 %vm315_vm0, %v270_v10 }
  0x54   : > { %2053 = vmatmul.mubr.msk.f32.gmra.mrb[32].mxu0 %vm315_vm0, %v207_v11 }
  0x55   : > { %2149 = vmatmul.mubr.msk.f32.gmra.mrb[32].mxu1 %vm315_vm0, %v271_v12  ;;  %2055 = vmatprep.mubr.msk.f32.mxu0 %vm315_vm0, %v208_v13 }
  0x56   : > { %2151 = vmatprep.mubr.msk.f32.mxu1 %vm315_vm0, %v272_v14 }
  0x58   : > { %2056 = vmatmul.mubr.msk.f32.gmra.mrb[34].mxu0 %vm315_vm0, %v209_v15 }
  0x59   : > { %2152 = vmatmul.mubr.msk.f32.gmra.mrb[34].mxu1 %vm315_vm0, %v273_v16  ;;  %2058 = vmatprep.mubr.msk.f32.mxu0 %vm315_vm0, %v210_v17 }
  0x5a   : > { %2154 = vmatprep.mubr.msk.f32.mxu1 %vm315_vm0, %v274_v18 }
  0x5c   : > { %2059 = vmatmul.mubr.msk.f32.gmra.mrb[36].mxu0 %vm315_vm0, %v211_v19 }
  0x5d   : > { %2155 = vmatmul.mubr.msk.f32.gmra.mrb[36].mxu1 %vm315_vm0, %v275_v20  ;;  %2061 = vmatprep.mubr.msk.f32.mxu0 %vm315_vm0, %v212_v21 }
  0x5e   : > { %2157 = vmatprep.mubr.msk.f32.mxu1 %vm315_vm0, %v276_v22 }
  0x60   : > { %2062 = vmatmul.mubr.msk.f32.gmra.mrb[38].mxu0 %vm315_vm0, %v213_v23 }
  0x61   : > { %2158 = vmatmul.mubr.msk.f32.gmra.mrb[38].mxu1 %vm315_vm0, %v277_v24  ;;  %2064 = vmatprep.mubr.msk.f32.mxu0 %vm315_vm0, %v214_v25 }
  0x62   : > { %2160 = vmatprep.mubr.msk.f32.mxu1 %vm315_vm0, %v278_v26 }
  0x64   : > { %2065 = vmatmul.mubr.msk.f32.gmra.mrb[40].mxu0 %vm315_vm0, %v215_v27 }
  0x65   : > { %2161 = vmatmul.mubr.msk.f32.gmra.mrb[40].mxu1 %vm315_vm0, %v279_v28  ;;  %2067 = vmatprep.mubr.msk.f32.mxu0 %vm315_vm0, %v216_v29 }
  0x66   : > { %2163 = vmatprep.mubr.msk.f32.mxu1 %vm315_vm0, %v280_v30 }
  0x68   : > { %2068 = vmatmul.mubr.msk.f32.gmra.mrb[42].mxu0 %vm315_vm0, %v217_v31 }
  0x69   : > { %2164 = vmatmul.mubr.msk.f32.gmra.mrb[42].mxu1 %vm315_vm0, %v281_v32  ;;  %2070 = vmatprep.mubr.msk.f32.mxu0 %vm315_vm0, %v218_v33 }
  0x6a   : > { %2166 = vmatprep.mubr.msk.f32.mxu1 %vm315_vm0, %v282_v34 }
  0x6c   : > { %2071 = vmatmul.mubr.msk.f32.gmra.mrb[44].mxu0 %vm315_vm0, %v219_v35 }
  0x6d   : > { %2167 = vmatmul.mubr.msk.f32.gmra.mrb[44].mxu1 %vm315_vm0, %v283_v36  ;;  %2073 = vmatprep.mubr.msk.f32.mxu0 %vm315_vm0, %v220_v37 }
  0x6e   : > { %2169 = vmatprep.mubr.msk.f32.mxu1 %vm315_vm0, %v284_v38 }
  0x70   : > { %2074 = vmatmul.mubr.msk.f32.gmra.mrb[46].mxu0 %vm315_vm0, %v221_v39 }
  0x71   : > { %2170 = vmatmul.mubr.msk.f32.gmra.mrb[46].mxu1 %vm315_vm0, %v285_v40  ;;  %2076 = vmatprep.mubr.msk.f32.mxu0 %vm315_vm0, %v222_v41 }
  0x72   : > { %2172 = vmatprep.mubr.msk.f32.mxu1 %vm315_vm0, %v286_v42 }
  0x74   : > { %2077 = vmatmul.mubr.msk.f32.gmra.mrb[48].mxu0 %vm315_vm0, %v223_v43 }
  0x75   : > { %2173 = vmatmul.mubr.msk.f32.gmra.mrb[48].mxu1 %vm315_vm0, %v287_v44  ;;  %2079 = vmatprep.mubr.msk.f32.mxu0 %vm315_vm0, %v224_v45 }
  0x76   : > { %2175 = vmatprep.mubr.msk.f32.mxu1 %vm315_vm0, %v288_v46 }
  0x78   : > { %2080 = vmatmul.mubr.msk.f32.gmra.mrb[50].mxu0 %vm315_vm0, %v225_v47 }
  0x79   : > { %2176 = vmatmul.mubr.msk.f32.gmra.mrb[50].mxu1 %vm315_vm0, %v289_v48  ;;  %2082 = vmatprep.mubr.msk.f32.mxu0 %vm315_vm0, %v226_v49 }
  0x7a   : > { %2178 = vmatprep.mubr.msk.f32.mxu1 %vm315_vm0, %v290_v50 }
  0x7c   : > { %2083 = vmatmul.mubr.msk.f32.gmra.mrb[52].mxu0 %vm315_vm0, %v227_v51 }
  0x7d   : > { %2179 = vmatmul.mubr.msk.f32.gmra.mrb[52].mxu1 %vm315_vm0, %v291_v52  ;;  %2085 = vmatprep.mubr.msk.f32.mxu0 %vm315_vm0, %v228_v53 }
  0x7e   : > { %2181 = vmatprep.mubr.msk.f32.mxu1 %vm315_vm0, %v292_v54 }
  0x80   : > { %2086 = vmatmul.mubr.msk.f32.gmra.mrb[54].mxu0 %vm315_vm0, %v229_v55 }
  0x81   : > { %2182 = vmatmul.mubr.msk.f32.gmra.mrb[54].mxu1 %vm315_vm0, %v293_v56  ;;  %2088 = vmatprep.mubr.msk.f32.mxu0 %vm315_vm0, %v230_v57 }
  0x82   : > { %2184 = vmatprep.mubr.msk.f32.mxu1 %vm315_vm0, %v294_v58 }
  0x84   : > { %2089 = vmatmul.mubr.msk.f32.gmra.mrb[56].mxu0 %vm315_vm0, %v231_v59 }
  0x85   : > { %2185 = vmatmul.mubr.msk.f32.gmra.mrb[56].mxu1 %vm315_vm0, %v295_v60  ;;  %2091 = vmatprep.mubr.msk.f32.mxu0 %vm315_vm0, %v232_v61 }
  0x86   : > { %2187 = vmatprep.mubr.msk.f32.mxu1 %vm315_vm0, %v296_v62 }
  0x88   : > { %2092 = vmatmul.mubr.msk.f32.gmra.mrb[58].mxu0 %vm315_vm0, %v233_v63 }
  0x89   : > { %2188 = vmatmul.mubr.msk.f32.gmra.mrb[58].mxu1 %vm315_vm0, %v297_v0  ;;  %2094 = vmatprep.mubr.msk.f32.mxu0 %vm315_vm0, %v234_v1 }
  0x8a   : > { %2190 = vmatprep.mubr.msk.f32.mxu1 %vm315_vm0, %v298_v2 }
  0x8c   : > { %2095 = vmatmul.mubr.msk.f32.gmra.mrb[60].mxu0 %vm315_vm0, %v235_v3 }
  0x8d   : > { %2191 = vmatmul.mubr.msk.f32.gmra.mrb[60].mxu1 %vm315_vm0, %v299_v4  ;;  %2097 = vmatprep.mubr.msk.f32.mxu0 %vm315_vm0, %v236_v5 }
  0x8e   : > { %2193 = vmatprep.mubr.msk.f32.mxu1 %vm315_vm0, %v300_v6 }
  0x90   : > { %2098 = vmatmul.mubr.msk.f32.gmra.mrb[62].mxu0 %vm315_vm0, %v237_v7 }
  0x91   : > { %2194 = vmatmul.mubr.msk.f32.gmra.mrb[62].mxu1 %vm315_vm0, %v301_v8 }
  0xe7   : > { %v2006_v10 = vpop.f32.mrb[0].mxu0 }
  0xe8   : > { %v2102_v11 = vpop.f32.mrb[0].mxu1  ;;  %v772_v12 = vadd.f32 %v2006_v10, %v2545_v9  ;;  %v766_v14 = vpop.f32.mrb[1].mxu0 }
  0xe9   : > { %v1092_v13 = vadd.f32 %v2102_v11, %v2545_v9  ;;  %v1086_v15 = vpop.f32.mrb[1].mxu1  ;;  %v767_v16 = vadd.f32 %v2545_v9, %v766_v14 }
  0xea   : > { %v1087_v17 = vadd.f32 %v2545_v9, %v1086_v15  ;;  %v1406_v18 = vmax.f32 %v772_v12, 0.0 }
  0xeb   : > { %v1470_v19 = vmax.f32 %v1092_v13, 0.0  ;;  %v1405_v20 = vmax.f32 %v767_v16, 0.0  ;;  %v2009_v22 = vpop.f32.mrb[2].mxu0 }
  0xec   : > { %v1469_v21 = vmax.f32 %v1087_v17, 0.0  ;;  %v2105_v23 = vpop.f32.mrb[2].mxu1  ;;  %1535 = vst.msk [vmem:[%s2554_s8 + $0x8] sm:$0xff] %vm1533_vm1, %v1406_v18  ;;  %v782_v24 = vadd.f32 %v2009_v22, %v2545_v9  ;;  %v776_v26 = vpop.f32.mrb[3].mxu0 }
  0xed   : > { %1599 = vst.msk [vmem:[%s2554_s8 + $0x208] sm:$0xff] %vm1533_vm1, %v1470_v19  ;;  %v1102_v25 = vadd.f32 %v2105_v23, %v2545_v9  ;;  %v1096_v27 = vpop.f32.mrb[3].mxu1  ;;  %1534 = vst.msk [vmem:[%s2554_s8] sm:$0xff] %vm1533_vm1, %v1405_v20  ;;  %v777_v28 = vadd.f32 %v2545_v9, %v776_v26 }
  0xee   : > { %1598 = vst.msk [vmem:[%s2554_s8 + $0x200] sm:$0xff] %vm1533_vm1, %v1469_v21  ;;  %v1097_v29 = vadd.f32 %v2545_v9, %v1096_v27  ;;  %v1408_v30 = vmax.f32 %v782_v24, 0.0 }
  0xef   : > { %v1472_v31 = vmax.f32 %v1102_v25, 0.0  ;;  %v1407_v32 = vmax.f32 %v777_v28, 0.0  ;;  %v2012_v34 = vpop.f32.mrb[4].mxu0 }
  0xf0   : > { %v1471_v33 = vmax.f32 %v1097_v29, 0.0  ;;  %v2108_v35 = vpop.f32.mrb[4].mxu1  ;;  %1537 = vst.msk [vmem:[%s2554_s8 + $0x18] sm:$0xff] %vm1533_vm1, %v1408_v30  ;;  %v792_v36 = vadd.f32 %v2012_v34, %v2545_v9  ;;  %v786_v38 = vpop.f32.mrb[5].mxu0 }
  0xf1   : > { %1601 = vst.msk [vmem:[%s2554_s8 + $0x218] sm:$0xff] %vm1533_vm1, %v1472_v31  ;;  %v1112_v37 = vadd.f32 %v2108_v35, %v2545_v9  ;;  %v1106_v39 = vpop.f32.mrb[5].mxu1  ;;  %1536 = vst.msk [vmem:[%s2554_s8 + $0x10] sm:$0xff] %vm1533_vm1, %v1407_v32  ;;  %v787_v40 = vadd.f32 %v2545_v9, %v786_v38 }
  0xf2   : > { %1600 = vst.msk [vmem:[%s2554_s8 + $0x210] sm:$0xff] %vm1533_vm1, %v1471_v33  ;;  %v1107_v41 = vadd.f32 %v2545_v9, %v1106_v39  ;;  %v1410_v42 = vmax.f32 %v792_v36, 0.0 }
  0xf3   : > { %v1474_v43 = vmax.f32 %v1112_v37, 0.0  ;;  %v1409_v44 = vmax.f32 %v787_v40, 0.0  ;;  %v2015_v46 = vpop.f32.mrb[6].mxu0 }
  0xf4   : > { %v1473_v45 = vmax.f32 %v1107_v41, 0.0  ;;  %v2111_v47 = vpop.f32.mrb[6].mxu1  ;;  %1539 = vst.msk [vmem:[%s2554_s8 + $0x28] sm:$0xff] %vm1533_vm1, %v1410_v42  ;;  %v802_v48 = vadd.f32 %v2015_v46, %v2545_v9  ;;  %v796_v50 = vpop.f32.mrb[7].mxu0 }
  0xf5   : > { %1603 = vst.msk [vmem:[%s2554_s8 + $0x228] sm:$0xff] %vm1533_vm1, %v1474_v43  ;;  %v1122_v49 = vadd.f32 %v2111_v47, %v2545_v9  ;;  %v1116_v51 = vpop.f32.mrb[7].mxu1  ;;  %1538 = vst.msk [vmem:[%s2554_s8 + $0x20] sm:$0xff] %vm1533_vm1, %v1409_v44  ;;  %v797_v52 = vadd.f32 %v2545_v9, %v796_v50 }
  0xf6   : > { %1602 = vst.msk [vmem:[%s2554_s8 + $0x220] sm:$0xff] %vm1533_vm1, %v1473_v45  ;;  %v1117_v53 = vadd.f32 %v2545_v9, %v1116_v51  ;;  %v1412_v54 = vmax.f32 %v802_v48, 0.0 }
  0xf7   : > { %v1476_v55 = vmax.f32 %v1122_v49, 0.0  ;;  %v1411_v56 = vmax.f32 %v797_v52, 0.0  ;;  %v2018_v58 = vpop.f32.mrb[8].mxu0 }
  0xf8   : > { %v1475_v57 = vmax.f32 %v1117_v53, 0.0  ;;  %v2114_v59 = vpop.f32.mrb[8].mxu1  ;;  %1541 = vst.msk [vmem:[%s2554_s8 + $0x38] sm:$0xff] %vm1533_vm1, %v1412_v54  ;;  %v812_v60 = vadd.f32 %v2018_v58, %v2545_v9  ;;  %v806_v62 = vpop.f32.mrb[9].mxu0 }
  0xf9   : > { %1605 = vst.msk [vmem:[%s2554_s8 + $0x238] sm:$0xff] %vm1533_vm1, %v1476_v55  ;;  %v1132_v61 = vadd.f32 %v2114_v59, %v2545_v9  ;;  %v1126_v63 = vpop.f32.mrb[9].mxu1  ;;  %1540 = vst.msk [vmem:[%s2554_s8 + $0x30] sm:$0xff] %vm1533_vm1, %v1411_v56  ;;  %v807_v0 = vadd.f32 %v2545_v9, %v806_v62 }
  0xfa   : > { %1604 = vst.msk [vmem:[%s2554_s8 + $0x230] sm:$0xff] %vm1533_vm1, %v1475_v57  ;;  %v1127_v1 = vadd.f32 %v2545_v9, %v1126_v63  ;;  %v1414_v2 = vmax.f32 %v812_v60, 0.0 }
  0xfb   : > { %v1478_v3 = vmax.f32 %v1132_v61, 0.0  ;;  %v1413_v4 = vmax.f32 %v807_v0, 0.0  ;;  %v2021_v6 = vpop.f32.mrb[10].mxu0 }
  0xfc   : > { %v1477_v5 = vmax.f32 %v1127_v1, 0.0  ;;  %v2117_v7 = vpop.f32.mrb[10].mxu1  ;;  %1543 = vst.msk [vmem:[%s2554_s8 + $0x48] sm:$0xff] %vm1533_vm1, %v1414_v2  ;;  %v822_v8 = vadd.f32 %v2021_v6, %v2545_v9  ;;  %v816_v11 = vpop.f32.mrb[11].mxu0 }
  0xfd   : > { %1607 = vst.msk [vmem:[%s2554_s8 + $0x248] sm:$0xff] %vm1533_vm1, %v1478_v3  ;;  %v1142_v10 = vadd.f32 %v2117_v7, %v2545_v9  ;;  %v1136_v12 = vpop.f32.mrb[11].mxu1  ;;  %1542 = vst.msk [vmem:[%s2554_s8 + $0x40] sm:$0xff] %vm1533_vm1, %v1413_v4  ;;  %v817_v13 = vadd.f32 %v2545_v9, %v816_v11 }
  0xfe   : > { %1606 = vst.msk [vmem:[%s2554_s8 + $0x240] sm:$0xff] %vm1533_vm1, %v1477_v5  ;;  %v1137_v14 = vadd.f32 %v2545_v9, %v1136_v12  ;;  %v1416_v15 = vmax.f32 %v822_v8, 0.0 }
  0xff   : > { %v1480_v16 = vmax.f32 %v1142_v10, 0.0  ;;  %v1415_v17 = vmax.f32 %v817_v13, 0.0  ;;  %v2024_v19 = vpop.f32.mrb[12].mxu0 }
 0x100   : > { %v1479_v18 = vmax.f32 %v1137_v14, 0.0  ;;  %v2120_v20 = vpop.f32.mrb[12].mxu1  ;;  %1545 = vst.msk [vmem:[%s2554_s8 + $0x58] sm:$0xff] %vm1533_vm1, %v1416_v15  ;;  %v832_v21 = vadd.f32 %v2024_v19, %v2545_v9  ;;  %v826_v23 = vpop.f32.mrb[13].mxu0 }
 0x101   : > { %1609 = vst.msk [vmem:[%s2554_s8 + $0x258] sm:$0xff] %vm1533_vm1, %v1480_v16  ;;  %v1152_v22 = vadd.f32 %v2120_v20, %v2545_v9  ;;  %v1146_v24 = vpop.f32.mrb[13].mxu1  ;;  %1544 = vst.msk [vmem:[%s2554_s8 + $0x50] sm:$0xff] %vm1533_vm1, %v1415_v17  ;;  %v827_v25 = vadd.f32 %v2545_v9, %v826_v23 }
 0x102   : > { %1608 = vst.msk [vmem:[%s2554_s8 + $0x250] sm:$0xff] %vm1533_vm1, %v1479_v18  ;;  %v1147_v26 = vadd.f32 %v2545_v9, %v1146_v24  ;;  %v1418_v27 = vmax.f32 %v832_v21, 0.0 }
 0x103   : > { %v1482_v28 = vmax.f32 %v1152_v22, 0.0  ;;  %v1417_v29 = vmax.f32 %v827_v25, 0.0  ;;  %v2027_v31 = vpop.f32.mrb[14].mxu0 }
 0x104   : > { %v1481_v30 = vmax.f32 %v1147_v26, 0.0  ;;  %v2123_v32 = vpop.f32.mrb[14].mxu1  ;;  %1547 = vst.msk [vmem:[%s2554_s8 + $0x68] sm:$0xff] %vm1533_vm1, %v1418_v27  ;;  %v842_v33 = vadd.f32 %v2027_v31, %v2545_v9  ;;  %v836_v35 = vpop.f32.mrb[15].mxu0 }
 0x105   : > { %1611 = vst.msk [vmem:[%s2554_s8 + $0x268] sm:$0xff] %vm1533_vm1, %v1482_v28  ;;  %v1162_v34 = vadd.f32 %v2123_v32, %v2545_v9  ;;  %v1156_v36 = vpop.f32.mrb[15].mxu1  ;;  %1546 = vst.msk [vmem:[%s2554_s8 + $0x60] sm:$0xff] %vm1533_vm1, %v1417_v29  ;;  %v837_v37 = vadd.f32 %v2545_v9, %v836_v35 }
 0x106   : > { %1610 = vst.msk [vmem:[%s2554_s8 + $0x260] sm:$0xff] %vm1533_vm1, %v1481_v30  ;;  %v1157_v38 = vadd.f32 %v2545_v9, %v1156_v36  ;;  %v1420_v39 = vmax.f32 %v842_v33, 0.0 }
 0x107   : > { %v1484_v40 = vmax.f32 %v1162_v34, 0.0  ;;  %v1419_v41 = vmax.f32 %v837_v37, 0.0  ;;  %v2030_v43 = vpop.f32.mrb[16].mxu0 }
 0x108   : > { %v1483_v42 = vmax.f32 %v1157_v38, 0.0  ;;  %v2126_v44 = vpop.f32.mrb[16].mxu1  ;;  %1549 = vst.msk [vmem:[%s2554_s8 + $0x78] sm:$0xff] %vm1533_vm1, %v1420_v39  ;;  %v852_v45 = vadd.f32 %v2030_v43, %v2545_v9  ;;  %v846_v47 = vpop.f32.mrb[17].mxu0 }
 0x109   : > { %1613 = vst.msk [vmem:[%s2554_s8 + $0x278] sm:$0xff] %vm1533_vm1, %v1484_v40  ;;  %v1172_v46 = vadd.f32 %v2126_v44, %v2545_v9  ;;  %v1166_v48 = vpop.f32.mrb[17].mxu1  ;;  %1548 = vst.msk [vmem:[%s2554_s8 + $0x70] sm:$0xff] %vm1533_vm1, %v1419_v41  ;;  %v847_v49 = vadd.f32 %v2545_v9, %v846_v47 }
 0x10a   : > { %1612 = vst.msk [vmem:[%s2554_s8 + $0x270] sm:$0xff] %vm1533_vm1, %v1483_v42  ;;  %v1167_v50 = vadd.f32 %v2545_v9, %v1166_v48  ;;  %v1422_v51 = vmax.f32 %v852_v45, 0.0 }
 0x10b   : > { %v1486_v52 = vmax.f32 %v1172_v46, 0.0  ;;  %v1421_v53 = vmax.f32 %v847_v49, 0.0  ;;  %v2033_v55 = vpop.f32.mrb[18].mxu0 }
 0x10c   : > { %v1485_v54 = vmax.f32 %v1167_v50, 0.0  ;;  %v2129_v56 = vpop.f32.mrb[18].mxu1  ;;  %1551 = vst.msk [vmem:[%s2554_s8 + $0x88] sm:$0xff] %vm1533_vm1, %v1422_v51  ;;  %v862_v57 = vadd.f32 %v2033_v55, %v2545_v9  ;;  %v856_v59 = vpop.f32.mrb[19].mxu0 }
 0x10d   : > { %1615 = vst.msk [vmem:[%s2554_s8 + $0x288] sm:$0xff] %vm1533_vm1, %v1486_v52  ;;  %v1182_v58 = vadd.f32 %v2129_v56, %v2545_v9  ;;  %v1176_v60 = vpop.f32.mrb[19].mxu1  ;;  %1550 = vst.msk [vmem:[%s2554_s8 + $0x80] sm:$0xff] %vm1533_vm1, %v1421_v53  ;;  %v857_v61 = vadd.f32 %v2545_v9, %v856_v59 }
 0x10e   : > { %1614 = vst.msk [vmem:[%s2554_s8 + $0x280] sm:$0xff] %vm1533_vm1, %v1485_v54  ;;  %v1177_v62 = vadd.f32 %v2545_v9, %v1176_v60  ;;  %v1424_v63 = vmax.f32 %v862_v57, 0.0 }
 0x10f   : > { %v1488_v0 = vmax.f32 %v1182_v58, 0.0  ;;  %v1423_v1 = vmax.f32 %v857_v61, 0.0  ;;  %v2036_v3 = vpop.f32.mrb[20].mxu0 }
 0x110   : > { %v1487_v2 = vmax.f32 %v1177_v62, 0.0  ;;  %v2132_v4 = vpop.f32.mrb[20].mxu1  ;;  %1553 = vst.msk [vmem:[%s2554_s8 + $0x98] sm:$0xff] %vm1533_vm1, %v1424_v63  ;;  %v872_v5 = vadd.f32 %v2036_v3, %v2545_v9  ;;  %v866_v7 = vpop.f32.mrb[21].mxu0 }
 0x111   : > { %1617 = vst.msk [vmem:[%s2554_s8 + $0x298] sm:$0xff] %vm1533_vm1, %v1488_v0  ;;  %v1192_v6 = vadd.f32 %v2132_v4, %v2545_v9  ;;  %v1186_v8 = vpop.f32.mrb[21].mxu1  ;;  %1552 = vst.msk [vmem:[%s2554_s8 + $0x90] sm:$0xff] %vm1533_vm1, %v1423_v1  ;;  %v867_v10 = vadd.f32 %v2545_v9, %v866_v7 }
 0x112   : > { %1616 = vst.msk [vmem:[%s2554_s8 + $0x290] sm:$0xff] %vm1533_vm1, %v1487_v2  ;;  %v1187_v11 = vadd.f32 %v2545_v9, %v1186_v8  ;;  %v1426_v12 = vmax.f32 %v872_v5, 0.0 }
 0x113   : > { %v1490_v13 = vmax.f32 %v1192_v6, 0.0  ;;  %v1425_v14 = vmax.f32 %v867_v10, 0.0  ;;  %v2039_v16 = vpop.f32.mrb[22].mxu0 }
 0x114   : > { %v1489_v15 = vmax.f32 %v1187_v11, 0.0  ;;  %v2135_v17 = vpop.f32.mrb[22].mxu1  ;;  %1555 = vst.msk [vmem:[%s2554_s8 + $0xa8] sm:$0xff] %vm1533_vm1, %v1426_v12  ;;  %v882_v18 = vadd.f32 %v2039_v16, %v2545_v9  ;;  %v876_v20 = vpop.f32.mrb[23].mxu0 }
 0x115   : > { %1619 = vst.msk [vmem:[%s2554_s8 + $0x2a8] sm:$0xff] %vm1533_vm1, %v1490_v13  ;;  %v1202_v19 = vadd.f32 %v2135_v17, %v2545_v9  ;;  %v1196_v21 = vpop.f32.mrb[23].mxu1  ;;  %1554 = vst.msk [vmem:[%s2554_s8 + $0xa0] sm:$0xff] %vm1533_vm1, %v1425_v14  ;;  %v877_v22 = vadd.f32 %v2545_v9, %v876_v20 }
 0x116   : > { %1618 = vst.msk [vmem:[%s2554_s8 + $0x2a0] sm:$0xff] %vm1533_vm1, %v1489_v15  ;;  %v1197_v23 = vadd.f32 %v2545_v9, %v1196_v21  ;;  %v1428_v24 = vmax.f32 %v882_v18, 0.0 }
 0x117   : > { %v1492_v25 = vmax.f32 %v1202_v19, 0.0  ;;  %v1427_v26 = vmax.f32 %v877_v22, 0.0  ;;  %v2042_v28 = vpop.f32.mrb[24].mxu0 }
 0x118   : > { %v1491_v27 = vmax.f32 %v1197_v23, 0.0  ;;  %v2138_v29 = vpop.f32.mrb[24].mxu1  ;;  %1557 = vst.msk [vmem:[%s2554_s8 + $0xb8] sm:$0xff] %vm1533_vm1, %v1428_v24  ;;  %v892_v30 = vadd.f32 %v2042_v28, %v2545_v9  ;;  %v886_v32 = vpop.f32.mrb[25].mxu0 }
 0x119   : > { %1621 = vst.msk [vmem:[%s2554_s8 + $0x2b8] sm:$0xff] %vm1533_vm1, %v1492_v25  ;;  %v1212_v31 = vadd.f32 %v2138_v29, %v2545_v9  ;;  %v1206_v33 = vpop.f32.mrb[25].mxu1  ;;  %1556 = vst.msk [vmem:[%s2554_s8 + $0xb0] sm:$0xff] %vm1533_vm1, %v1427_v26  ;;  %v887_v34 = vadd.f32 %v2545_v9, %v886_v32 }
 0x11a   : > { %1620 = vst.msk [vmem:[%s2554_s8 + $0x2b0] sm:$0xff] %vm1533_vm1, %v1491_v27  ;;  %v1207_v35 = vadd.f32 %v2545_v9, %v1206_v33  ;;  %v1430_v36 = vmax.f32 %v892_v30, 0.0 }
 0x11b   : > { %v1494_v37 = vmax.f32 %v1212_v31, 0.0  ;;  %v1429_v38 = vmax.f32 %v887_v34, 0.0  ;;  %v2045_v40 = vpop.f32.mrb[26].mxu0 }
 0x11c   : > { %v1493_v39 = vmax.f32 %v1207_v35, 0.0  ;;  %v2141_v41 = vpop.f32.mrb[26].mxu1  ;;  %1559 = vst.msk [vmem:[%s2554_s8 + $0xc8] sm:$0xff] %vm1533_vm1, %v1430_v36  ;;  %v902_v42 = vadd.f32 %v2045_v40, %v2545_v9  ;;  %v896_v44 = vpop.f32.mrb[27].mxu0 }
 0x11d   : > { %1623 = vst.msk [vmem:[%s2554_s8 + $0x2c8] sm:$0xff] %vm1533_vm1, %v1494_v37  ;;  %v1222_v43 = vadd.f32 %v2141_v41, %v2545_v9  ;;  %v1216_v45 = vpop.f32.mrb[27].mxu1  ;;  %1558 = vst.msk [vmem:[%s2554_s8 + $0xc0] sm:$0xff] %vm1533_vm1, %v1429_v38  ;;  %v897_v46 = vadd.f32 %v2545_v9, %v896_v44 }
 0x11e   : > { %1622 = vst.msk [vmem:[%s2554_s8 + $0x2c0] sm:$0xff] %vm1533_vm1, %v1493_v39  ;;  %v1217_v47 = vadd.f32 %v2545_v9, %v1216_v45  ;;  %v1432_v48 = vmax.f32 %v902_v42, 0.0 }
 0x11f   : > { %v1496_v49 = vmax.f32 %v1222_v43, 0.0  ;;  %v1431_v50 = vmax.f32 %v897_v46, 0.0  ;;  %v2048_v52 = vpop.f32.mrb[28].mxu0 }
 0x120   : > { %v1495_v51 = vmax.f32 %v1217_v47, 0.0  ;;  %v2144_v53 = vpop.f32.mrb[28].mxu1  ;;  %1561 = vst.msk [vmem:[%s2554_s8 + $0xd8] sm:$0xff] %vm1533_vm1, %v1432_v48  ;;  %v912_v54 = vadd.f32 %v2048_v52, %v2545_v9  ;;  %v906_v56 = vpop.f32.mrb[29].mxu0 }
 0x121   : > { %1625 = vst.msk [vmem:[%s2554_s8 + $0x2d8] sm:$0xff] %vm1533_vm1, %v1496_v49  ;;  %v1232_v55 = vadd.f32 %v2144_v53, %v2545_v9  ;;  %v1226_v57 = vpop.f32.mrb[29].mxu1  ;;  %1560 = vst.msk [vmem:[%s2554_s8 + $0xd0] sm:$0xff] %vm1533_vm1, %v1431_v50  ;;  %v907_v58 = vadd.f32 %v2545_v9, %v906_v56 }
 0x122   : > { %1624 = vst.msk [vmem:[%s2554_s8 + $0x2d0] sm:$0xff] %vm1533_vm1, %v1495_v51  ;;  %v1227_v59 = vadd.f32 %v2545_v9, %v1226_v57  ;;  %v1434_v60 = vmax.f32 %v912_v54, 0.0 }
 0x123   : > { %v1498_v61 = vmax.f32 %v1232_v55, 0.0  ;;  %v1433_v62 = vmax.f32 %v907_v58, 0.0  ;;  %v2051_v0 = vpop.f32.mrb[30].mxu0 }
 0x124   : > { %v1497_v63 = vmax.f32 %v1227_v59, 0.0  ;;  %v2147_v1 = vpop.f32.mrb[30].mxu1  ;;  %1563 = vst.msk [vmem:[%s2554_s8 + $0xe8] sm:$0xff] %vm1533_vm1, %v1434_v60  ;;  %v922_v2 = vadd.f32 %v2051_v0, %v2545_v9  ;;  %v916_v4 = vpop.f32.mrb[31].mxu0 }
 0x125   : > { %1627 = vst.msk [vmem:[%s2554_s8 + $0x2e8] sm:$0xff] %vm1533_vm1, %v1498_v61  ;;  %v1242_v3 = vadd.f32 %v2147_v1, %v2545_v9  ;;  %v1236_v5 = vpop.f32.mrb[31].mxu1  ;;  %1562 = vst.msk [vmem:[%s2554_s8 + $0xe0] sm:$0xff] %vm1533_vm1, %v1433_v62  ;;  %v917_v6 = vadd.f32 %v2545_v9, %v916_v4 }
 0x126   : > { %1626 = vst.msk [vmem:[%s2554_s8 + $0x2e0] sm:$0xff] %vm1533_vm1, %v1497_v63  ;;  %v1237_v7 = vadd.f32 %v2545_v9, %v1236_v5  ;;  %v1436_v8 = vmax.f32 %v922_v2, 0.0 }
 0x127   : > { %v1500_v10 = vmax.f32 %v1242_v3, 0.0  ;;  %v1435_v11 = vmax.f32 %v917_v6, 0.0  ;;  %v2054_v13 = vpop.f32.mrb[32].mxu0 }
 0x128   : > { %v1499_v12 = vmax.f32 %v1237_v7, 0.0  ;;  %v2150_v14 = vpop.f32.mrb[32].mxu1  ;;  %1565 = vst.msk [vmem:[%s2554_s8 + $0xf8] sm:$0xff] %vm1533_vm1, %v1436_v8  ;;  %v932_v15 = vadd.f32 %v2054_v13, %v2545_v9  ;;  %v926_v17 = vpop.f32.mrb[33].mxu0 }
 0x129   : > { %1629 = vst.msk [vmem:[%s2554_s8 + $0x2f8] sm:$0xff] %vm1533_vm1, %v1500_v10  ;;  %v1252_v16 = vadd.f32 %v2150_v14, %v2545_v9  ;;  %v1246_v18 = vpop.f32.mrb[33].mxu1  ;;  %1564 = vst.msk [vmem:[%s2554_s8 + $0xf0] sm:$0xff] %vm1533_vm1, %v1435_v11  ;;  %v927_v19 = vadd.f32 %v2545_v9, %v926_v17 }
 0x12a   : > { %1628 = vst.msk [vmem:[%s2554_s8 + $0x2f0] sm:$0xff] %vm1533_vm1, %v1499_v12  ;;  %v1247_v20 = vadd.f32 %v2545_v9, %v1246_v18  ;;  %v1438_v21 = vmax.f32 %v932_v15, 0.0 }
 0x12b   : > { %v1502_v22 = vmax.f32 %v1252_v16, 0.0  ;;  %v1437_v23 = vmax.f32 %v927_v19, 0.0  ;;  %v2057_v25 = vpop.f32.mrb[34].mxu0 }
 0x12c   : > { %v1501_v24 = vmax.f32 %v1247_v20, 0.0  ;;  %v2153_v26 = vpop.f32.mrb[34].mxu1  ;;  %1567 = vst.msk [vmem:[%s2554_s8 + $0x108] sm:$0xff] %vm1533_vm1, %v1438_v21  ;;  %v942_v27 = vadd.f32 %v2057_v25, %v2545_v9  ;;  %v936_v29 = vpop.f32.mrb[35].mxu0 }
 0x12d   : > { %1631 = vst.msk [vmem:[%s2554_s8 + $0x308] sm:$0xff] %vm1533_vm1, %v1502_v22  ;;  %v1262_v28 = vadd.f32 %v2153_v26, %v2545_v9  ;;  %v1256_v30 = vpop.f32.mrb[35].mxu1  ;;  %1566 = vst.msk [vmem:[%s2554_s8 + $0x100] sm:$0xff] %vm1533_vm1, %v1437_v23  ;;  %v937_v31 = vadd.f32 %v2545_v9, %v936_v29 }
 0x12e   : > { %1630 = vst.msk [vmem:[%s2554_s8 + $0x300] sm:$0xff] %vm1533_vm1, %v1501_v24  ;;  %v1257_v32 = vadd.f32 %v2545_v9, %v1256_v30  ;;  %v1440_v33 = vmax.f32 %v942_v27, 0.0 }
 0x12f   : > { %v1504_v34 = vmax.f32 %v1262_v28, 0.0  ;;  %v1439_v35 = vmax.f32 %v937_v31, 0.0  ;;  %v2060_v37 = vpop.f32.mrb[36].mxu0 }
 0x130   : > { %v1503_v36 = vmax.f32 %v1257_v32, 0.0  ;;  %v2156_v38 = vpop.f32.mrb[36].mxu1  ;;  %1569 = vst.msk [vmem:[%s2554_s8 + $0x118] sm:$0xff] %vm1533_vm1, %v1440_v33  ;;  %v952_v39 = vadd.f32 %v2060_v37, %v2545_v9  ;;  %v946_v41 = vpop.f32.mrb[37].mxu0 }
 0x131   : > { %1633 = vst.msk [vmem:[%s2554_s8 + $0x318] sm:$0xff] %vm1533_vm1, %v1504_v34  ;;  %v1272_v40 = vadd.f32 %v2156_v38, %v2545_v9  ;;  %v1266_v42 = vpop.f32.mrb[37].mxu1  ;;  %1568 = vst.msk [vmem:[%s2554_s8 + $0x110] sm:$0xff] %vm1533_vm1, %v1439_v35  ;;  %v947_v43 = vadd.f32 %v2545_v9, %v946_v41 }
 0x132   : > { %1632 = vst.msk [vmem:[%s2554_s8 + $0x310] sm:$0xff] %vm1533_vm1, %v1503_v36  ;;  %v1267_v44 = vadd.f32 %v2545_v9, %v1266_v42  ;;  %v1442_v45 = vmax.f32 %v952_v39, 0.0 }
 0x133   : > { %v1506_v46 = vmax.f32 %v1272_v40, 0.0  ;;  %v1441_v47 = vmax.f32 %v947_v43, 0.0  ;;  %v2063_v49 = vpop.f32.mrb[38].mxu0 }
 0x134   : > { %v1505_v48 = vmax.f32 %v1267_v44, 0.0  ;;  %v2159_v50 = vpop.f32.mrb[38].mxu1  ;;  %1571 = vst.msk [vmem:[%s2554_s8 + $0x128] sm:$0xff] %vm1533_vm1, %v1442_v45  ;;  %v962_v51 = vadd.f32 %v2063_v49, %v2545_v9  ;;  %v956_v53 = vpop.f32.mrb[39].mxu0 }
 0x135   : > { %1635 = vst.msk [vmem:[%s2554_s8 + $0x328] sm:$0xff] %vm1533_vm1, %v1506_v46  ;;  %v1282_v52 = vadd.f32 %v2159_v50, %v2545_v9  ;;  %v1276_v54 = vpop.f32.mrb[39].mxu1  ;;  %1570 = vst.msk [vmem:[%s2554_s8 + $0x120] sm:$0xff] %vm1533_vm1, %v1441_v47  ;;  %v957_v55 = vadd.f32 %v2545_v9, %v956_v53 }
 0x136   : > { %1634 = vst.msk [vmem:[%s2554_s8 + $0x320] sm:$0xff] %vm1533_vm1, %v1505_v48  ;;  %v1277_v56 = vadd.f32 %v2545_v9, %v1276_v54  ;;  %v1444_v57 = vmax.f32 %v962_v51, 0.0 }
 0x137   : > { %v1508_v58 = vmax.f32 %v1282_v52, 0.0  ;;  %v1443_v59 = vmax.f32 %v957_v55, 0.0  ;;  %v2066_v61 = vpop.f32.mrb[40].mxu0 }
 0x138   : > { %v1507_v60 = vmax.f32 %v1277_v56, 0.0  ;;  %v2162_v62 = vpop.f32.mrb[40].mxu1  ;;  %1573 = vst.msk [vmem:[%s2554_s8 + $0x138] sm:$0xff] %vm1533_vm1, %v1444_v57  ;;  %v972_v63 = vadd.f32 %v2066_v61, %v2545_v9  ;;  %v966_v1 = vpop.f32.mrb[41].mxu0 }
 0x139   : > { %1637 = vst.msk [vmem:[%s2554_s8 + $0x338] sm:$0xff] %vm1533_vm1, %v1508_v58  ;;  %v1292_v0 = vadd.f32 %v2162_v62, %v2545_v9  ;;  %v1286_v2 = vpop.f32.mrb[41].mxu1  ;;  %1572 = vst.msk [vmem:[%s2554_s8 + $0x130] sm:$0xff] %vm1533_vm1, %v1443_v59  ;;  %v967_v3 = vadd.f32 %v2545_v9, %v966_v1 }
 0x13a   : > { %1636 = vst.msk [vmem:[%s2554_s8 + $0x330] sm:$0xff] %vm1533_vm1, %v1507_v60  ;;  %v1287_v4 = vadd.f32 %v2545_v9, %v1286_v2  ;;  %v1446_v5 = vmax.f32 %v972_v63, 0.0 }
 0x13b   : > { %v1510_v6 = vmax.f32 %v1292_v0, 0.0  ;;  %v1445_v7 = vmax.f32 %v967_v3, 0.0  ;;  %v2069_v10 = vpop.f32.mrb[42].mxu0 }
 0x13c   : > { %v1509_v8 = vmax.f32 %v1287_v4, 0.0  ;;  %v2165_v11 = vpop.f32.mrb[42].mxu1  ;;  %1575 = vst.msk [vmem:[%s2554_s8 + $0x148] sm:$0xff] %vm1533_vm1, %v1446_v5  ;;  %v982_v12 = vadd.f32 %v2069_v10, %v2545_v9  ;;  %v976_v14 = vpop.f32.mrb[43].mxu0 }
 0x13d   : > { %1639 = vst.msk [vmem:[%s2554_s8 + $0x348] sm:$0xff] %vm1533_vm1, %v1510_v6  ;;  %v1302_v13 = vadd.f32 %v2165_v11, %v2545_v9  ;;  %v1296_v15 = vpop.f32.mrb[43].mxu1  ;;  %1574 = vst.msk [vmem:[%s2554_s8 + $0x140] sm:$0xff] %vm1533_vm1, %v1445_v7  ;;  %v977_v16 = vadd.f32 %v2545_v9, %v976_v14 }
 0x13e   : > { %1638 = vst.msk [vmem:[%s2554_s8 + $0x340] sm:$0xff] %vm1533_vm1, %v1509_v8  ;;  %v1297_v17 = vadd.f32 %v2545_v9, %v1296_v15  ;;  %v1448_v18 = vmax.f32 %v982_v12, 0.0 }
 0x13f   : > { %v1512_v19 = vmax.f32 %v1302_v13, 0.0  ;;  %v1447_v20 = vmax.f32 %v977_v16, 0.0  ;;  %v2072_v22 = vpop.f32.mrb[44].mxu0 }
 0x140   : > { %v1511_v21 = vmax.f32 %v1297_v17, 0.0  ;;  %v2168_v23 = vpop.f32.mrb[44].mxu1  ;;  %1577 = vst.msk [vmem:[%s2554_s8 + $0x158] sm:$0xff] %vm1533_vm1, %v1448_v18  ;;  %v992_v24 = vadd.f32 %v2072_v22, %v2545_v9  ;;  %v986_v26 = vpop.f32.mrb[45].mxu0 }
 0x141   : > { %1641 = vst.msk [vmem:[%s2554_s8 + $0x358] sm:$0xff] %vm1533_vm1, %v1512_v19  ;;  %v1312_v25 = vadd.f32 %v2168_v23, %v2545_v9  ;;  %v1306_v27 = vpop.f32.mrb[45].mxu1  ;;  %1576 = vst.msk [vmem:[%s2554_s8 + $0x150] sm:$0xff] %vm1533_vm1, %v1447_v20  ;;  %v987_v28 = vadd.f32 %v2545_v9, %v986_v26 }
 0x142   : > { %1640 = vst.msk [vmem:[%s2554_s8 + $0x350] sm:$0xff] %vm1533_vm1, %v1511_v21  ;;  %v1307_v29 = vadd.f32 %v2545_v9, %v1306_v27  ;;  %v1450_v30 = vmax.f32 %v992_v24, 0.0 }
 0x143   : > { %v1514_v31 = vmax.f32 %v1312_v25, 0.0  ;;  %v1449_v32 = vmax.f32 %v987_v28, 0.0  ;;  %v2075_v34 = vpop.f32.mrb[46].mxu0 }
 0x144   : > { %v1513_v33 = vmax.f32 %v1307_v29, 0.0  ;;  %v2171_v35 = vpop.f32.mrb[46].mxu1  ;;  %1579 = vst.msk [vmem:[%s2554_s8 + $0x168] sm:$0xff] %vm1533_vm1, %v1450_v30  ;;  %v1002_v36 = vadd.f32 %v2075_v34, %v2545_v9  ;;  %v996_v38 = vpop.f32.mrb[47].mxu0 }
 0x145   : > { %1643 = vst.msk [vmem:[%s2554_s8 + $0x368] sm:$0xff] %vm1533_vm1, %v1514_v31  ;;  %v1322_v37 = vadd.f32 %v2171_v35, %v2545_v9  ;;  %v1316_v39 = vpop.f32.mrb[47].mxu1  ;;  %1578 = vst.msk [vmem:[%s2554_s8 + $0x160] sm:$0xff] %vm1533_vm1, %v1449_v32  ;;  %v997_v40 = vadd.f32 %v2545_v9, %v996_v38 }
 0x146   : > { %1642 = vst.msk [vmem:[%s2554_s8 + $0x360] sm:$0xff] %vm1533_vm1, %v1513_v33  ;;  %v1317_v41 = vadd.f32 %v2545_v9, %v1316_v39  ;;  %v1452_v42 = vmax.f32 %v1002_v36, 0.0 }
 0x147   : > { %v1516_v43 = vmax.f32 %v1322_v37, 0.0  ;;  %v1451_v44 = vmax.f32 %v997_v40, 0.0  ;;  %v2078_v46 = vpop.f32.mrb[48].mxu0 }
 0x148   : > { %v1515_v45 = vmax.f32 %v1317_v41, 0.0  ;;  %v2174_v47 = vpop.f32.mrb[48].mxu1  ;;  %1581 = vst.msk [vmem:[%s2554_s8 + $0x178] sm:$0xff] %vm1533_vm1, %v1452_v42  ;;  %v1012_v48 = vadd.f32 %v2078_v46, %v2545_v9  ;;  %v1006_v50 = vpop.f32.mrb[49].mxu0 }
 0x149   : > { %1645 = vst.msk [vmem:[%s2554_s8 + $0x378] sm:$0xff] %vm1533_vm1, %v1516_v43  ;;  %v1332_v49 = vadd.f32 %v2174_v47, %v2545_v9  ;;  %v1326_v51 = vpop.f32.mrb[49].mxu1  ;;  %1580 = vst.msk [vmem:[%s2554_s8 + $0x170] sm:$0xff] %vm1533_vm1, %v1451_v44  ;;  %v1007_v52 = vadd.f32 %v2545_v9, %v1006_v50 }
 0x14a   : > { %1644 = vst.msk [vmem:[%s2554_s8 + $0x370] sm:$0xff] %vm1533_vm1, %v1515_v45  ;;  %v1327_v53 = vadd.f32 %v2545_v9, %v1326_v51  ;;  %v1454_v54 = vmax.f32 %v1012_v48, 0.0 }
 0x14b   : > { %v1518_v55 = vmax.f32 %v1332_v49, 0.0  ;;  %v1453_v56 = vmax.f32 %v1007_v52, 0.0  ;;  %v2081_v58 = vpop.f32.mrb[50].mxu0 }
 0x14c   : > { %v1517_v57 = vmax.f32 %v1327_v53, 0.0  ;;  %v2177_v59 = vpop.f32.mrb[50].mxu1  ;;  %1583 = vst.msk [vmem:[%s2554_s8 + $0x188] sm:$0xff] %vm1533_vm1, %v1454_v54  ;;  %v1022_v60 = vadd.f32 %v2081_v58, %v2545_v9  ;;  %v1016_v62 = vpop.f32.mrb[51].mxu0 }
 0x14d   : > { %1647 = vst.msk [vmem:[%s2554_s8 + $0x388] sm:$0xff] %vm1533_vm1, %v1518_v55  ;;  %v1342_v61 = vadd.f32 %v2177_v59, %v2545_v9  ;;  %v1336_v63 = vpop.f32.mrb[51].mxu1  ;;  %1582 = vst.msk [vmem:[%s2554_s8 + $0x180] sm:$0xff] %vm1533_vm1, %v1453_v56  ;;  %v1017_v0 = vadd.f32 %v2545_v9, %v1016_v62 }
 0x14e   : > { %1646 = vst.msk [vmem:[%s2554_s8 + $0x380] sm:$0xff] %vm1533_vm1, %v1517_v57  ;;  %v1337_v1 = vadd.f32 %v2545_v9, %v1336_v63  ;;  %v1456_v2 = vmax.f32 %v1022_v60, 0.0 }
 0x14f   : > { %v1520_v3 = vmax.f32 %v1342_v61, 0.0  ;;  %v1455_v4 = vmax.f32 %v1017_v0, 0.0  ;;  %v2084_v6 = vpop.f32.mrb[52].mxu0 }
 0x150   : > { %v1519_v5 = vmax.f32 %v1337_v1, 0.0  ;;  %v2180_v7 = vpop.f32.mrb[52].mxu1  ;;  %1585 = vst.msk [vmem:[%s2554_s8 + $0x198] sm:$0xff] %vm1533_vm1, %v1456_v2  ;;  %v1032_v8 = vadd.f32 %v2084_v6, %v2545_v9  ;;  %v1026_v11 = vpop.f32.mrb[53].mxu0 }
 0x151   : > { %1649 = vst.msk [vmem:[%s2554_s8 + $0x398] sm:$0xff] %vm1533_vm1, %v1520_v3  ;;  %v1352_v10 = vadd.f32 %v2180_v7, %v2545_v9  ;;  %v1346_v12 = vpop.f32.mrb[53].mxu1  ;;  %1584 = vst.msk [vmem:[%s2554_s8 + $0x190] sm:$0xff] %vm1533_vm1, %v1455_v4  ;;  %v1027_v13 = vadd.f32 %v2545_v9, %v1026_v11 }
 0x152   : > { %1648 = vst.msk [vmem:[%s2554_s8 + $0x390] sm:$0xff] %vm1533_vm1, %v1519_v5  ;;  %v1347_v14 = vadd.f32 %v2545_v9, %v1346_v12  ;;  %v1458_v15 = vmax.f32 %v1032_v8, 0.0 }
 0x153   : > { %v1522_v16 = vmax.f32 %v1352_v10, 0.0  ;;  %v1457_v17 = vmax.f32 %v1027_v13, 0.0  ;;  %v2087_v19 = vpop.f32.mrb[54].mxu0 }
 0x154   : > { %v1521_v18 = vmax.f32 %v1347_v14, 0.0  ;;  %v2183_v20 = vpop.f32.mrb[54].mxu1  ;;  %1587 = vst.msk [vmem:[%s2554_s8 + $0x1a8] sm:$0xff] %vm1533_vm1, %v1458_v15  ;;  %v1042_v21 = vadd.f32 %v2087_v19, %v2545_v9  ;;  %v1036_v23 = vpop.f32.mrb[55].mxu0 }
 0x155   : > { %1651 = vst.msk [vmem:[%s2554_s8 + $0x3a8] sm:$0xff] %vm1533_vm1, %v1522_v16  ;;  %v1362_v22 = vadd.f32 %v2183_v20, %v2545_v9  ;;  %v1356_v24 = vpop.f32.mrb[55].mxu1  ;;  %1586 = vst.msk [vmem:[%s2554_s8 + $0x1a0] sm:$0xff] %vm1533_vm1, %v1457_v17  ;;  %v1037_v25 = vadd.f32 %v2545_v9, %v1036_v23 }
 0x156   : > { %1650 = vst.msk [vmem:[%s2554_s8 + $0x3a0] sm:$0xff] %vm1533_vm1, %v1521_v18  ;;  %v1357_v26 = vadd.f32 %v2545_v9, %v1356_v24  ;;  %v1460_v27 = vmax.f32 %v1042_v21, 0.0 }
 0x157   : > { %v1524_v28 = vmax.f32 %v1362_v22, 0.0  ;;  %v1459_v29 = vmax.f32 %v1037_v25, 0.0  ;;  %v2090_v31 = vpop.f32.mrb[56].mxu0 }
 0x158   : > { %v1523_v30 = vmax.f32 %v1357_v26, 0.0  ;;  %v2186_v32 = vpop.f32.mrb[56].mxu1  ;;  %1589 = vst.msk [vmem:[%s2554_s8 + $0x1b8] sm:$0xff] %vm1533_vm1, %v1460_v27  ;;  %v1052_v33 = vadd.f32 %v2090_v31, %v2545_v9  ;;  %v1046_v35 = vpop.f32.mrb[57].mxu0 }
 0x159   : > { %1653 = vst.msk [vmem:[%s2554_s8 + $0x3b8] sm:$0xff] %vm1533_vm1, %v1524_v28  ;;  %v1372_v34 = vadd.f32 %v2186_v32, %v2545_v9  ;;  %v1366_v36 = vpop.f32.mrb[57].mxu1  ;;  %1588 = vst.msk [vmem:[%s2554_s8 + $0x1b0] sm:$0xff] %vm1533_vm1, %v1459_v29  ;;  %v1047_v37 = vadd.f32 %v2545_v9, %v1046_v35 }
 0x15a   : > { %1652 = vst.msk [vmem:[%s2554_s8 + $0x3b0] sm:$0xff] %vm1533_vm1, %v1523_v30  ;;  %v1367_v38 = vadd.f32 %v2545_v9, %v1366_v36  ;;  %v1462_v39 = vmax.f32 %v1052_v33, 0.0 }
 0x15b   : > { %v1526_v40 = vmax.f32 %v1372_v34, 0.0  ;;  %v1461_v41 = vmax.f32 %v1047_v37, 0.0  ;;  %v2093_v43 = vpop.f32.mrb[58].mxu0 }
 0x15c   : > { %v1525_v42 = vmax.f32 %v1367_v38, 0.0  ;;  %v2189_v44 = vpop.f32.mrb[58].mxu1  ;;  %1591 = vst.msk [vmem:[%s2554_s8 + $0x1c8] sm:$0xff] %vm1533_vm1, %v1462_v39  ;;  %v1062_v45 = vadd.f32 %v2093_v43, %v2545_v9  ;;  %v1056_v47 = vpop.f32.mrb[59].mxu0 }
 0x15d   : > { %1655 = vst.msk [vmem:[%s2554_s8 + $0x3c8] sm:$0xff] %vm1533_vm1, %v1526_v40  ;;  %v1382_v46 = vadd.f32 %v2189_v44, %v2545_v9  ;;  %v1376_v48 = vpop.f32.mrb[59].mxu1  ;;  %1590 = vst.msk [vmem:[%s2554_s8 + $0x1c0] sm:$0xff] %vm1533_vm1, %v1461_v41  ;;  %v1057_v49 = vadd.f32 %v2545_v9, %v1056_v47 }
 0x15e   : > { %1654 = vst.msk [vmem:[%s2554_s8 + $0x3c0] sm:$0xff] %vm1533_vm1, %v1525_v42  ;;  %v1377_v50 = vadd.f32 %v2545_v9, %v1376_v48  ;;  %v1464_v51 = vmax.f32 %v1062_v45, 0.0 }
 0x15f   : > { %v1528_v52 = vmax.f32 %v1382_v46, 0.0  ;;  %v1463_v53 = vmax.f32 %v1057_v49, 0.0  ;;  %v2096_v55 = vpop.f32.mrb[60].mxu0 }
 0x160   : > { %v1527_v54 = vmax.f32 %v1377_v50, 0.0  ;;  %v2192_v56 = vpop.f32.mrb[60].mxu1  ;;  %1593 = vst.msk [vmem:[%s2554_s8 + $0x1d8] sm:$0xff] %vm1533_vm1, %v1464_v51  ;;  %v1072_v57 = vadd.f32 %v2096_v55, %v2545_v9  ;;  %v1066_v59 = vpop.f32.mrb[61].mxu0 }
 0x161   : > { %1657 = vst.msk [vmem:[%s2554_s8 + $0x3d8] sm:$0xff] %vm1533_vm1, %v1528_v52  ;;  %v1392_v58 = vadd.f32 %v2192_v56, %v2545_v9  ;;  %v1386_v60 = vpop.f32.mrb[61].mxu1  ;;  %1592 = vst.msk [vmem:[%s2554_s8 + $0x1d0] sm:$0xff] %vm1533_vm1, %v1463_v53  ;;  %v1067_v61 = vadd.f32 %v2545_v9, %v1066_v59 }
 0x162   : > { %1656 = vst.msk [vmem:[%s2554_s8 + $0x3d0] sm:$0xff] %vm1533_vm1, %v1527_v54  ;;  %v1387_v62 = vadd.f32 %v2545_v9, %v1386_v60  ;;  %v1466_v63 = vmax.f32 %v1072_v57, 0.0 }
 0x163   : > { %v1530_v0 = vmax.f32 %v1392_v58, 0.0  ;;  %v1465_v1 = vmax.f32 %v1067_v61, 0.0  ;;  %v2099_v3 = vpop.f32.mrb[62].mxu0 }
 0x164   : > { %v1529_v2 = vmax.f32 %v1387_v62, 0.0  ;;  %v2195_v4 = vpop.f32.mrb[62].mxu1  ;;  %1595 = vst.msk [vmem:[%s2554_s8 + $0x1e8] sm:$0xff] %vm1533_vm1, %v1466_v63  ;;  %v1082_v5 = vadd.f32 %v2099_v3, %v2545_v9  ;;  %v1076_v7 = vpop.f32.mrb[63].mxu0 }
 0x165   : > { %1659 = vst.msk [vmem:[%s2554_s8 + $0x3e8] sm:$0xff] %vm1533_vm1, %v1530_v0  ;;  %v1402_v6 = vadd.f32 %v2195_v4, %v2545_v9  ;;  %v1396_v8 = vpop.f32.mrb[63].mxu1  ;;  %1594 = vst.msk [vmem:[%s2554_s8 + $0x1e0] sm:$0xff] %vm1533_vm1, %v1465_v1  ;;  %v1077_v10 = vadd.f32 %v2545_v9, %v1076_v7 }
 0x166   : > { %1658 = vst.msk [vmem:[%s2554_s8 + $0x3e0] sm:$0xff] %vm1533_vm1, %v1529_v2  ;;  %v1397_v11 = vadd.f32 %v2545_v9, %v1396_v8  ;;  %v1468_v12 = vmax.f32 %v1082_v5, 0.0 }
 0x167   : > { %v1532_v13 = vmax.f32 %v1402_v6, 0.0  ;;  %v1467_v14 = vmax.f32 %v1077_v10, 0.0 }
 0x168   : > { %v1531_v15 = vmax.f32 %v1397_v11, 0.0  ;;  %1597 = vst.msk [vmem:[%s2554_s8 + $0x1f8] sm:$0xff] %vm1533_vm1, %v1468_v12 }
 0x169   : > { %1661 = vst.msk [vmem:[%s2554_s8 + $0x3f8] sm:$0xff] %vm1533_vm1, %v1532_v13  ;;  %1596 = vst.msk [vmem:[%s2554_s8 + $0x1f0] sm:$0xff] %vm1533_vm1, %v1467_v14 }
 0x16a   : > { %1660 = vst.msk [vmem:[%s2554_s8 + $0x3f0] sm:$0xff] %vm1533_vm1, %v1531_v15 }
 0x16b PF: > { %s13_s12 = sadd.s32 1, %s2228_s12  }
 0x16c   : > { %p10_p4 = scmp.ge.s32.totalorder %s13_s12, 4  }
 0x16e   :  { %12 = sbr.rel (!%p10_p4) target bundleno = 1 (0x1), region = 62 }

// kernel: encoder_forward.5
= control target key start
LH: loop header
LB: loop body
LE: loop exit
PB: predicated region body
PF: predicated region fallthrough
CT: control target
= control target key end

     0   :  { %v646_v0 = vmov 0.0|0.0   ;;  %vm510_vm0 = vcmask 261120   ;;  %s1339_s1 = inlined_call_operand.vmem [shape: f32[256,32], index: 1, kind: input, shape index: {}]   ;;  %s1340_s0 = inlined_call_operand.vmem [shape: f32[392,256], index: 0, kind: input, shape index: {}]   ;;  %s1341_s2 = inlined_call_operand.vmem [shape: f32[1,32], index: 2, kind: input, shape index: {}]   ;;  %s1342_s3 = inlined_call_operand.vmem [shape: f32[392,32], index: 3, kind: output, shape index: {}]  }
   0x1   :  { %565 = vmatprep.subr.bf16.mxu0 %v646_v0  ;;  %v112_v1 = vld [vmem:[%s1339_s1] sm:$0xff]  ;;  %v113_v2 = vld [vmem:[%s1339_s1 + $0x8] sm:$0xff]  ;;  %613 = vmatprep.subr.bf16.mxu1 %v646_v0  ;;  %v114_v3 = vld [vmem:[%s1339_s1 + $0x10] sm:$0xff] }
   0x2   :  { %v566_v4 = vpack.c.bf16 %v113_v2, %v112_v1  ;;  %v115_v5 = vld [vmem:[%s1339_s1 + $0x18] sm:$0xff]  ;;  %v116_v7 = vld [vmem:[%s1339_s1 + $0x20] sm:$0xff]  ;;  %v117_v8 = vld [vmem:[%s1339_s1 + $0x28] sm:$0xff] }
   0x3   :  { %v569_v6 = vpack.c.bf16 %v115_v5, %v114_v3  ;;  %v572_v9 = vpack.c.bf16 %v117_v8, %v116_v7  ;;  %v118_v10 = vld [vmem:[%s1339_s1 + $0x30] sm:$0xff]  ;;  %v119_v11 = vld [vmem:[%s1339_s1 + $0x38] sm:$0xff]  ;;  %v15_v12 = vld [vmem:[%s1340_s0 + $0x8] sm:$0xff] }
   0x4   :  { %567 = vmatpush1.bf16.msra.mxu0 %v566_v4  ;;  %629 = vmatpush1.bf16.msra.mxu1 %v566_v4  ;;  %v575_v13 = vpack.c.bf16 %v119_v11, %v118_v10  ;;  %v65_v14 = vld [vmem:[%s1340_s0 + $0x198] sm:$0xff]  ;;  %v120_v15 = vld [vmem:[%s1339_s1 + $0x40] sm:$0xff]  ;;  %v121_v16 = vld [vmem:[%s1339_s1 + $0x48] sm:$0xff] }
   0x5   :  { %568 = vmatprep.subr.bf16.mxu0 %v646_v0  ;;  %614 = vmatprep.subr.bf16.mxu1 %v646_v0  ;;  %v578_v17 = vpack.c.bf16 %v121_v16, %v120_v15  ;;  %v122_v18 = vld [vmem:[%s1339_s1 + $0x50] sm:$0xff]  ;;  %v123_v19 = vld [vmem:[%s1339_s1 + $0x58] sm:$0xff]  ;;  %v124_v21 = vld [vmem:[%s1339_s1 + $0x60] sm:$0xff] }
   0x6   :  { %215 = vmatprep.mubr.f32.mxu0 %v15_v12  ;;  %340 = vmatprep.mubr.f32.mxu1 %v65_v14  ;;  %v581_v20 = vpack.c.bf16 %v123_v19, %v122_v18  ;;  %v125_v22 = vld [vmem:[%s1339_s1 + $0x68] sm:$0xff]  ;;  %v126_v24 = vld [vmem:[%s1339_s1 + $0x70] sm:$0xff]  ;;  %v127_v25 = vld [vmem:[%s1339_s1 + $0x78] sm:$0xff] }
   0x7   :  { %v584_v23 = vpack.c.bf16 %v125_v22, %v124_v21  ;;  %v587_v26 = vpack.c.bf16 %v127_v25, %v126_v24  ;;  %v128_v27 = vld [vmem:[%s1339_s1 + $0x80] sm:$0xff]  ;;  %v129_v28 = vld [vmem:[%s1339_s1 + $0x88] sm:$0xff]  ;;  %v130_v30 = vld [vmem:[%s1339_s1 + $0x90] sm:$0xff] }
   0x8   :  { %570 = vmatpush1.bf16.msra.mxu0 %v569_v6  ;;  %630 = vmatpush1.bf16.msra.mxu1 %v569_v6  ;;  %v590_v29 = vpack.c.bf16 %v129_v28, %v128_v27  ;;  %v131_v31 = vld [vmem:[%s1339_s1 + $0x98] sm:$0xff]  ;;  %v132_v33 = vld [vmem:[%s1339_s1 + $0xa0] sm:$0xff]  ;;  %v133_v34 = vld [vmem:[%s1339_s1 + $0xa8] sm:$0xff] }
   0x9   :  { %571 = vmatprep.subr.bf16.mxu0 %v646_v0  ;;  %615 = vmatprep.subr.bf16.mxu1 %v646_v0  ;;  %v593_v32 = vpack.c.bf16 %v131_v31, %v130_v30  ;;  %v596_v35 = vpack.c.bf16 %v133_v34, %v132_v33  ;;  %v134_v36 = vld [vmem:[%s1339_s1 + $0xb0] sm:$0xff]  ;;  %v135_v37 = vld [vmem:[%s1339_s1 + $0xb8] sm:$0xff]  ;;  %v136_v39 = vld [vmem:[%s1339_s1 + $0xc0] sm:$0xff] }
   0xa   :  { %v599_v38 = vpack.c.bf16 %v135_v37, %v134_v36  ;;  %v137_v40 = vld [vmem:[%s1339_s1 + $0xc8] sm:$0xff]  ;;  %v138_v42 = vld [vmem:[%s1339_s1 + $0xd0] sm:$0xff]  ;;  %v139_v43 = vld [vmem:[%s1339_s1 + $0xd8] sm:$0xff] }
   0xb   :  { %v602_v41 = vpack.c.bf16 %v137_v40, %v136_v39  ;;  %v605_v44 = vpack.c.bf16 %v139_v43, %v138_v42  ;;  %v140_v45 = vld [vmem:[%s1339_s1 + $0xe0] sm:$0xff]  ;;  %v141_v46 = vld [vmem:[%s1339_s1 + $0xe8] sm:$0xff]  ;;  %v142_v48 = vld [vmem:[%s1339_s1 + $0xf0] sm:$0xff] }
   0xc   :  { %573 = vmatpush1.bf16.msra.mxu0 %v572_v9  ;;  %631 = vmatpush1.bf16.msra.mxu1 %v572_v9  ;;  %v608_v47 = vpack.c.bf16 %v141_v46, %v140_v45  ;;  %v143_v49 = vld [vmem:[%s1339_s1 + $0xf8] sm:$0xff]  ;;  %v14_v51 = vld [vmem:[%s1340_s0] sm:$0xff]  ;;  %v64_v52 = vld [vmem:[%s1340_s0 + $0x190] sm:$0xff] }
   0xd   :  { %574 = vmatprep.subr.bf16.mxu0 %v646_v0  ;;  %616 = vmatprep.subr.bf16.mxu1 %v646_v0  ;;  %v611_v50 = vpack.c.bf16 %v143_v49, %v142_v48  ;;  %v17_v53 = vld [vmem:[%s1340_s0 + $0x18] sm:$0xff]  ;;  %v67_v54 = vld [vmem:[%s1340_s0 + $0x1a8] sm:$0xff]  ;;  %v16_v55 = vld [vmem:[%s1340_s0 + $0x10] sm:$0xff] }
   0xe   :  { %v66_v56 = vld [vmem:[%s1340_s0 + $0x1a0] sm:$0xff]  ;;  %v19_v57 = vld [vmem:[%s1340_s0 + $0x28] sm:$0xff]  ;;  %v69_v58 = vld [vmem:[%s1340_s0 + $0x1b8] sm:$0xff] }
   0xf   :  { %v18_v59 = vld [vmem:[%s1340_s0 + $0x20] sm:$0xff]  ;;  %v68_v60 = vld [vmem:[%s1340_s0 + $0x1b0] sm:$0xff]  ;;  %v21_v61 = vld [vmem:[%s1340_s0 + $0x38] sm:$0xff] }
  0x10   :  { %576 = vmatpush1.bf16.msra.mxu0 %v575_v13  ;;  %632 = vmatpush1.bf16.msra.mxu1 %v575_v13  ;;  %v71_v62 = vld [vmem:[%s1340_s0 + $0x1c8] sm:$0xff]  ;;  %v20_v63 = vld [vmem:[%s1340_s0 + $0x30] sm:$0xff]  ;;  %v73_v2 = vld [vmem:[%s1340_s0 + $0x1d8] sm:$0xff] }
  0x11   :  { %577 = vmatprep.subr.bf16.mxu0 %v646_v0  ;;  %617 = vmatprep.subr.bf16.mxu1 %v646_v0  ;;  %v23_v1 = vld [vmem:[%s1340_s0 + $0x48] sm:$0xff]  ;;  %v22_v3 = vld [vmem:[%s1340_s0 + $0x40] sm:$0xff]  ;;  %v72_v4 = vld [vmem:[%s1340_s0 + $0x1d0] sm:$0xff] }
  0x12   :  { %v25_v5 = vld [vmem:[%s1340_s0 + $0x58] sm:$0xff]  ;;  %v75_v6 = vld [vmem:[%s1340_s0 + $0x1e8] sm:$0xff]  ;;  %v24_v7 = vld [vmem:[%s1340_s0 + $0x50] sm:$0xff] }
  0x13   :  { %v74_v8 = vld [vmem:[%s1340_s0 + $0x1e0] sm:$0xff]  ;;  %v27_v9 = vld [vmem:[%s1340_s0 + $0x68] sm:$0xff]  ;;  %v77_v10 = vld [vmem:[%s1340_s0 + $0x1f8] sm:$0xff] }
  0x14   :  { %579 = vmatpush1.bf16.msra.mxu0 %v578_v17  ;;  %633 = vmatpush1.bf16.msra.mxu1 %v578_v17  ;;  %v26_v11 = vld [vmem:[%s1340_s0 + $0x60] sm:$0xff]  ;;  %v76_v12 = vld [vmem:[%s1340_s0 + $0x1f0] sm:$0xff]  ;;  %v29_v13 = vld [vmem:[%s1340_s0 + $0x78] sm:$0xff] }
  0x15   :  { %580 = vmatprep.subr.bf16.mxu0 %v646_v0  ;;  %618 = vmatprep.subr.bf16.mxu1 %v646_v0  ;;  %v79_v14 = vld [vmem:[%s1340_s0 + $0x208] sm:$0xff]  ;;  %v28_v15 = vld [vmem:[%s1340_s0 + $0x70] sm:$0xff]  ;;  %v78_v16 = vld [vmem:[%s1340_s0 + $0x200] sm:$0xff] }
  0x16   :  { %v31_v17 = vld [vmem:[%s1340_s0 + $0x88] sm:$0xff]  ;;  %v81_v18 = vld [vmem:[%s1340_s0 + $0x218] sm:$0xff]  ;;  %v30_v19 = vld [vmem:[%s1340_s0 + $0x80] sm:$0xff] }
  0x17   :  { %v33_v21 = vld [vmem:[%s1340_s0 + $0x98] sm:$0xff]  ;;  %v83_v22 = vld [vmem:[%s1340_s0 + $0x228] sm:$0xff]  ;;  %v82_v24 = vld [vmem:[%s1340_s0 + $0x220] sm:$0xff] }
  0x18   :  { %582 = vmatpush1.bf16.msra.mxu0 %v581_v20  ;;  %634 = vmatpush1.bf16.msra.mxu1 %v581_v20  ;;  %v80_v20 = vld [vmem:[%s1340_s0 + $0x210] sm:$0xff]  ;;  %v35_v25 = vld [vmem:[%s1340_s0 + $0xa8] sm:$0xff]  ;;  %v34_v27 = vld [vmem:[%s1340_s0 + $0xa0] sm:$0xff] }
  0x19   :  { %583 = vmatprep.subr.bf16.mxu0 %v646_v0  ;;  %619 = vmatprep.subr.bf16.mxu1 %v646_v0  ;;  %v84_v28 = vld [vmem:[%s1340_s0 + $0x230] sm:$0xff]  ;;  %v87_v30 = vld [vmem:[%s1340_s0 + $0x248] sm:$0xff]  ;;  %v89_v34 = vld [vmem:[%s1340_s0 + $0x258] sm:$0xff] }
  0x1a   :  { %v36_v31 = vld [vmem:[%s1340_s0 + $0xb0] sm:$0xff]  ;;  %v39_v33 = vld [vmem:[%s1340_s0 + $0xc8] sm:$0xff]  ;;  %v41_v37 = vld [vmem:[%s1340_s0 + $0xd8] sm:$0xff] }
  0x1b   :  { %v88_v36 = vld [vmem:[%s1340_s0 + $0x250] sm:$0xff]  ;;  %v90_v40 = vld [vmem:[%s1340_s0 + $0x260] sm:$0xff]  ;;  %v93_v42 = vld [vmem:[%s1340_s0 + $0x278] sm:$0xff] }
  0x1c   :  { %585 = vmatpush1.bf16.msra.mxu0 %v584_v23  ;;  %635 = vmatpush1.bf16.msra.mxu1 %v584_v23  ;;  %v32_v23 = vld [vmem:[%s1340_s0 + $0x90] sm:$0xff]  ;;  %v42_v43 = vld [vmem:[%s1340_s0 + $0xe0] sm:$0xff]  ;;  %v45_v45 = vld [vmem:[%s1340_s0 + $0xf8] sm:$0xff] }
  0x1d   :  { %586 = vmatprep.subr.bf16.mxu0 %v646_v0  ;;  %620 = vmatprep.subr.bf16.mxu1 %v646_v0  ;;  %v40_v39 = vld [vmem:[%s1340_s0 + $0xd0] sm:$0xff]  ;;  %v95_v46 = vld [vmem:[%s1340_s0 + $0x288] sm:$0xff]  ;;  %v94_v48 = vld [vmem:[%s1340_s0 + $0x280] sm:$0xff] }
  0x1e   :  { %v47_v49 = vld [vmem:[%s1340_s0 + $0x108] sm:$0xff] }
  0x20   :  { %588 = vmatpush1.bf16.msra.mxu0 %v587_v26  ;;  %636 = vmatpush1.bf16.msra.mxu1 %v587_v26  ;;  %v85_v26 = vld [vmem:[%s1340_s0 + $0x238] sm:$0xff] }
  0x21   :  { %589 = vmatprep.subr.bf16.mxu0 %v646_v0  ;;  %621 = vmatprep.subr.bf16.mxu1 %v646_v0 }
  0x24   :  { %591 = vmatpush1.bf16.msra.mxu0 %v590_v29  ;;  %637 = vmatpush1.bf16.msra.mxu1 %v590_v29  ;;  %v37_v29 = vld [vmem:[%s1340_s0 + $0xb8] sm:$0xff] }
  0x25   :  { %592 = vmatprep.subr.bf16.mxu0 %v646_v0  ;;  %622 = vmatprep.subr.bf16.mxu1 %v646_v0 }
  0x28   :  { %594 = vmatpush1.bf16.msra.mxu0 %v593_v32  ;;  %638 = vmatpush1.bf16.msra.mxu1 %v593_v32  ;;  %v86_v32 = vld [vmem:[%s1340_s0 + $0x240] sm:$0xff] }
  0x29   :  { %595 = vmatprep.subr.bf16.mxu0 %v646_v0  ;;  %623 = vmatprep.subr.bf16.mxu1 %v646_v0 }
  0x2c   :  { %597 = vmatpush1.bf16.msra.mxu0 %v596_v35  ;;  %639 = vmatpush1.bf16.msra.mxu1 %v596_v35  ;;  %v38_v35 = vld [vmem:[%s1340_s0 + $0xc0] sm:$0xff] }
  0x2d   :  { %598 = vmatprep.subr.bf16.mxu0 %v646_v0  ;;  %624 = vmatprep.subr.bf16.mxu1 %v646_v0 }
  0x30   :  { %600 = vmatpush1.bf16.msra.mxu0 %v599_v38  ;;  %640 = vmatpush1.bf16.msra.mxu1 %v599_v38  ;;  %v91_v38 = vld [vmem:[%s1340_s0 + $0x268] sm:$0xff] }
  0x31   :  { %601 = vmatprep.subr.bf16.mxu0 %v646_v0  ;;  %625 = vmatprep.subr.bf16.mxu1 %v646_v0 }
  0x34   :  { %603 = vmatpush1.bf16.msra.mxu0 %v602_v41  ;;  %641 = vmatpush1.bf16.msra.mxu1 %v602_v41  ;;  %v43_v41 = vld [vmem:[%s1340_s0 + $0xe8] sm:$0xff] }
  0x35   :  { %604 = vmatprep.subr.bf16.mxu0 %v646_v0  ;;  %626 = vmatprep.subr.bf16.mxu1 %v646_v0 }
  0x38   :  { %606 = vmatpush1.bf16.msra.mxu0 %v605_v44  ;;  %642 = vmatpush1.bf16.msra.mxu1 %v605_v44  ;;  %v92_v44 = vld [vmem:[%s1340_s0 + $0x270] sm:$0xff] }
  0x39   :  { %607 = vmatprep.subr.bf16.mxu0 %v646_v0  ;;  %627 = vmatprep.subr.bf16.mxu1 %v646_v0 }
  0x3c   :  { %609 = vmatpush1.bf16.msra.mxu0 %v608_v47  ;;  %643 = vmatpush1.bf16.msra.mxu1 %v608_v47  ;;  %v44_v47 = vld [vmem:[%s1340_s0 + $0xf0] sm:$0xff] }
  0x3d   :  { %610 = vmatprep.subr.bf16.mxu0 %v646_v0  ;;  %628 = vmatprep.subr.bf16.mxu1 %v646_v0  ;;  %v70_v0 = vld [vmem:[%s1340_s0 + $0x1c0] sm:$0xff] }
  0x40   :  { %612 = vmatpush1.bf16.msra.mxu0 %v611_v50  ;;  %644 = vmatpush1.bf16.msra.mxu1 %v611_v50  ;;  %v97_v50 = vld [vmem:[%s1340_s0 + $0x298] sm:$0xff] }
  0x43   :  { %216 = vmatmul.mubr.f32.vlgmr.msra.gmra.mrb[0].mxu0 %v14_v51  ;;  %341 = vmatmul.mubr.f32.vlgmr.msra.gmra.mrb[0].mxu1 %v64_v52  ;;  %v46_v51 = vld [vmem:[%s1340_s0 + $0x100] sm:$0xff]  ;;  %v96_v52 = vld [vmem:[%s1340_s0 + $0x290] sm:$0xff] }
  0x44   :  { %220 = vmatprep.mubr.f32.mxu0 %v17_v53  ;;  %345 = vmatprep.mubr.f32.mxu1 %v67_v54  ;;  %v49_v53 = vld [vmem:[%s1340_s0 + $0x118] sm:$0xff]  ;;  %v99_v54 = vld [vmem:[%s1340_s0 + $0x2a8] sm:$0xff] }
  0x47   :  { %221 = vmatmul.mubr.f32.gmra.mrb[2].mxu0 %v16_v55  ;;  %346 = vmatmul.mubr.f32.gmra.mrb[2].mxu1 %v66_v56  ;;  %v48_v55 = vld [vmem:[%s1340_s0 + $0x110] sm:$0xff]  ;;  %v98_v56 = vld [vmem:[%s1340_s0 + $0x2a0] sm:$0xff] }
  0x48   :  { %225 = vmatprep.mubr.f32.mxu0 %v19_v57  ;;  %350 = vmatprep.mubr.f32.mxu1 %v69_v58  ;;  %v51_v57 = vld [vmem:[%s1340_s0 + $0x128] sm:$0xff]  ;;  %v101_v58 = vld [vmem:[%s1340_s0 + $0x2b8] sm:$0xff] }
  0x4b   :  { %226 = vmatmul.mubr.f32.gmra.mrb[4].mxu0 %v18_v59  ;;  %351 = vmatmul.mubr.f32.gmra.mrb[4].mxu1 %v68_v60  ;;  %v50_v59 = vld [vmem:[%s1340_s0 + $0x120] sm:$0xff]  ;;  %v100_v60 = vld [vmem:[%s1340_s0 + $0x2b0] sm:$0xff] }
  0x4c   :  { %230 = vmatprep.mubr.f32.mxu0 %v21_v61  ;;  %355 = vmatprep.mubr.f32.mxu1 %v71_v62  ;;  %v53_v61 = vld [vmem:[%s1340_s0 + $0x138] sm:$0xff]  ;;  %v103_v62 = vld [vmem:[%s1340_s0 + $0x2c8] sm:$0xff] }
  0x4f   :  { %231 = vmatmul.mubr.f32.gmra.mrb[6].mxu0 %v20_v63  ;;  %356 = vmatmul.mubr.f32.gmra.mrb[6].mxu1 %v70_v0  ;;  %v52_v63 = vld [vmem:[%s1340_s0 + $0x130] sm:$0xff]  ;;  %v102_v0 = vld [vmem:[%s1340_s0 + $0x2c0] sm:$0xff] }
  0x50   :  { %235 = vmatprep.mubr.f32.mxu0 %v23_v1  ;;  %360 = vmatprep.mubr.f32.mxu1 %v73_v2  ;;  %v55_v1 = vld [vmem:[%s1340_s0 + $0x148] sm:$0xff]  ;;  %v105_v2 = vld [vmem:[%s1340_s0 + $0x2d8] sm:$0xff] }
  0x53   :  { %236 = vmatmul.mubr.f32.gmra.mrb[8].mxu0 %v22_v3  ;;  %361 = vmatmul.mubr.f32.gmra.mrb[8].mxu1 %v72_v4  ;;  %v54_v3 = vld [vmem:[%s1340_s0 + $0x140] sm:$0xff]  ;;  %v104_v4 = vld [vmem:[%s1340_s0 + $0x2d0] sm:$0xff] }
  0x54   :  { %240 = vmatprep.mubr.f32.mxu0 %v25_v5  ;;  %365 = vmatprep.mubr.f32.mxu1 %v75_v6  ;;  %v57_v5 = vld [vmem:[%s1340_s0 + $0x158] sm:$0xff]  ;;  %v107_v6 = vld [vmem:[%s1340_s0 + $0x2e8] sm:$0xff] }
  0x57   :  { %241 = vmatmul.mubr.f32.gmra.mrb[10].mxu0 %v24_v7  ;;  %366 = vmatmul.mubr.f32.gmra.mrb[10].mxu1 %v74_v8  ;;  %v56_v7 = vld [vmem:[%s1340_s0 + $0x150] sm:$0xff]  ;;  %v106_v8 = vld [vmem:[%s1340_s0 + $0x2e0] sm:$0xff] }
  0x58   :  { %245 = vmatprep.mubr.f32.mxu0 %v27_v9  ;;  %370 = vmatprep.mubr.f32.mxu1 %v77_v10  ;;  %v59_v9 = vld [vmem:[%s1340_s0 + $0x168] sm:$0xff]  ;;  %v109_v10 = vld [vmem:[%s1340_s0 + $0x2f8] sm:$0xff] }
  0x5b   :  { %246 = vmatmul.mubr.f32.gmra.mrb[12].mxu0 %v26_v11  ;;  %371 = vmatmul.mubr.f32.gmra.mrb[12].mxu1 %v76_v12  ;;  %v58_v11 = vld [vmem:[%s1340_s0 + $0x160] sm:$0xff]  ;;  %v108_v12 = vld [vmem:[%s1340_s0 + $0x2f0] sm:$0xff] }
  0x5c   :  { %250 = vmatprep.mubr.f32.mxu0 %v29_v13  ;;  %375 = vmatprep.mubr.f32.mxu1 %v79_v14  ;;  %v61_v13 = vld [vmem:[%s1340_s0 + $0x178] sm:$0xff]  ;;  %v111_v14 = vld [vmem:[%s1340_s0 + $0x308] sm:$0xff] }
  0x5f   :  { %251 = vmatmul.mubr.f32.gmra.mrb[14].mxu0 %v28_v15  ;;  %376 = vmatmul.mubr.f32.gmra.mrb[14].mxu1 %v78_v16  ;;  %v60_v15 = vld [vmem:[%s1340_s0 + $0x170] sm:$0xff]  ;;  %v110_v16 = vld [vmem:[%s1340_s0 + $0x300] sm:$0xff] }
  0x60   :  { %255 = vmatprep.mubr.f32.mxu0 %v31_v17  ;;  %380 = vmatprep.mubr.f32.mxu1 %v81_v18  ;;  %v63_v17 = vld [vmem:[%s1340_s0 + $0x188] sm:$0xff]  ;;  %v62_v18 = vld [vmem:[%s1340_s0 + $0x180] sm:$0xff] }
  0x63   :  { %256 = vmatmul.mubr.f32.gmra.mrb[16].mxu0 %v30_v19  ;;  %381 = vmatmul.mubr.f32.gmra.mrb[16].mxu1 %v80_v20  ;;  %v1092_v19 = vld [vmem:[%s1341_s2] ss:$0 sm:$0xff] }
  0x64   :  { %260 = vmatprep.mubr.f32.mxu0 %v33_v21  ;;  %385 = vmatprep.mubr.f32.mxu1 %v83_v22 }
  0x67   :  { %261 = vmatmul.mubr.f32.gmra.mrb[18].mxu0 %v32_v23  ;;  %386 = vmatmul.mubr.f32.gmra.mrb[18].mxu1 %v82_v24 }
  0x68   :  { %265 = vmatprep.mubr.f32.mxu0 %v35_v25  ;;  %390 = vmatprep.mubr.f32.mxu1 %v85_v26 }
  0x6b   :  { %266 = vmatmul.mubr.f32.gmra.mrb[20].mxu0 %v34_v27  ;;  %391 = vmatmul.mubr.f32.gmra.mrb[20].mxu1 %v84_v28 }
  0x6c   :  { %270 = vmatprep.mubr.f32.mxu0 %v37_v29  ;;  %395 = vmatprep.mubr.f32.mxu1 %v87_v30 }
  0x6f   :  { %271 = vmatmul.mubr.f32.gmra.mrb[22].mxu0 %v36_v31  ;;  %396 = vmatmul.mubr.f32.gmra.mrb[22].mxu1 %v86_v32 }
  0x70   :  { %275 = vmatprep.mubr.f32.mxu0 %v39_v33  ;;  %400 = vmatprep.mubr.f32.mxu1 %v89_v34 }
  0x73   :  { %276 = vmatmul.mubr.f32.gmra.mrb[24].mxu0 %v38_v35  ;;  %401 = vmatmul.mubr.f32.gmra.mrb[24].mxu1 %v88_v36 }
  0x74   :  { %280 = vmatprep.mubr.f32.mxu0 %v41_v37  ;;  %405 = vmatprep.mubr.f32.mxu1 %v91_v38 }
  0x77   :  { %281 = vmatmul.mubr.f32.gmra.mrb[26].mxu0 %v40_v39  ;;  %406 = vmatmul.mubr.f32.gmra.mrb[26].mxu1 %v90_v40 }
  0x78   :  { %285 = vmatprep.mubr.f32.mxu0 %v43_v41  ;;  %410 = vmatprep.mubr.f32.mxu1 %v93_v42 }
  0x7b   :  { %286 = vmatmul.mubr.f32.gmra.mrb[28].mxu0 %v42_v43  ;;  %411 = vmatmul.mubr.f32.gmra.mrb[28].mxu1 %v92_v44 }
  0x7c   :  { %290 = vmatprep.mubr.f32.mxu0 %v45_v45  ;;  %415 = vmatprep.mubr.f32.mxu1 %v95_v46 }
  0x7f   :  { %291 = vmatmul.mubr.f32.gmra.mrb[30].mxu0 %v44_v47  ;;  %416 = vmatmul.mubr.f32.gmra.mrb[30].mxu1 %v94_v48 }
  0x80   :  { %295 = vmatprep.mubr.f32.mxu0 %v47_v49  ;;  %420 = vmatprep.mubr.f32.mxu1 %v97_v50 }
  0x83   :  { %296 = vmatmul.mubr.f32.gmra.mrb[32].mxu0 %v46_v51  ;;  %421 = vmatmul.mubr.f32.gmra.mrb[32].mxu1 %v96_v52 }
  0x84   :  { %300 = vmatprep.mubr.f32.mxu0 %v49_v53  ;;  %425 = vmatprep.mubr.f32.mxu1 %v99_v54 }
  0x87   :  { %301 = vmatmul.mubr.f32.gmra.mrb[34].mxu0 %v48_v55  ;;  %426 = vmatmul.mubr.f32.gmra.mrb[34].mxu1 %v98_v56 }
  0x88   :  { %305 = vmatprep.mubr.f32.mxu0 %v51_v57  ;;  %430 = vmatprep.mubr.f32.mxu1 %v101_v58 }
  0x8b   :  { %306 = vmatmul.mubr.f32.gmra.mrb[36].mxu0 %v50_v59  ;;  %431 = vmatmul.mubr.f32.gmra.mrb[36].mxu1 %v100_v60 }
  0x8c   :  { %310 = vmatprep.mubr.f32.mxu0 %v53_v61  ;;  %435 = vmatprep.mubr.f32.mxu1 %v103_v62 }
  0x8f   :  { %311 = vmatmul.mubr.f32.gmra.mrb[38].mxu0 %v52_v63  ;;  %436 = vmatmul.mubr.f32.gmra.mrb[38].mxu1 %v102_v0 }
  0x90   :  { %315 = vmatprep.mubr.f32.mxu0 %v55_v1  ;;  %440 = vmatprep.mubr.f32.mxu1 %v105_v2 }
  0x93   :  { %316 = vmatmul.mubr.f32.gmra.mrb[40].mxu0 %v54_v3  ;;  %441 = vmatmul.mubr.f32.gmra.mrb[40].mxu1 %v104_v4 }
  0x94   :  { %320 = vmatprep.mubr.f32.mxu0 %v57_v5  ;;  %445 = vmatprep.mubr.f32.mxu1 %v107_v6 }
  0x97   :  { %321 = vmatmul.mubr.f32.gmra.mrb[42].mxu0 %v56_v7  ;;  %446 = vmatmul.mubr.f32.gmra.mrb[42].mxu1 %v106_v8 }
  0x98   :  { %325 = vmatprep.mubr.f32.mxu0 %v59_v9  ;;  %450 = vmatprep.mubr.f32.mxu1 %v109_v10 }
  0x9b   :  { %326 = vmatmul.mubr.f32.gmra.mrb[44].mxu0 %v58_v11  ;;  %451 = vmatmul.mubr.f32.gmra.mrb[44].mxu1 %v108_v12 }
  0x9c   :  { %330 = vmatprep.mubr.f32.mxu0 %v61_v13  ;;  %455 = vmatprep.mubr.f32.mxu1 %v111_v14 }
  0x9f   :  { %331 = vmatmul.mubr.f32.gmra.mrb[46].mxu0 %v60_v15  ;;  %456 = vmatmul.mubr.f32.gmra.mrb[46].mxu1 %v110_v16 }
  0xa0   :  { %335 = vmatprep.mubr.f32.mxu0 %v63_v17 }
  0xa3   :  { %336 = vmatmul.mubr.f32.gmra.mrb[48].mxu0 %v62_v18 }
 0x116   :  { %v217_v20 = vpop.f32.mrb[0].mxu0  ;;  %v342_v21 = vpop.f32.mrb[0].mxu1 }
 0x117   :  { %v218_v22 = vadd.f32 %v1092_v19, %v217_v20  ;;  %v219_v23 = vpop.f32.mrb[1].mxu0  ;;  %v343_v24 = vadd.f32 %v1092_v19, %v342_v21  ;;  %v344_v25 = vpop.f32.mrb[1].mxu1 }
 0x119   :  { %v461_v26 = vmax.f32 %v218_v22, 0.0  ;;  %v486_v27 = vmax.f32 %v343_v24, 0.0 }
 0x11a   :  { %v222_v28 = vpop.f32.mrb[2].mxu0  ;;  %v347_v29 = vpop.f32.mrb[2].mxu1 }
 0x11b   :  { %511 = vst.msk [vmem:[%s1342_s3] sm:$0xff] %vm510_vm0, %v461_v26  ;;  %536 = vst.msk [vmem:[%s1342_s3 + $0xc8] sm:$0xff] %vm510_vm0, %v486_v27  ;;  %v223_v30 = vadd.f32 %v1092_v19, %v222_v28  ;;  %v224_v31 = vpop.f32.mrb[3].mxu0  ;;  %v348_v32 = vadd.f32 %v1092_v19, %v347_v29  ;;  %v349_v33 = vpop.f32.mrb[3].mxu1 }
 0x11d   :  { %v462_v34 = vmax.f32 %v223_v30, 0.0  ;;  %v487_v35 = vmax.f32 %v348_v32, 0.0 }
 0x11e   :  { %v227_v36 = vpop.f32.mrb[4].mxu0  ;;  %v352_v37 = vpop.f32.mrb[4].mxu1 }
 0x11f   :  { %512 = vst.msk [vmem:[%s1342_s3 + $0x8] sm:$0xff] %vm510_vm0, %v462_v34  ;;  %537 = vst.msk [vmem:[%s1342_s3 + $0xd0] sm:$0xff] %vm510_vm0, %v487_v35  ;;  %v228_v38 = vadd.f32 %v1092_v19, %v227_v36  ;;  %v229_v39 = vpop.f32.mrb[5].mxu0  ;;  %v353_v40 = vadd.f32 %v1092_v19, %v352_v37  ;;  %v354_v41 = vpop.f32.mrb[5].mxu1 }
 0x121   :  { %v463_v42 = vmax.f32 %v228_v38, 0.0  ;;  %v488_v43 = vmax.f32 %v353_v40, 0.0 }
 0x122   :  { %v232_v44 = vpop.f32.mrb[6].mxu0  ;;  %v357_v45 = vpop.f32.mrb[6].mxu1 }
 0x123   :  { %513 = vst.msk [vmem:[%s1342_s3 + $0x10] sm:$0xff] %vm510_vm0, %v463_v42  ;;  %538 = vst.msk [vmem:[%s1342_s3 + $0xd8] sm:$0xff] %vm510_vm0, %v488_v43  ;;  %v233_v46 = vadd.f32 %v1092_v19, %v232_v44  ;;  %v234_v47 = vpop.f32.mrb[7].mxu0  ;;  %v358_v48 = vadd.f32 %v1092_v19, %v357_v45  ;;  %v359_v49 = vpop.f32.mrb[7].mxu1 }
 0x125   :  { %v464_v50 = vmax.f32 %v233_v46, 0.0  ;;  %v489_v51 = vmax.f32 %v358_v48, 0.0 }
 0x126   :  { %v237_v52 = vpop.f32.mrb[8].mxu0  ;;  %v362_v53 = vpop.f32.mrb[8].mxu1 }
 0x127   :  { %514 = vst.msk [vmem:[%s1342_s3 + $0x18] sm:$0xff] %vm510_vm0, %v464_v50  ;;  %539 = vst.msk [vmem:[%s1342_s3 + $0xe0] sm:$0xff] %vm510_vm0, %v489_v51  ;;  %v238_v54 = vadd.f32 %v1092_v19, %v237_v52  ;;  %v239_v55 = vpop.f32.mrb[9].mxu0  ;;  %v363_v56 = vadd.f32 %v1092_v19, %v362_v53  ;;  %v364_v57 = vpop.f32.mrb[9].mxu1 }
 0x129   :  { %v465_v58 = vmax.f32 %v238_v54, 0.0  ;;  %v490_v59 = vmax.f32 %v363_v56, 0.0 }
 0x12a   :  { %v242_v60 = vpop.f32.mrb[10].mxu0  ;;  %v367_v61 = vpop.f32.mrb[10].mxu1 }
 0x12b   :  { %515 = vst.msk [vmem:[%s1342_s3 + $0x20] sm:$0xff] %vm510_vm0, %v465_v58  ;;  %540 = vst.msk [vmem:[%s1342_s3 + $0xe8] sm:$0xff] %vm510_vm0, %v490_v59  ;;  %v243_v62 = vadd.f32 %v1092_v19, %v242_v60  ;;  %v244_v63 = vpop.f32.mrb[11].mxu0  ;;  %v368_v0 = vadd.f32 %v1092_v19, %v367_v61  ;;  %v369_v1 = vpop.f32.mrb[11].mxu1 }
 0x12d   :  { %v466_v2 = vmax.f32 %v243_v62, 0.0  ;;  %v491_v3 = vmax.f32 %v368_v0, 0.0 }
 0x12e   :  { %v247_v4 = vpop.f32.mrb[12].mxu0  ;;  %v372_v5 = vpop.f32.mrb[12].mxu1 }
 0x12f   :  { %516 = vst.msk [vmem:[%s1342_s3 + $0x28] sm:$0xff] %vm510_vm0, %v466_v2  ;;  %541 = vst.msk [vmem:[%s1342_s3 + $0xf0] sm:$0xff] %vm510_vm0, %v491_v3  ;;  %v248_v6 = vadd.f32 %v1092_v19, %v247_v4  ;;  %v249_v7 = vpop.f32.mrb[13].mxu0  ;;  %v373_v8 = vadd.f32 %v1092_v19, %v372_v5  ;;  %v374_v9 = vpop.f32.mrb[13].mxu1 }
 0x131   :  { %v467_v10 = vmax.f32 %v248_v6, 0.0  ;;  %v492_v11 = vmax.f32 %v373_v8, 0.0 }
 0x132   :  { %v252_v12 = vpop.f32.mrb[14].mxu0  ;;  %v377_v13 = vpop.f32.mrb[14].mxu1 }
 0x133   :  { %517 = vst.msk [vmem:[%s1342_s3 + $0x30] sm:$0xff] %vm510_vm0, %v467_v10  ;;  %542 = vst.msk [vmem:[%s1342_s3 + $0xf8] sm:$0xff] %vm510_vm0, %v492_v11  ;;  %v253_v14 = vadd.f32 %v1092_v19, %v252_v12  ;;  %v254_v15 = vpop.f32.mrb[15].mxu0  ;;  %v378_v16 = vadd.f32 %v1092_v19, %v377_v13  ;;  %v379_v17 = vpop.f32.mrb[15].mxu1 }
 0x135   :  { %v468_v18 = vmax.f32 %v253_v14, 0.0  ;;  %v493_v20 = vmax.f32 %v378_v16, 0.0 }
 0x136   :  { %v257_v21 = vpop.f32.mrb[16].mxu0  ;;  %v382_v22 = vpop.f32.mrb[16].mxu1 }
 0x137   :  { %518 = vst.msk [vmem:[%s1342_s3 + $0x38] sm:$0xff] %vm510_vm0, %v468_v18  ;;  %543 = vst.msk [vmem:[%s1342_s3 + $0x100] sm:$0xff] %vm510_vm0, %v493_v20  ;;  %v258_v23 = vadd.f32 %v1092_v19, %v257_v21  ;;  %v259_v24 = vpop.f32.mrb[17].mxu0  ;;  %v383_v25 = vadd.f32 %v1092_v19, %v382_v22  ;;  %v384_v26 = vpop.f32.mrb[17].mxu1 }
 0x139   :  { %v469_v27 = vmax.f32 %v258_v23, 0.0  ;;  %v494_v28 = vmax.f32 %v383_v25, 0.0 }
 0x13a   :  { %v262_v29 = vpop.f32.mrb[18].mxu0  ;;  %v387_v30 = vpop.f32.mrb[18].mxu1 }
 0x13b   :  { %519 = vst.msk [vmem:[%s1342_s3 + $0x40] sm:$0xff] %vm510_vm0, %v469_v27  ;;  %544 = vst.msk [vmem:[%s1342_s3 + $0x108] sm:$0xff] %vm510_vm0, %v494_v28  ;;  %v263_v31 = vadd.f32 %v1092_v19, %v262_v29  ;;  %v264_v32 = vpop.f32.mrb[19].mxu0  ;;  %v388_v33 = vadd.f32 %v1092_v19, %v387_v30  ;;  %v389_v34 = vpop.f32.mrb[19].mxu1 }
 0x13d   :  { %v470_v35 = vmax.f32 %v263_v31, 0.0  ;;  %v495_v36 = vmax.f32 %v388_v33, 0.0 }
 0x13e   :  { %v267_v37 = vpop.f32.mrb[20].mxu0  ;;  %v392_v38 = vpop.f32.mrb[20].mxu1 }
 0x13f   :  { %520 = vst.msk [vmem:[%s1342_s3 + $0x48] sm:$0xff] %vm510_vm0, %v470_v35  ;;  %545 = vst.msk [vmem:[%s1342_s3 + $0x110] sm:$0xff] %vm510_vm0, %v495_v36  ;;  %v268_v39 = vadd.f32 %v1092_v19, %v267_v37  ;;  %v269_v40 = vpop.f32.mrb[21].mxu0  ;;  %v393_v41 = vadd.f32 %v1092_v19, %v392_v38  ;;  %v394_v42 = vpop.f32.mrb[21].mxu1 }
 0x141   :  { %v471_v43 = vmax.f32 %v268_v39, 0.0  ;;  %v496_v44 = vmax.f32 %v393_v41, 0.0 }
 0x142   :  { %v272_v45 = vpop.f32.mrb[22].mxu0  ;;  %v397_v46 = vpop.f32.mrb[22].mxu1 }
 0x143   :  { %521 = vst.msk [vmem:[%s1342_s3 + $0x50] sm:$0xff] %vm510_vm0, %v471_v43  ;;  %546 = vst.msk [vmem:[%s1342_s3 + $0x118] sm:$0xff] %vm510_vm0, %v496_v44  ;;  %v273_v47 = vadd.f32 %v1092_v19, %v272_v45  ;;  %v274_v48 = vpop.f32.mrb[23].mxu0  ;;  %v398_v49 = vadd.f32 %v1092_v19, %v397_v46  ;;  %v399_v50 = vpop.f32.mrb[23].mxu1 }
 0x145   :  { %v472_v51 = vmax.f32 %v273_v47, 0.0  ;;  %v497_v52 = vmax.f32 %v398_v49, 0.0 }
 0x146   :  { %v277_v53 = vpop.f32.mrb[24].mxu0  ;;  %v402_v54 = vpop.f32.mrb[24].mxu1 }
 0x147   :  { %522 = vst.msk [vmem:[%s1342_s3 + $0x58] sm:$0xff] %vm510_vm0, %v472_v51  ;;  %547 = vst.msk [vmem:[%s1342_s3 + $0x120] sm:$0xff] %vm510_vm0, %v497_v52  ;;  %v278_v55 = vadd.f32 %v1092_v19, %v277_v53  ;;  %v279_v56 = vpop.f32.mrb[25].mxu0  ;;  %v403_v57 = vadd.f32 %v1092_v19, %v402_v54  ;;  %v404_v58 = vpop.f32.mrb[25].mxu1 }
 0x149   :  { %v473_v59 = vmax.f32 %v278_v55, 0.0  ;;  %v498_v60 = vmax.f32 %v403_v57, 0.0 }
 0x14a   :  { %v282_v61 = vpop.f32.mrb[26].mxu0  ;;  %v407_v62 = vpop.f32.mrb[26].mxu1 }
 0x14b   :  { %523 = vst.msk [vmem:[%s1342_s3 + $0x60] sm:$0xff] %vm510_vm0, %v473_v59  ;;  %548 = vst.msk [vmem:[%s1342_s3 + $0x128] sm:$0xff] %vm510_vm0, %v498_v60  ;;  %v283_v63 = vadd.f32 %v1092_v19, %v282_v61  ;;  %v284_v0 = vpop.f32.mrb[27].mxu0  ;;  %v408_v1 = vadd.f32 %v1092_v19, %v407_v62  ;;  %v409_v2 = vpop.f32.mrb[27].mxu1 }
 0x14d   :  { %v474_v3 = vmax.f32 %v283_v63, 0.0  ;;  %v499_v4 = vmax.f32 %v408_v1, 0.0 }
 0x14e   :  { %v287_v5 = vpop.f32.mrb[28].mxu0  ;;  %v412_v6 = vpop.f32.mrb[28].mxu1 }
 0x14f   :  { %524 = vst.msk [vmem:[%s1342_s3 + $0x68] sm:$0xff] %vm510_vm0, %v474_v3  ;;  %549 = vst.msk [vmem:[%s1342_s3 + $0x130] sm:$0xff] %vm510_vm0, %v499_v4  ;;  %v288_v7 = vadd.f32 %v1092_v19, %v287_v5  ;;  %v289_v8 = vpop.f32.mrb[29].mxu0  ;;  %v413_v9 = vadd.f32 %v1092_v19, %v412_v6  ;;  %v414_v10 = vpop.f32.mrb[29].mxu1 }
 0x151   :  { %v475_v11 = vmax.f32 %v288_v7, 0.0  ;;  %v500_v12 = vmax.f32 %v413_v9, 0.0 }
 0x152   :  { %v292_v13 = vpop.f32.mrb[30].mxu0  ;;  %v417_v14 = vpop.f32.mrb[30].mxu1 }
 0x153   :  { %525 = vst.msk [vmem:[%s1342_s3 + $0x70] sm:$0xff] %vm510_vm0, %v475_v11  ;;  %550 = vst.msk [vmem:[%s1342_s3 + $0x138] sm:$0xff] %vm510_vm0, %v500_v12  ;;  %v293_v15 = vadd.f32 %v1092_v19, %v292_v13  ;;  %v294_v16 = vpop.f32.mrb[31].mxu0  ;;  %v418_v17 = vadd.f32 %v1092_v19, %v417_v14  ;;  %v419_v18 = vpop.f32.mrb[31].mxu1 }
 0x155   :  { %v476_v20 = vmax.f32 %v293_v15, 0.0  ;;  %v501_v21 = vmax.f32 %v418_v17, 0.0 }
 0x156   :  { %v297_v22 = vpop.f32.mrb[32].mxu0  ;;  %v422_v23 = vpop.f32.mrb[32].mxu1 }
 0x157   :  { %526 = vst.msk [vmem:[%s1342_s3 + $0x78] sm:$0xff] %vm510_vm0, %v476_v20  ;;  %551 = vst.msk [vmem:[%s1342_s3 + $0x140] sm:$0xff] %vm510_vm0, %v501_v21  ;;  %v298_v24 = vadd.f32 %v1092_v19, %v297_v22  ;;  %v299_v25 = vpop.f32.mrb[33].mxu0  ;;  %v423_v26 = vadd.f32 %v1092_v19, %v422_v23  ;;  %v424_v27 = vpop.f32.mrb[33].mxu1 }
 0x159   :  { %v477_v28 = vmax.f32 %v298_v24, 0.0  ;;  %v502_v29 = vmax.f32 %v423_v26, 0.0 }
 0x15a   :  { %v302_v30 = vpop.f32.mrb[34].mxu0  ;;  %v427_v31 = vpop.f32.mrb[34].mxu1 }
 0x15b   :  { %527 = vst.msk [vmem:[%s1342_s3 + $0x80] sm:$0xff] %vm510_vm0, %v477_v28  ;;  %552 = vst.msk [vmem:[%s1342_s3 + $0x148] sm:$0xff] %vm510_vm0, %v502_v29  ;;  %v303_v32 = vadd.f32 %v1092_v19, %v302_v30  ;;  %v304_v33 = vpop.f32.mrb[35].mxu0  ;;  %v428_v34 = vadd.f32 %v1092_v19, %v427_v31  ;;  %v429_v35 = vpop.f32.mrb[35].mxu1 }
 0x15d   :  { %v478_v36 = vmax.f32 %v303_v32, 0.0  ;;  %v503_v37 = vmax.f32 %v428_v34, 0.0 }
 0x15e   :  { %v307_v38 = vpop.f32.mrb[36].mxu0  ;;  %v432_v39 = vpop.f32.mrb[36].mxu1 }
 0x15f   :  { %528 = vst.msk [vmem:[%s1342_s3 + $0x88] sm:$0xff] %vm510_vm0, %v478_v36  ;;  %553 = vst.msk [vmem:[%s1342_s3 + $0x150] sm:$0xff] %vm510_vm0, %v503_v37  ;;  %v308_v40 = vadd.f32 %v1092_v19, %v307_v38  ;;  %v309_v41 = vpop.f32.mrb[37].mxu0  ;;  %v433_v42 = vadd.f32 %v1092_v19, %v432_v39  ;;  %v434_v43 = vpop.f32.mrb[37].mxu1 }
 0x161   :  { %v479_v44 = vmax.f32 %v308_v40, 0.0  ;;  %v504_v45 = vmax.f32 %v433_v42, 0.0 }
 0x162   :  { %v312_v46 = vpop.f32.mrb[38].mxu0  ;;  %v437_v47 = vpop.f32.mrb[38].mxu1 }
 0x163   :  { %529 = vst.msk [vmem:[%s1342_s3 + $0x90] sm:$0xff] %vm510_vm0, %v479_v44  ;;  %554 = vst.msk [vmem:[%s1342_s3 + $0x158] sm:$0xff] %vm510_vm0, %v504_v45  ;;  %v313_v48 = vadd.f32 %v1092_v19, %v312_v46  ;;  %v314_v49 = vpop.f32.mrb[39].mxu0  ;;  %v438_v50 = vadd.f32 %v1092_v19, %v437_v47  ;;  %v439_v51 = vpop.f32.mrb[39].mxu1 }
 0x165   :  { %v480_v52 = vmax.f32 %v313_v48, 0.0  ;;  %v505_v53 = vmax.f32 %v438_v50, 0.0 }
 0x166   :  { %v317_v54 = vpop.f32.mrb[40].mxu0  ;;  %v442_v55 = vpop.f32.mrb[40].mxu1 }
 0x167   :  { %530 = vst.msk [vmem:[%s1342_s3 + $0x98] sm:$0xff] %vm510_vm0, %v480_v52  ;;  %555 = vst.msk [vmem:[%s1342_s3 + $0x160] sm:$0xff] %vm510_vm0, %v505_v53  ;;  %v318_v56 = vadd.f32 %v1092_v19, %v317_v54  ;;  %v319_v57 = vpop.f32.mrb[41].mxu0  ;;  %v443_v58 = vadd.f32 %v1092_v19, %v442_v55  ;;  %v444_v59 = vpop.f32.mrb[41].mxu1 }
 0x169   :  { %v481_v60 = vmax.f32 %v318_v56, 0.0  ;;  %v506_v61 = vmax.f32 %v443_v58, 0.0 }
 0x16a   :  { %v322_v62 = vpop.f32.mrb[42].mxu0  ;;  %v447_v63 = vpop.f32.mrb[42].mxu1 }
 0x16b   :  { %531 = vst.msk [vmem:[%s1342_s3 + $0xa0] sm:$0xff] %vm510_vm0, %v481_v60  ;;  %556 = vst.msk [vmem:[%s1342_s3 + $0x168] sm:$0xff] %vm510_vm0, %v506_v61  ;;  %v323_v0 = vadd.f32 %v1092_v19, %v322_v62  ;;  %v324_v1 = vpop.f32.mrb[43].mxu0  ;;  %v448_v2 = vadd.f32 %v1092_v19, %v447_v63  ;;  %v449_v3 = vpop.f32.mrb[43].mxu1 }
 0x16d   :  { %v482_v4 = vmax.f32 %v323_v0, 0.0  ;;  %v507_v5 = vmax.f32 %v448_v2, 0.0 }
 0x16e   :  { %v327_v6 = vpop.f32.mrb[44].mxu0  ;;  %v452_v7 = vpop.f32.mrb[44].mxu1 }
 0x16f   :  { %532 = vst.msk [vmem:[%s1342_s3 + $0xa8] sm:$0xff] %vm510_vm0, %v482_v4  ;;  %557 = vst.msk [vmem:[%s1342_s3 + $0x170] sm:$0xff] %vm510_vm0, %v507_v5  ;;  %v328_v8 = vadd.f32 %v1092_v19, %v327_v6  ;;  %v329_v9 = vpop.f32.mrb[45].mxu0  ;;  %v453_v10 = vadd.f32 %v1092_v19, %v452_v7  ;;  %v454_v11 = vpop.f32.mrb[45].mxu1 }
 0x171   :  { %v483_v12 = vmax.f32 %v328_v8, 0.0  ;;  %v508_v13 = vmax.f32 %v453_v10, 0.0 }
 0x172   :  { %v332_v14 = vpop.f32.mrb[46].mxu0  ;;  %v457_v15 = vpop.f32.mrb[46].mxu1 }
 0x173   :  { %533 = vst.msk [vmem:[%s1342_s3 + $0xb0] sm:$0xff] %vm510_vm0, %v483_v12  ;;  %558 = vst.msk [vmem:[%s1342_s3 + $0x178] sm:$0xff] %vm510_vm0, %v508_v13  ;;  %v333_v16 = vadd.f32 %v1092_v19, %v332_v14  ;;  %v334_v17 = vpop.f32.mrb[47].mxu0  ;;  %v458_v18 = vadd.f32 %v1092_v19, %v457_v15  ;;  %v459_v20 = vpop.f32.mrb[47].mxu1 }
 0x175   :  { %v484_v21 = vmax.f32 %v333_v16, 0.0  ;;  %v509_v22 = vmax.f32 %v458_v18, 0.0 }
 0x176   :  { %v337_v23 = vpop.f32.mrb[48].mxu0 }
 0x177   :  { %534 = vst.msk [vmem:[%s1342_s3 + $0xb8] sm:$0xff] %vm510_vm0, %v484_v21  ;;  %559 = vst.msk [vmem:[%s1342_s3 + $0x180] sm:$0xff] %vm510_vm0, %v509_v22  ;;  %v338_v24 = vadd.f32 %v1092_v19, %v337_v23  ;;  %v339_v25 = vpop.f32.mrb[49].mxu0 }
 0x179   :  { %v485_v26 = vmax.f32 %v338_v24, 0.0 }
 0x17b   :  { %535 = vst.msk [vmem:[%s1342_s3 + $0xc0] sm:$0xff] %vm510_vm0, %v485_v26 }

// kernel: encoder_forward.6
= control target key start
LH: loop header
LB: loop body
LE: loop exit
PB: predicated region body
PF: predicated region fallthrough
CT: control target
= control target key end

     0   :  { %vm350_vm0 = vcmask 523264   ;;  %s917_s1 = inlined_call_operand.vmem [shape: f32[512,64], index: 1, kind: input, shape index: {}]   ;;  %s918_s0 = inlined_call_operand.vmem [shape: f32[72,512], index: 0, kind: input, shape index: {}]   ;;  %s919_s2 = inlined_call_operand.vmem [shape: f32[1,64], index: 2, kind: input, shape index: {}]   ;;  %s920_s3 = inlined_call_operand.vmem [shape: f32[72,64], index: 3, kind: output, shape index: {}]  }
   0x1   :  { %v66_v0 = vld [vmem:[%s917_s1 + $0x80] sm:$0xff]  ;;  %v67_v1 = vld [vmem:[%s917_s1 + $0x88] sm:$0xff]  ;;  %v68_v11 = vld [vmem:[%s917_s1 + $0x90] sm:$0xff] }
   0x2   :  { %v50_v2 = vld [vmem:[%s917_s1] sm:$0xff]  ;;  %v483_v3 = vpack.c.bf16 %v67_v1, %v66_v0  ;;  %v51_v4 = vld [vmem:[%s917_s1 + $0x8] sm:$0xff]  ;;  %v69_v13 = vld [vmem:[%s917_s1 + $0x98] sm:$0xff] }
   0x3   :  { %v98_v5 = vld [vmem:[%s917_s1 + $0x180] sm:$0xff]  ;;  %v99_v6 = vld [vmem:[%s917_s1 + $0x188] sm:$0xff]  ;;  %v485_v7 = vpack.c.bf16 %v51_v4, %v50_v2  ;;  %v52_v14 = vld [vmem:[%s917_s1 + $0x10] sm:$0xff]  ;;  %v487_v16 = vpack.c.bf16 %v69_v13, %v68_v11 }
   0x4   :  { %v515_v8 = vpack.c.bf16 %v99_v6, %v98_v5  ;;  %v82_v9 = vld [vmem:[%s917_s1 + $0x100] sm:$0xff]  ;;  %v83_v10 = vld [vmem:[%s917_s1 + $0x108] sm:$0xff]  ;;  %484 = vmatprep.subr.bf16.mxu0 %v483_v3  ;;  %v53_v15 = vld [vmem:[%s917_s1 + $0x18] sm:$0xff] }
   0x5   :  { %v517_v12 = vpack.c.bf16 %v83_v10, %v82_v9  ;;  %486 = vmatpush3.bf16.msra.mxu0 %v485_v7  ;;  %v489_v17 = vpack.c.bf16 %v53_v15, %v52_v14  ;;  %v100_v18 = vld [vmem:[%s917_s1 + $0x190] sm:$0xff]  ;;  %v101_v19 = vld [vmem:[%s917_s1 + $0x198] sm:$0xff]  ;;  %v70_v23 = vld [vmem:[%s917_s1 + $0xa0] sm:$0xff] }
   0x6   :  { %516 = vmatprep.subr.bf16.mxu1 %v515_v8  ;;  %v84_v20 = vld [vmem:[%s917_s1 + $0x110] sm:$0xff]  ;;  %v519_v21 = vpack.c.bf16 %v101_v19, %v100_v18  ;;  %v85_v22 = vld [vmem:[%s917_s1 + $0x118] sm:$0xff]  ;;  %v71_v24 = vld [vmem:[%s917_s1 + $0xa8] sm:$0xff]  ;;  %488 = vmatprep.subr.bf16.mxu0 %v487_v16 }
   0x7   :  { %518 = vmatpush3.bf16.msra.mxu1 %v517_v12  ;;  %v521_v25 = vpack.c.bf16 %v85_v22, %v84_v20  ;;  %v491_v26 = vpack.c.bf16 %v71_v24, %v70_v23  ;;  %v54_v27 = vld [vmem:[%s917_s1 + $0x20] sm:$0xff]  ;;  %v55_v28 = vld [vmem:[%s917_s1 + $0x28] sm:$0xff]  ;;  %v72_v35 = vld [vmem:[%s917_s1 + $0xb0] sm:$0xff] }
   0x8   :  { %v102_v29 = vld [vmem:[%s917_s1 + $0x1a0] sm:$0xff]  ;;  %520 = vmatprep.subr.bf16.mxu1 %v519_v21  ;;  %v103_v30 = vld [vmem:[%s917_s1 + $0x1a8] sm:$0xff]  ;;  %v493_v33 = vpack.c.bf16 %v55_v28, %v54_v27  ;;  %v73_v36 = vld [vmem:[%s917_s1 + $0xb8] sm:$0xff] }
   0x9   :  { %v86_v31 = vld [vmem:[%s917_s1 + $0x120] sm:$0xff]  ;;  %v87_v32 = vld [vmem:[%s917_s1 + $0x128] sm:$0xff]  ;;  %490 = vmatpush3.bf16.msra.mxu0 %v489_v17  ;;  %v523_v34 = vpack.c.bf16 %v103_v30, %v102_v29  ;;  %v56_v37 = vld [vmem:[%s917_s1 + $0x30] sm:$0xff]  ;;  %v495_v39 = vpack.c.bf16 %v73_v36, %v72_v35 }
   0xa   :  { %492 = vmatprep.subr.bf16.mxu0 %v491_v26  ;;  %v525_v38 = vpack.c.bf16 %v87_v32, %v86_v31  ;;  %v57_v40 = vld [vmem:[%s917_s1 + $0x38] sm:$0xff]  ;;  %v104_v41 = vld [vmem:[%s917_s1 + $0x1b0] sm:$0xff]  ;;  %v74_v46 = vld [vmem:[%s917_s1 + $0xc0] sm:$0xff] }
   0xb   :  { %522 = vmatpush3.bf16.msra.mxu1 %v521_v25  ;;  %v105_v42 = vld [vmem:[%s917_s1 + $0x1b8] sm:$0xff]  ;;  %v88_v44 = vld [vmem:[%s917_s1 + $0x130] sm:$0xff]  ;;  %v75_v47 = vld [vmem:[%s917_s1 + $0xc8] sm:$0xff]  ;;  %v497_v48 = vpack.c.bf16 %v57_v40, %v56_v37 }
   0xc   :  { %524 = vmatprep.subr.bf16.mxu1 %v523_v34  ;;  %v527_v43 = vpack.c.bf16 %v105_v42, %v104_v41  ;;  %v89_v45 = vld [vmem:[%s917_s1 + $0x138] sm:$0xff]  ;;  %v106_v49 = vld [vmem:[%s917_s1 + $0x1c0] sm:$0xff]  ;;  %v107_v50 = vld [vmem:[%s917_s1 + $0x1c8] sm:$0xff]  ;;  %v499_v52 = vpack.c.bf16 %v75_v47, %v74_v46 }
   0xd   :  { %494 = vmatpush3.bf16.msra.mxu0 %v493_v33  ;;  %v529_v51 = vpack.c.bf16 %v89_v45, %v88_v44  ;;  %v58_v53 = vld [vmem:[%s917_s1 + $0x40] sm:$0xff]  ;;  %v59_v54 = vld [vmem:[%s917_s1 + $0x48] sm:$0xff]  ;;  %v531_v56 = vpack.c.bf16 %v107_v50, %v106_v49  ;;  %v76_v58 = vld [vmem:[%s917_s1 + $0xd0] sm:$0xff] }
   0xe   :  { %496 = vmatprep.subr.bf16.mxu0 %v495_v39  ;;  %v90_v55 = vld [vmem:[%s917_s1 + $0x140] sm:$0xff]  ;;  %v91_v57 = vld [vmem:[%s917_s1 + $0x148] sm:$0xff]  ;;  %v77_v59 = vld [vmem:[%s917_s1 + $0xd8] sm:$0xff]  ;;  %v501_v62 = vpack.c.bf16 %v59_v54, %v58_v53 }
   0xf   :  { %526 = vmatpush3.bf16.msra.mxu1 %v525_v38  ;;  %v108_v60 = vld [vmem:[%s917_s1 + $0x1d0] sm:$0xff]  ;;  %v109_v61 = vld [vmem:[%s917_s1 + $0x1d8] sm:$0xff]  ;;  %v533_v63 = vpack.c.bf16 %v91_v57, %v90_v55  ;;  %v503_v0 = vpack.c.bf16 %v77_v59, %v76_v58  ;;  %v78_v6 = vld [vmem:[%s917_s1 + $0xe0] sm:$0xff] }
  0x10   :  { %528 = vmatprep.subr.bf16.mxu1 %v527_v43  ;;  %v60_v1 = vld [vmem:[%s917_s1 + $0x50] sm:$0xff]  ;;  %v61_v2 = vld [vmem:[%s917_s1 + $0x58] sm:$0xff]  ;;  %v535_v4 = vpack.c.bf16 %v109_v61, %v108_v60  ;;  %v79_v7 = vld [vmem:[%s917_s1 + $0xe8] sm:$0xff] }
  0x11   :  { %498 = vmatpush3.bf16.msra.mxu0 %v497_v48  ;;  %v92_v3 = vld [vmem:[%s917_s1 + $0x150] sm:$0xff]  ;;  %v93_v5 = vld [vmem:[%s917_s1 + $0x158] sm:$0xff]  ;;  %v110_v8 = vld [vmem:[%s917_s1 + $0x1e0] sm:$0xff]  ;;  %v505_v10 = vpack.c.bf16 %v61_v2, %v60_v1  ;;  %v507_v14 = vpack.c.bf16 %v79_v7, %v78_v6 }
  0x12   :  { %500 = vmatprep.subr.bf16.mxu0 %v499_v52  ;;  %v111_v9 = vld [vmem:[%s917_s1 + $0x1e8] sm:$0xff]  ;;  %v62_v11 = vld [vmem:[%s917_s1 + $0x60] sm:$0xff]  ;;  %v537_v13 = vpack.c.bf16 %v93_v5, %v92_v3  ;;  %v80_v19 = vld [vmem:[%s917_s1 + $0xf0] sm:$0xff] }
  0x13   :  { %530 = vmatpush3.bf16.msra.mxu1 %v529_v51  ;;  %v63_v12 = vld [vmem:[%s917_s1 + $0x68] sm:$0xff]  ;;  %v94_v15 = vld [vmem:[%s917_s1 + $0x160] sm:$0xff]  ;;  %v539_v18 = vpack.c.bf16 %v111_v9, %v110_v8  ;;  %v81_v20 = vld [vmem:[%s917_s1 + $0xf8] sm:$0xff] }
  0x14   :  { %532 = vmatprep.subr.bf16.mxu1 %v531_v56  ;;  %v95_v16 = vld [vmem:[%s917_s1 + $0x168] sm:$0xff]  ;;  %v17_v21 = vld [vmem:[%s918_s0 + $0x18] sm:$0xff]  ;;  %v112_v22 = vld [vmem:[%s917_s1 + $0x1f0] sm:$0xff]  ;;  %v509_v24 = vpack.c.bf16 %v63_v12, %v62_v11  ;;  %v511_v26 = vpack.c.bf16 %v81_v20, %v80_v19 }
  0x15   :  { %502 = vmatpush3.bf16.msra.mxu0 %v501_v62  ;;  %v15_v17 = vld [vmem:[%s918_s0 + $0x8] sm:$0xff]  ;;  %v113_v23 = vld [vmem:[%s917_s1 + $0x1f8] sm:$0xff]  ;;  %295 = vmatprep.mubr.f32.mxu1 %v17_v21  ;;  %v541_v25 = vpack.c.bf16 %v95_v16, %v94_v15  ;;  %v64_v27 = vld [vmem:[%s917_s1 + $0x70] sm:$0xff] }
  0x16   :  { %504 = vmatprep.subr.bf16.mxu0 %v503_v0  ;;  %185 = vmatprep.mubr.f32.mxu0 %v15_v17  ;;  %v65_v28 = vld [vmem:[%s917_s1 + $0x78] sm:$0xff]  ;;  %v543_v29 = vpack.c.bf16 %v113_v23, %v112_v22  ;;  %v96_v30 = vld [vmem:[%s917_s1 + $0x170] sm:$0xff]  ;;  %v14_v34 = vld [vmem:[%s918_s0] sm:$0xff] }
  0x17   :  { %534 = vmatpush3.bf16.msra.mxu1 %v533_v63  ;;  %v97_v31 = vld [vmem:[%s917_s1 + $0x178] sm:$0xff]  ;;  %v513_v32 = vpack.c.bf16 %v65_v28, %v64_v27  ;;  %v16_v35 = vld [vmem:[%s918_s0 + $0x10] sm:$0xff]  ;;  %v19_v36 = vld [vmem:[%s918_s0 + $0x28] sm:$0xff] }
  0x18   :  { %536 = vmatprep.subr.bf16.mxu1 %v535_v4  ;;  %v545_v33 = vpack.c.bf16 %v97_v31, %v96_v30  ;;  %v21_v37 = vld [vmem:[%s918_s0 + $0x38] sm:$0xff]  ;;  %v18_v38 = vld [vmem:[%s918_s0 + $0x20] sm:$0xff]  ;;  %v20_v39 = vld [vmem:[%s918_s0 + $0x30] sm:$0xff] }
  0x19   :  { %506 = vmatpush3.bf16.msra.mxu0 %v505_v10  ;;  %v23_v40 = vld [vmem:[%s918_s0 + $0x48] sm:$0xff]  ;;  %v25_v41 = vld [vmem:[%s918_s0 + $0x58] sm:$0xff]  ;;  %v22_v42 = vld [vmem:[%s918_s0 + $0x40] sm:$0xff] }
  0x1a   :  { %508 = vmatprep.subr.bf16.mxu0 %v507_v14  ;;  %v24_v43 = vld [vmem:[%s918_s0 + $0x50] sm:$0xff]  ;;  %v27_v44 = vld [vmem:[%s918_s0 + $0x68] sm:$0xff]  ;;  %v29_v45 = vld [vmem:[%s918_s0 + $0x78] sm:$0xff] }
  0x1b   :  { %538 = vmatpush3.bf16.msra.mxu1 %v537_v13  ;;  %v26_v46 = vld [vmem:[%s918_s0 + $0x60] sm:$0xff]  ;;  %v28_v47 = vld [vmem:[%s918_s0 + $0x70] sm:$0xff]  ;;  %v31_v48 = vld [vmem:[%s918_s0 + $0x88] sm:$0xff] }
  0x1c   :  { %540 = vmatprep.subr.bf16.mxu1 %v539_v18  ;;  %v33_v49 = vld [vmem:[%s918_s0 + $0x98] sm:$0xff]  ;;  %v30_v50 = vld [vmem:[%s918_s0 + $0x80] sm:$0xff]  ;;  %v32_v51 = vld [vmem:[%s918_s0 + $0x90] sm:$0xff] }
  0x1d   :  { %510 = vmatpush3.bf16.msra.mxu0 %v509_v24  ;;  %v35_v52 = vld [vmem:[%s918_s0 + $0xa8] sm:$0xff]  ;;  %v37_v53 = vld [vmem:[%s918_s0 + $0xb8] sm:$0xff]  ;;  %v34_v54 = vld [vmem:[%s918_s0 + $0xa0] sm:$0xff] }
  0x1e   :  { %512 = vmatprep.subr.bf16.mxu0 %v511_v26  ;;  %v36_v55 = vld [vmem:[%s918_s0 + $0xb0] sm:$0xff]  ;;  %v39_v56 = vld [vmem:[%s918_s0 + $0xc8] sm:$0xff]  ;;  %v41_v57 = vld [vmem:[%s918_s0 + $0xd8] sm:$0xff] }
  0x1f   :  { %542 = vmatpush3.bf16.msra.mxu1 %v541_v25  ;;  %v38_v58 = vld [vmem:[%s918_s0 + $0xc0] sm:$0xff]  ;;  %v40_v59 = vld [vmem:[%s918_s0 + $0xd0] sm:$0xff]  ;;  %v43_v60 = vld [vmem:[%s918_s0 + $0xe8] sm:$0xff] }
  0x20   :  { %544 = vmatprep.subr.bf16.mxu1 %v543_v29  ;;  %v45_v61 = vld [vmem:[%s918_s0 + $0xf8] sm:$0xff]  ;;  %v42_v62 = vld [vmem:[%s918_s0 + $0xe0] sm:$0xff]  ;;  %v44_v63 = vld [vmem:[%s918_s0 + $0xf0] sm:$0xff] }
  0x21   :  { %514 = vmatpush3.bf16.msra.mxu0 %v513_v32  ;;  %v47_v0 = vld [vmem:[%s918_s0 + $0x108] sm:$0xff]  ;;  %v49_v1 = vld [vmem:[%s918_s0 + $0x118] sm:$0xff]  ;;  %v46_v2 = vld [vmem:[%s918_s0 + $0x100] sm:$0xff] }
  0x22   :  { %v48_v3 = vld [vmem:[%s918_s0 + $0x110] sm:$0xff]  ;;  %v870_v5 = vld [vmem:[%s919_s2] ss:$0 sm:$0xff] }
  0x23   :  { %546 = vmatpush3.bf16.msra.mxu1 %v545_v33 }
  0x24   :  { %186 = vmatmul.mubr.f32.vlgmr.msra.gmra.mrb[0].mxu0 %v14_v34 }
  0x25   :  { %190 = vmatprep.mubr.f32.mxu0 %v19_v36 }
  0x26   :  { %296 = vmatmul.mubr.f32.vlgmr.msra.gmra.mrb[0].mxu1 %v16_v35 }
  0x27   :  { %300 = vmatprep.mubr.f32.mxu1 %v21_v37 }
  0x28   :  { %191 = vmatmul.mubr.f32.gmra.mrb[2].mxu0 %v18_v38 }
  0x29   :  { %195 = vmatprep.mubr.f32.mxu0 %v23_v40 }
  0x2a   :  { %301 = vmatmul.mubr.f32.gmra.mrb[2].mxu1 %v20_v39 }
  0x2b   :  { %305 = vmatprep.mubr.f32.mxu1 %v25_v41 }
  0x2c   :  { %196 = vmatmul.mubr.f32.gmra.mrb[4].mxu0 %v22_v42 }
  0x2d   :  { %200 = vmatprep.mubr.f32.mxu0 %v27_v44 }
  0x2e   :  { %306 = vmatmul.mubr.f32.gmra.mrb[4].mxu1 %v24_v43 }
  0x2f   :  { %310 = vmatprep.mubr.f32.mxu1 %v29_v45 }
  0x30   :  { %201 = vmatmul.mubr.f32.gmra.mrb[6].mxu0 %v26_v46 }
  0x31   :  { %205 = vmatprep.mubr.f32.mxu0 %v31_v48 }
  0x32   :  { %311 = vmatmul.mubr.f32.gmra.mrb[6].mxu1 %v28_v47 }
  0x33   :  { %315 = vmatprep.mubr.f32.mxu1 %v33_v49 }
  0x34   :  { %206 = vmatmul.mubr.f32.gmra.mrb[8].mxu0 %v30_v50 }
  0x35   :  { %210 = vmatprep.mubr.f32.mxu0 %v35_v52 }
  0x36   :  { %316 = vmatmul.mubr.f32.gmra.mrb[8].mxu1 %v32_v51 }
  0x37   :  { %320 = vmatprep.mubr.f32.mxu1 %v37_v53 }
  0x38   :  { %211 = vmatmul.mubr.f32.gmra.mrb[10].mxu0 %v34_v54 }
  0x39   :  { %215 = vmatprep.mubr.f32.mxu0 %v39_v56 }
  0x3a   :  { %321 = vmatmul.mubr.f32.gmra.mrb[10].mxu1 %v36_v55 }
  0x3b   :  { %325 = vmatprep.mubr.f32.mxu1 %v41_v57 }
  0x3c   :  { %216 = vmatmul.mubr.f32.gmra.mrb[12].mxu0 %v38_v58 }
  0x3d   :  { %220 = vmatprep.mubr.f32.mxu0 %v43_v60 }
  0x3e   :  { %326 = vmatmul.mubr.f32.gmra.mrb[12].mxu1 %v40_v59 }
  0x3f   :  { %330 = vmatprep.mubr.f32.mxu1 %v45_v61 }
  0x40   :  { %221 = vmatmul.mubr.f32.gmra.mrb[14].mxu0 %v42_v62 }
  0x41   :  { %225 = vmatprep.mubr.f32.mxu0 %v47_v0 }
  0x42   :  { %331 = vmatmul.mubr.f32.gmra.mrb[14].mxu1 %v44_v63 }
  0x43   :  { %335 = vmatprep.mubr.f32.mxu1 %v49_v1 }
  0x44   :  { %226 = vmatmul.mubr.f32.gmra.mrb[16].mxu0 %v46_v2 }
  0x46   :  { %336 = vmatmul.mubr.f32.gmra.mrb[16].mxu1 %v48_v3 }
  0xf7   :  { %v397_v4 = vpop.f32.mrb[0].mxu0 }
  0xf8   :  { %v398_v6 = vpop.f32.mrb[1].mxu0 }
  0xf9   :  { %v456_v7 = vpop.f32.mrb[0].mxu1  ;;  %v399_v8 = vadd.f32 %v398_v6, %v397_v4 }
  0xfa   :  { %v457_v9 = vpop.f32.mrb[1].mxu1 }
  0xfb   :  { %v458_v10 = vadd.f32 %v457_v9, %v456_v7  ;;  %v188_v11 = vadd.f32 %v399_v8, %v870_v5  ;;  %v400_v12 = vpop.f32.mrb[2].mxu0 }
  0xfc   :  { %v401_v13 = vpop.f32.mrb[3].mxu0 }
  0xfd   :  { %v459_v14 = vpop.f32.mrb[2].mxu1  ;;  %v298_v15 = vadd.f32 %v458_v10, %v188_v11  ;;  %v402_v16 = vadd.f32 %v401_v13, %v400_v12 }
  0xfe   :  { %v460_v17 = vpop.f32.mrb[3].mxu1 }
  0xff   :  { %v461_v18 = vadd.f32 %v460_v17, %v459_v14  ;;  %v341_v19 = vmax.f32 %v298_v15, 0.0  ;;  %v193_v20 = vadd.f32 %v402_v16, %v870_v5  ;;  %v403_v21 = vpop.f32.mrb[4].mxu0 }
 0x100   :  { %v404_v22 = vpop.f32.mrb[5].mxu0 }
 0x101   :  { %v462_v23 = vpop.f32.mrb[4].mxu1  ;;  %351 = vst.msk [vmem:[%s920_s3] sm:$0xff] %vm350_vm0, %v341_v19  ;;  %v303_v24 = vadd.f32 %v461_v18, %v193_v20  ;;  %v405_v25 = vadd.f32 %v404_v22, %v403_v21 }
 0x102   :  { %v463_v26 = vpop.f32.mrb[5].mxu1 }
 0x103   :  { %v464_v27 = vadd.f32 %v463_v26, %v462_v23  ;;  %v342_v28 = vmax.f32 %v303_v24, 0.0  ;;  %v198_v29 = vadd.f32 %v405_v25, %v870_v5  ;;  %v406_v30 = vpop.f32.mrb[6].mxu0 }
 0x104   :  { %v407_v31 = vpop.f32.mrb[7].mxu0 }
 0x105   :  { %v465_v32 = vpop.f32.mrb[6].mxu1  ;;  %352 = vst.msk [vmem:[%s920_s3 + $0x8] sm:$0xff] %vm350_vm0, %v342_v28  ;;  %v308_v33 = vadd.f32 %v464_v27, %v198_v29  ;;  %v408_v34 = vadd.f32 %v407_v31, %v406_v30 }
 0x106   :  { %v466_v35 = vpop.f32.mrb[7].mxu1 }
 0x107   :  { %v467_v36 = vadd.f32 %v466_v35, %v465_v32  ;;  %v343_v37 = vmax.f32 %v308_v33, 0.0  ;;  %v203_v38 = vadd.f32 %v408_v34, %v870_v5  ;;  %v409_v39 = vpop.f32.mrb[8].mxu0 }
 0x108   :  { %v410_v40 = vpop.f32.mrb[9].mxu0 }
 0x109   :  { %v468_v41 = vpop.f32.mrb[8].mxu1  ;;  %353 = vst.msk [vmem:[%s920_s3 + $0x10] sm:$0xff] %vm350_vm0, %v343_v37  ;;  %v313_v42 = vadd.f32 %v467_v36, %v203_v38  ;;  %v411_v43 = vadd.f32 %v410_v40, %v409_v39 }
 0x10a   :  { %v469_v44 = vpop.f32.mrb[9].mxu1 }
 0x10b   :  { %v470_v45 = vadd.f32 %v469_v44, %v468_v41  ;;  %v344_v46 = vmax.f32 %v313_v42, 0.0  ;;  %v208_v47 = vadd.f32 %v411_v43, %v870_v5  ;;  %v412_v48 = vpop.f32.mrb[10].mxu0 }
 0x10c   :  { %v413_v49 = vpop.f32.mrb[11].mxu0 }
 0x10d   :  { %v471_v50 = vpop.f32.mrb[10].mxu1  ;;  %354 = vst.msk [vmem:[%s920_s3 + $0x18] sm:$0xff] %vm350_vm0, %v344_v46  ;;  %v318_v51 = vadd.f32 %v470_v45, %v208_v47  ;;  %v414_v52 = vadd.f32 %v413_v49, %v412_v48 }
 0x10e   :  { %v472_v53 = vpop.f32.mrb[11].mxu1 }
 0x10f   :  { %v473_v54 = vadd.f32 %v472_v53, %v471_v50  ;;  %v345_v55 = vmax.f32 %v318_v51, 0.0  ;;  %v213_v56 = vadd.f32 %v414_v52, %v870_v5  ;;  %v415_v57 = vpop.f32.mrb[12].mxu0 }
 0x110   :  { %v416_v58 = vpop.f32.mrb[13].mxu0 }
 0x111   :  { %v474_v59 = vpop.f32.mrb[12].mxu1  ;;  %355 = vst.msk [vmem:[%s920_s3 + $0x20] sm:$0xff] %vm350_vm0, %v345_v55  ;;  %v323_v60 = vadd.f32 %v473_v54, %v213_v56  ;;  %v417_v61 = vadd.f32 %v416_v58, %v415_v57 }
 0x112   :  { %v475_v62 = vpop.f32.mrb[13].mxu1 }
 0x113   :  { %v476_v63 = vadd.f32 %v475_v62, %v474_v59  ;;  %v346_v0 = vmax.f32 %v323_v60, 0.0  ;;  %v218_v1 = vadd.f32 %v417_v61, %v870_v5  ;;  %v418_v2 = vpop.f32.mrb[14].mxu0 }
 0x114   :  { %v419_v3 = vpop.f32.mrb[15].mxu0 }
 0x115   :  { %v477_v4 = vpop.f32.mrb[14].mxu1  ;;  %356 = vst.msk [vmem:[%s920_s3 + $0x28] sm:$0xff] %vm350_vm0, %v346_v0  ;;  %v328_v6 = vadd.f32 %v476_v63, %v218_v1  ;;  %v420_v7 = vadd.f32 %v419_v3, %v418_v2 }
 0x116   :  { %v478_v8 = vpop.f32.mrb[15].mxu1 }
 0x117   :  { %v479_v9 = vadd.f32 %v478_v8, %v477_v4  ;;  %v347_v10 = vmax.f32 %v328_v6, 0.0  ;;  %v223_v11 = vadd.f32 %v420_v7, %v870_v5  ;;  %v421_v12 = vpop.f32.mrb[16].mxu0 }
 0x118   :  { %v422_v13 = vpop.f32.mrb[17].mxu0 }
 0x119   :  { %v480_v14 = vpop.f32.mrb[16].mxu1  ;;  %357 = vst.msk [vmem:[%s920_s3 + $0x30] sm:$0xff] %vm350_vm0, %v347_v10  ;;  %v333_v15 = vadd.f32 %v479_v9, %v223_v11  ;;  %v423_v16 = vadd.f32 %v422_v13, %v421_v12 }
 0x11a   :  { %v481_v17 = vpop.f32.mrb[17].mxu1 }
 0x11b   :  { %v482_v18 = vadd.f32 %v481_v17, %v480_v14  ;;  %v348_v19 = vmax.f32 %v333_v15, 0.0  ;;  %v228_v20 = vadd.f32 %v423_v16, %v870_v5 }
 0x11d   :  { %358 = vst.msk [vmem:[%s920_s3 + $0x38] sm:$0xff] %vm350_vm0, %v348_v19  ;;  %v338_v21 = vadd.f32 %v482_v18, %v228_v20 }
 0x11f   :  { %v349_v22 = vmax.f32 %v338_v21, 0.0 }
 0x121   :  { %359 = vst.msk [vmem:[%s920_s3 + $0x40] sm:$0xff] %vm350_vm0, %v349_v22 }

// kernel: encoder_forward.7
= control target key start
LH: loop header
LB: loop body
LE: loop exit
PB: predicated region body
PF: predicated region fallthrough
CT: control target
= control target key end

     0   :  { %s1146_s1 = inlined_call_operand.vmem [shape: f32[1024,128], index: 1, kind: input, shape index: {}]   ;;  %s1147_s0 = inlined_call_operand.vmem [shape: f32[8,1024], index: 0, kind: input, shape index: {}]   ;;  %s1148_s2 = inlined_call_operand.vmem [shape: f32[1,128], index: 2, kind: input, shape index: {}]   ;;  %s1149_s3 = inlined_call_operand.vmem [shape: f32[8,128], index: 3, kind: output, shape index: {}]  }
   0x1   :  { %v38_v0 = vld [vmem:[%s1146_s1 + $0x80] sm:$0xff]  ;;  %v39_v1 = vld [vmem:[%s1146_s1 + $0x88] sm:$0xff]  ;;  %v40_v11 = vld [vmem:[%s1146_s1 + $0x90] sm:$0xff] }
   0x2   :  { %v22_v2 = vld [vmem:[%s1146_s1] sm:$0xff]  ;;  %v584_v3 = vpack.c.bf16 %v39_v1, %v38_v0  ;;  %v23_v4 = vld [vmem:[%s1146_s1 + $0x8] sm:$0xff]  ;;  %v41_v13 = vld [vmem:[%s1146_s1 + $0x98] sm:$0xff] }
   0x3   :  { %v70_v5 = vld [vmem:[%s1146_s1 + $0x180] sm:$0xff]  ;;  %v71_v6 = vld [vmem:[%s1146_s1 + $0x188] sm:$0xff]  ;;  %v586_v7 = vpack.c.bf16 %v23_v4, %v22_v2  ;;  %v24_v14 = vld [vmem:[%s1146_s1 + $0x10] sm:$0xff]  ;;  %v588_v16 = vpack.c.bf16 %v41_v13, %v40_v11 }
   0x4   :  { %v616_v8 = vpack.c.bf16 %v71_v6, %v70_v5  ;;  %v54_v9 = vld [vmem:[%s1146_s1 + $0x100] sm:$0xff]  ;;  %v55_v10 = vld [vmem:[%s1146_s1 + $0x108] sm:$0xff]  ;;  %585 = vmatprep.subr.bf16.mxu0 %v584_v3  ;;  %v25_v15 = vld [vmem:[%s1146_s1 + $0x18] sm:$0xff] }
   0x5   :  { %v618_v12 = vpack.c.bf16 %v55_v10, %v54_v9  ;;  %587 = vmatpush3.bf16.msra.mxu0 %v586_v7  ;;  %v590_v17 = vpack.c.bf16 %v25_v15, %v24_v14  ;;  %v72_v18 = vld [vmem:[%s1146_s1 + $0x190] sm:$0xff]  ;;  %v73_v19 = vld [vmem:[%s1146_s1 + $0x198] sm:$0xff]  ;;  %v42_v23 = vld [vmem:[%s1146_s1 + $0xa0] sm:$0xff] }
   0x6   :  { %617 = vmatprep.subr.bf16.mxu1 %v616_v8  ;;  %v56_v20 = vld [vmem:[%s1146_s1 + $0x110] sm:$0xff]  ;;  %v620_v21 = vpack.c.bf16 %v73_v19, %v72_v18  ;;  %v57_v22 = vld [vmem:[%s1146_s1 + $0x118] sm:$0xff]  ;;  %v43_v24 = vld [vmem:[%s1146_s1 + $0xa8] sm:$0xff]  ;;  %589 = vmatprep.subr.bf16.mxu0 %v588_v16 }
   0x7   :  { %619 = vmatpush3.bf16.msra.mxu1 %v618_v12  ;;  %v622_v25 = vpack.c.bf16 %v57_v22, %v56_v20  ;;  %v592_v26 = vpack.c.bf16 %v43_v24, %v42_v23  ;;  %v26_v27 = vld [vmem:[%s1146_s1 + $0x20] sm:$0xff]  ;;  %v27_v28 = vld [vmem:[%s1146_s1 + $0x28] sm:$0xff]  ;;  %v44_v35 = vld [vmem:[%s1146_s1 + $0xb0] sm:$0xff] }
   0x8   :  { %v74_v29 = vld [vmem:[%s1146_s1 + $0x1a0] sm:$0xff]  ;;  %621 = vmatprep.subr.bf16.mxu1 %v620_v21  ;;  %v75_v30 = vld [vmem:[%s1146_s1 + $0x1a8] sm:$0xff]  ;;  %v594_v33 = vpack.c.bf16 %v27_v28, %v26_v27  ;;  %v45_v36 = vld [vmem:[%s1146_s1 + $0xb8] sm:$0xff] }
   0x9   :  { %v58_v31 = vld [vmem:[%s1146_s1 + $0x120] sm:$0xff]  ;;  %v59_v32 = vld [vmem:[%s1146_s1 + $0x128] sm:$0xff]  ;;  %591 = vmatpush3.bf16.msra.mxu0 %v590_v17  ;;  %v624_v34 = vpack.c.bf16 %v75_v30, %v74_v29  ;;  %v28_v37 = vld [vmem:[%s1146_s1 + $0x30] sm:$0xff]  ;;  %v596_v39 = vpack.c.bf16 %v45_v36, %v44_v35 }
   0xa   :  { %593 = vmatprep.subr.bf16.mxu0 %v592_v26  ;;  %v626_v38 = vpack.c.bf16 %v59_v32, %v58_v31  ;;  %v29_v40 = vld [vmem:[%s1146_s1 + $0x38] sm:$0xff]  ;;  %v76_v41 = vld [vmem:[%s1146_s1 + $0x1b0] sm:$0xff]  ;;  %v46_v46 = vld [vmem:[%s1146_s1 + $0xc0] sm:$0xff] }
   0xb   :  { %623 = vmatpush3.bf16.msra.mxu1 %v622_v25  ;;  %v77_v42 = vld [vmem:[%s1146_s1 + $0x1b8] sm:$0xff]  ;;  %v60_v44 = vld [vmem:[%s1146_s1 + $0x130] sm:$0xff]  ;;  %v47_v47 = vld [vmem:[%s1146_s1 + $0xc8] sm:$0xff]  ;;  %v598_v48 = vpack.c.bf16 %v29_v40, %v28_v37 }
   0xc   :  { %625 = vmatprep.subr.bf16.mxu1 %v624_v34  ;;  %v628_v43 = vpack.c.bf16 %v77_v42, %v76_v41  ;;  %v61_v45 = vld [vmem:[%s1146_s1 + $0x138] sm:$0xff]  ;;  %v78_v49 = vld [vmem:[%s1146_s1 + $0x1c0] sm:$0xff]  ;;  %v79_v50 = vld [vmem:[%s1146_s1 + $0x1c8] sm:$0xff]  ;;  %v600_v52 = vpack.c.bf16 %v47_v47, %v46_v46 }
   0xd   :  { %595 = vmatpush3.bf16.msra.mxu0 %v594_v33  ;;  %v630_v51 = vpack.c.bf16 %v61_v45, %v60_v44  ;;  %v30_v53 = vld [vmem:[%s1146_s1 + $0x40] sm:$0xff]  ;;  %v31_v54 = vld [vmem:[%s1146_s1 + $0x48] sm:$0xff]  ;;  %v632_v56 = vpack.c.bf16 %v79_v50, %v78_v49  ;;  %v48_v58 = vld [vmem:[%s1146_s1 + $0xd0] sm:$0xff] }
   0xe   :  { %597 = vmatprep.subr.bf16.mxu0 %v596_v39  ;;  %v62_v55 = vld [vmem:[%s1146_s1 + $0x140] sm:$0xff]  ;;  %v63_v57 = vld [vmem:[%s1146_s1 + $0x148] sm:$0xff]  ;;  %v49_v59 = vld [vmem:[%s1146_s1 + $0xd8] sm:$0xff]  ;;  %v602_v62 = vpack.c.bf16 %v31_v54, %v30_v53 }
   0xf   :  { %627 = vmatpush3.bf16.msra.mxu1 %v626_v38  ;;  %v80_v60 = vld [vmem:[%s1146_s1 + $0x1d0] sm:$0xff]  ;;  %v81_v61 = vld [vmem:[%s1146_s1 + $0x1d8] sm:$0xff]  ;;  %v634_v63 = vpack.c.bf16 %v63_v57, %v62_v55  ;;  %v604_v0 = vpack.c.bf16 %v49_v59, %v48_v58  ;;  %v50_v6 = vld [vmem:[%s1146_s1 + $0xe0] sm:$0xff] }
  0x10   :  { %629 = vmatprep.subr.bf16.mxu1 %v628_v43  ;;  %v32_v1 = vld [vmem:[%s1146_s1 + $0x50] sm:$0xff]  ;;  %v33_v2 = vld [vmem:[%s1146_s1 + $0x58] sm:$0xff]  ;;  %v636_v4 = vpack.c.bf16 %v81_v61, %v80_v60  ;;  %v51_v7 = vld [vmem:[%s1146_s1 + $0xe8] sm:$0xff] }
  0x11   :  { %599 = vmatpush3.bf16.msra.mxu0 %v598_v48  ;;  %v64_v3 = vld [vmem:[%s1146_s1 + $0x150] sm:$0xff]  ;;  %v65_v5 = vld [vmem:[%s1146_s1 + $0x158] sm:$0xff]  ;;  %v82_v8 = vld [vmem:[%s1146_s1 + $0x1e0] sm:$0xff]  ;;  %v606_v10 = vpack.c.bf16 %v33_v2, %v32_v1  ;;  %v608_v14 = vpack.c.bf16 %v51_v7, %v50_v6 }
  0x12   :  { %601 = vmatprep.subr.bf16.mxu0 %v600_v52  ;;  %v83_v9 = vld [vmem:[%s1146_s1 + $0x1e8] sm:$0xff]  ;;  %v34_v11 = vld [vmem:[%s1146_s1 + $0x60] sm:$0xff]  ;;  %v638_v13 = vpack.c.bf16 %v65_v5, %v64_v3  ;;  %v52_v19 = vld [vmem:[%s1146_s1 + $0xf0] sm:$0xff] }
  0x13   :  { %631 = vmatpush3.bf16.msra.mxu1 %v630_v51  ;;  %v35_v12 = vld [vmem:[%s1146_s1 + $0x68] sm:$0xff]  ;;  %v66_v15 = vld [vmem:[%s1146_s1 + $0x160] sm:$0xff]  ;;  %v640_v18 = vpack.c.bf16 %v83_v9, %v82_v8  ;;  %v53_v20 = vld [vmem:[%s1146_s1 + $0xf8] sm:$0xff] }
  0x14   :  { %633 = vmatprep.subr.bf16.mxu1 %v632_v56  ;;  %v67_v16 = vld [vmem:[%s1146_s1 + $0x168] sm:$0xff]  ;;  %v17_v21 = vld [vmem:[%s1147_s0 + $0x18] sm:$0xff]  ;;  %v84_v22 = vld [vmem:[%s1146_s1 + $0x1f0] sm:$0xff]  ;;  %v610_v24 = vpack.c.bf16 %v35_v12, %v34_v11  ;;  %v612_v26 = vpack.c.bf16 %v53_v20, %v52_v19 }
  0x15   :  { %603 = vmatpush3.bf16.msra.mxu0 %v602_v62  ;;  %v15_v17 = vld [vmem:[%s1147_s0 + $0x8] sm:$0xff]  ;;  %v85_v23 = vld [vmem:[%s1146_s1 + $0x1f8] sm:$0xff]  ;;  %291 = vmatprep.mubr.f32.mxu1 %v17_v21  ;;  %v642_v25 = vpack.c.bf16 %v67_v16, %v66_v15  ;;  %v36_v27 = vld [vmem:[%s1146_s1 + $0x70] sm:$0xff] }
  0x16   :  { %605 = vmatprep.subr.bf16.mxu0 %v604_v0  ;;  %221 = vmatprep.mubr.f32.mxu0 %v15_v17  ;;  %v37_v28 = vld [vmem:[%s1146_s1 + $0x78] sm:$0xff]  ;;  %v68_v29 = vld [vmem:[%s1146_s1 + $0x170] sm:$0xff]  ;;  %v644_v30 = vpack.c.bf16 %v85_v23, %v84_v22  ;;  %v102_v32 = vld [vmem:[%s1146_s1 + $0x280] sm:$0xff] }
  0x17   :  { %635 = vmatpush3.bf16.msra.mxu1 %v634_v63  ;;  %v69_v31 = vld [vmem:[%s1146_s1 + $0x178] sm:$0xff]  ;;  %v103_v33 = vld [vmem:[%s1146_s1 + $0x288] sm:$0xff]  ;;  %v134_v34 = vld [vmem:[%s1146_s1 + $0x380] sm:$0xff]  ;;  %v614_v36 = vpack.c.bf16 %v37_v28, %v36_v27 }
  0x18   :  { %637 = vmatprep.subr.bf16.mxu1 %v636_v4  ;;  %v135_v35 = vld [vmem:[%s1146_s1 + $0x388] sm:$0xff]  ;;  %v646_v37 = vpack.c.bf16 %v69_v31, %v68_v29  ;;  %v648_v38 = vpack.c.bf16 %v103_v33, %v102_v32  ;;  %v86_v39 = vld [vmem:[%s1146_s1 + $0x200] sm:$0xff]  ;;  %v104_v44 = vld [vmem:[%s1146_s1 + $0x290] sm:$0xff] }
  0x19   :  { %607 = vmatpush3.bf16.msra.mxu0 %v606_v10  ;;  %v87_v40 = vld [vmem:[%s1146_s1 + $0x208] sm:$0xff]  ;;  %v118_v41 = vld [vmem:[%s1146_s1 + $0x300] sm:$0xff]  ;;  %v680_v42 = vpack.c.bf16 %v135_v35, %v134_v34  ;;  %v105_v45 = vld [vmem:[%s1146_s1 + $0x298] sm:$0xff] }
  0x1a   :  { %609 = vmatprep.subr.bf16.mxu0 %v608_v14  ;;  %v119_v43 = vld [vmem:[%s1146_s1 + $0x308] sm:$0xff]  ;;  %v136_v46 = vld [vmem:[%s1146_s1 + $0x390] sm:$0xff]  ;;  %v137_v47 = vld [vmem:[%s1146_s1 + $0x398] sm:$0xff]  ;;  %v650_v49 = vpack.c.bf16 %v87_v40, %v86_v39  ;;  %v652_v52 = vpack.c.bf16 %v105_v45, %v104_v44 }
  0x1b   :  { %639 = vmatpush3.bf16.msra.mxu1 %v638_v13  ;;  %v14_v48 = vld [vmem:[%s1147_s0] sm:$0xff]  ;;  %v16_v50 = vld [vmem:[%s1147_s0 + $0x10] sm:$0xff]  ;;  %v682_v51 = vpack.c.bf16 %v119_v43, %v118_v41  ;;  %v89_v54 = vld [vmem:[%s1146_s1 + $0x218] sm:$0xff]  ;;  %v684_v56 = vpack.c.bf16 %v137_v47, %v136_v46 }
  0x1c   :  { %641 = vmatprep.subr.bf16.mxu1 %v640_v18  ;;  %v88_v53 = vld [vmem:[%s1146_s1 + $0x210] sm:$0xff]  ;;  %v121_v57 = vld [vmem:[%s1146_s1 + $0x318] sm:$0xff]  ;;  %v106_v58 = vld [vmem:[%s1146_s1 + $0x2a0] sm:$0xff] }
  0x1d   :  { %611 = vmatpush3.bf16.msra.mxu0 %v610_v24  ;;  %v120_v55 = vld [vmem:[%s1146_s1 + $0x310] sm:$0xff]  ;;  %v107_v59 = vld [vmem:[%s1146_s1 + $0x2a8] sm:$0xff]  ;;  %v138_v60 = vld [vmem:[%s1146_s1 + $0x3a0] sm:$0xff]  ;;  %v654_v62 = vpack.c.bf16 %v89_v54, %v88_v53 }
  0x1e   :  { %613 = vmatprep.subr.bf16.mxu0 %v612_v26  ;;  %v139_v61 = vld [vmem:[%s1146_s1 + $0x3a8] sm:$0xff]  ;;  %v686_v63 = vpack.c.bf16 %v121_v57, %v120_v55  ;;  %v656_v0 = vpack.c.bf16 %v107_v59, %v106_v58  ;;  %v90_v1 = vld [vmem:[%s1146_s1 + $0x220] sm:$0xff]  ;;  %v108_v6 = vld [vmem:[%s1146_s1 + $0x2b0] sm:$0xff] }
  0x1f   :  { %643 = vmatpush3.bf16.msra.mxu1 %v642_v25  ;;  %v91_v2 = vld [vmem:[%s1146_s1 + $0x228] sm:$0xff]  ;;  %v122_v3 = vld [vmem:[%s1146_s1 + $0x320] sm:$0xff]  ;;  %v688_v4 = vpack.c.bf16 %v139_v61, %v138_v60  ;;  %v109_v7 = vld [vmem:[%s1146_s1 + $0x2b8] sm:$0xff] }
  0x20   :  { %645 = vmatprep.subr.bf16.mxu1 %v644_v30  ;;  %v123_v5 = vld [vmem:[%s1146_s1 + $0x328] sm:$0xff]  ;;  %v140_v8 = vld [vmem:[%s1146_s1 + $0x3b0] sm:$0xff]  ;;  %v141_v9 = vld [vmem:[%s1146_s1 + $0x3b8] sm:$0xff]  ;;  %v658_v10 = vpack.c.bf16 %v91_v2, %v90_v1  ;;  %v660_v12 = vpack.c.bf16 %v109_v7, %v108_v6 }
  0x21   :  { %615 = vmatpush3.bf16.msra.mxu0 %v614_v36  ;;  %v690_v11 = vpack.c.bf16 %v123_v5, %v122_v3  ;;  %v92_v13 = vld [vmem:[%s1146_s1 + $0x230] sm:$0xff]  ;;  %v93_v14 = vld [vmem:[%s1146_s1 + $0x238] sm:$0xff]  ;;  %v692_v16 = vpack.c.bf16 %v141_v9, %v140_v8  ;;  %v110_v18 = vld [vmem:[%s1146_s1 + $0x2c0] sm:$0xff] }
  0x22   :  { %649 = vmatprep.subr.bf16.mxu0 %v648_v38  ;;  %v124_v15 = vld [vmem:[%s1146_s1 + $0x330] sm:$0xff]  ;;  %v125_v17 = vld [vmem:[%s1146_s1 + $0x338] sm:$0xff]  ;;  %v111_v19 = vld [vmem:[%s1146_s1 + $0x2c8] sm:$0xff]  ;;  %v662_v22 = vpack.c.bf16 %v93_v14, %v92_v13 }
  0x23   :  { %647 = vmatpush3.bf16.msra.mxu1 %v646_v37  ;;  %v142_v20 = vld [vmem:[%s1146_s1 + $0x3c0] sm:$0xff]  ;;  %v143_v21 = vld [vmem:[%s1146_s1 + $0x3c8] sm:$0xff]  ;;  %v21_v24 = vld [vmem:[%s1147_s0 + $0x38] sm:$0xff]  ;;  %v694_v25 = vpack.c.bf16 %v125_v17, %v124_v15  ;;  %v664_v26 = vpack.c.bf16 %v111_v19, %v110_v18 }
  0x24   :  { %681 = vmatprep.subr.bf16.mxu1 %v680_v42  ;;  %222 = vmatmul.mubr.f32.vlgmr.msra.gmra.mrb[0].mxu0 %v14_v48  ;;  %v19_v23 = vld [vmem:[%s1147_s0 + $0x28] sm:$0xff]  ;;  %v94_v27 = vld [vmem:[%s1146_s1 + $0x240] sm:$0xff]  ;;  %v696_v30 = vpack.c.bf16 %v143_v21, %v142_v20  ;;  %v112_v32 = vld [vmem:[%s1146_s1 + $0x2d0] sm:$0xff] }
  0x25   :  { %651 = vmatpush3.bf16.msra.mxu0 %v650_v49  ;;  %v95_v28 = vld [vmem:[%s1146_s1 + $0x248] sm:$0xff]  ;;  %v126_v29 = vld [vmem:[%s1146_s1 + $0x340] sm:$0xff]  ;;  %v113_v33 = vld [vmem:[%s1146_s1 + $0x2d8] sm:$0xff]  ;;  %361 = vmatprep.mubr.f32.mxu0 %v19_v23 }
  0x26   :  { %292 = vmatmul.mubr.f32.vlgmr.msra.gmra.mrb[0].mxu1 %v16_v50  ;;  %653 = vmatprep.subr.bf16.mxu0 %v652_v52  ;;  %v127_v31 = vld [vmem:[%s1146_s1 + $0x348] sm:$0xff]  ;;  %v144_v34 = vld [vmem:[%s1146_s1 + $0x3d0] sm:$0xff]  ;;  %v145_v35 = vld [vmem:[%s1146_s1 + $0x3d8] sm:$0xff]  ;;  %v666_v36 = vpack.c.bf16 %v95_v28, %v94_v27  ;;  %v668_v38 = vpack.c.bf16 %v113_v33, %v112_v32 }
  0x27   :  { %683 = vmatpush3.bf16.msra.mxu1 %v682_v51  ;;  %431 = vmatprep.mubr.f32.mxu1 %v21_v24  ;;  %v698_v37 = vpack.c.bf16 %v127_v31, %v126_v29  ;;  %v96_v39 = vld [vmem:[%s1146_s1 + $0x250] sm:$0xff]  ;;  %v97_v40 = vld [vmem:[%s1146_s1 + $0x258] sm:$0xff]  ;;  %v700_v42 = vpack.c.bf16 %v145_v35, %v144_v34  ;;  %v114_v44 = vld [vmem:[%s1146_s1 + $0x2e0] sm:$0xff] }
  0x28   :  { %685 = vmatprep.subr.bf16.mxu1 %v684_v56  ;;  %v128_v41 = vld [vmem:[%s1146_s1 + $0x350] sm:$0xff]  ;;  %v129_v43 = vld [vmem:[%s1146_s1 + $0x358] sm:$0xff]  ;;  %v115_v45 = vld [vmem:[%s1146_s1 + $0x2e8] sm:$0xff]  ;;  %v670_v48 = vpack.c.bf16 %v97_v40, %v96_v39 }
  0x29   :  { %655 = vmatpush3.bf16.msra.mxu0 %v654_v62  ;;  %v146_v46 = vld [vmem:[%s1146_s1 + $0x3e0] sm:$0xff]  ;;  %v147_v47 = vld [vmem:[%s1146_s1 + $0x3e8] sm:$0xff]  ;;  %v702_v49 = vpack.c.bf16 %v129_v43, %v128_v41  ;;  %v672_v50 = vpack.c.bf16 %v115_v45, %v114_v44  ;;  %v116_v56 = vld [vmem:[%s1146_s1 + $0x2f0] sm:$0xff] }
  0x2a   :  { %657 = vmatprep.subr.bf16.mxu0 %v656_v0  ;;  %v98_v51 = vld [vmem:[%s1146_s1 + $0x260] sm:$0xff]  ;;  %v99_v52 = vld [vmem:[%s1146_s1 + $0x268] sm:$0xff]  ;;  %v704_v54 = vpack.c.bf16 %v147_v47, %v146_v46  ;;  %v117_v57 = vld [vmem:[%s1146_s1 + $0x2f8] sm:$0xff] }
  0x2b   :  { %687 = vmatpush3.bf16.msra.mxu1 %v686_v63  ;;  %v130_v53 = vld [vmem:[%s1146_s1 + $0x360] sm:$0xff]  ;;  %v131_v55 = vld [vmem:[%s1146_s1 + $0x368] sm:$0xff]  ;;  %v148_v58 = vld [vmem:[%s1146_s1 + $0x3f0] sm:$0xff]  ;;  %v674_v60 = vpack.c.bf16 %v99_v52, %v98_v51  ;;  %v676_v62 = vpack.c.bf16 %v117_v57, %v116_v56 }
  0x2c   :  { %689 = vmatprep.subr.bf16.mxu1 %v688_v4  ;;  %v149_v59 = vld [vmem:[%s1146_s1 + $0x3f8] sm:$0xff]  ;;  %v706_v61 = vpack.c.bf16 %v131_v55, %v130_v53  ;;  %v100_v63 = vld [vmem:[%s1146_s1 + $0x270] sm:$0xff]  ;;  %v18_v6 = vld [vmem:[%s1147_s0 + $0x20] sm:$0xff] }
  0x2d   :  { %659 = vmatpush3.bf16.msra.mxu0 %v658_v10  ;;  %v101_v0 = vld [vmem:[%s1146_s1 + $0x278] sm:$0xff]  ;;  %v708_v1 = vpack.c.bf16 %v149_v59, %v148_v58  ;;  %v132_v2 = vld [vmem:[%s1146_s1 + $0x370] sm:$0xff]  ;;  %v443_v9 = vld [vmem:[%s1148_s2] ss:$0 sm:$0xff] }
  0x2e   :  { %661 = vmatprep.subr.bf16.mxu0 %v660_v12  ;;  %v133_v3 = vld [vmem:[%s1146_s1 + $0x378] sm:$0xff]  ;;  %v678_v4 = vpack.c.bf16 %v101_v0, %v100_v63  ;;  %v20_v7 = vld [vmem:[%s1147_s0 + $0x30] sm:$0xff] }
  0x2f   :  { %691 = vmatpush3.bf16.msra.mxu1 %v690_v11  ;;  %v710_v5 = vpack.c.bf16 %v133_v3, %v132_v2 }
  0x30   :  { %693 = vmatprep.subr.bf16.mxu1 %v692_v16 }
  0x31   :  { %663 = vmatpush3.bf16.msra.mxu0 %v662_v22 }
  0x32   :  { %665 = vmatprep.subr.bf16.mxu0 %v664_v26 }
  0x33   :  { %695 = vmatpush3.bf16.msra.mxu1 %v694_v25 }
  0x34   :  { %697 = vmatprep.subr.bf16.mxu1 %v696_v30 }
  0x35   :  { %667 = vmatpush3.bf16.msra.mxu0 %v666_v36 }
  0x36   :  { %669 = vmatprep.subr.bf16.mxu0 %v668_v38 }
  0x37   :  { %699 = vmatpush3.bf16.msra.mxu1 %v698_v37 }
  0x38   :  { %701 = vmatprep.subr.bf16.mxu1 %v700_v42 }
  0x39   :  { %671 = vmatpush3.bf16.msra.mxu0 %v670_v48 }
  0x3a   :  { %673 = vmatprep.subr.bf16.mxu0 %v672_v50 }
  0x3b   :  { %703 = vmatpush3.bf16.msra.mxu1 %v702_v49 }
  0x3c   :  { %705 = vmatprep.subr.bf16.mxu1 %v704_v54 }
  0x3d   :  { %675 = vmatpush3.bf16.msra.mxu0 %v674_v60 }
  0x3e   :  { %677 = vmatprep.subr.bf16.mxu0 %v676_v62 }
  0x3f   :  { %707 = vmatpush3.bf16.msra.mxu1 %v706_v61 }
  0x40   :  { %709 = vmatprep.subr.bf16.mxu1 %v708_v1 }
  0x41   :  { %679 = vmatpush3.bf16.msra.mxu0 %v678_v4 }
  0x43   :  { %711 = vmatpush3.bf16.msra.mxu1 %v710_v5 }
  0x44   :  { %362 = vmatmul.mubr.f32.vlgmr.msra.gmra.mrb[2].mxu0 %v18_v6 }
  0x46   :  { %432 = vmatmul.mubr.f32.vlgmr.msra.gmra.mrb[2].mxu1 %v20_v7 }
  0xf7   :  { %v476_v8 = vpop.f32.mrb[0].mxu0 }
  0xf8   :  { %v477_v10 = vpop.f32.mrb[1].mxu0 }
  0xf9   :  { %v511_v11 = vpop.f32.mrb[0].mxu1  ;;  %v478_v12 = vadd.f32 %v477_v10, %v476_v8 }
  0xfa   :  { %v512_v13 = vpop.f32.mrb[1].mxu1 }
  0xfb   :  { %v513_v14 = vadd.f32 %v512_v13, %v511_v11  ;;  %v224_v15 = vadd.f32 %v478_v12, %v443_v9 }
  0xfd   :  { %v294_v16 = vadd.f32 %v513_v14, %v224_v15 }
 0x117   :  { %v546_v17 = vpop.f32.mrb[2].mxu0 }
 0x118   :  { %v547_v18 = vpop.f32.mrb[3].mxu0 }
 0x119   :  { %v581_v19 = vpop.f32.mrb[2].mxu1  ;;  %v548_v20 = vadd.f32 %v547_v18, %v546_v17 }
 0x11a   :  { %v582_v21 = vpop.f32.mrb[3].mxu1 }
 0x11b   :  { %v583_v22 = vadd.f32 %v582_v21, %v581_v19  ;;  %v364_v23 = vadd.f32 %v548_v20, %v294_v16 }
 0x11d   :  { %v434_v24 = vadd.f32 %v583_v22, %v364_v23 }
 0x11f   :  { %v437_v25 = vmax.f32 %v434_v24, 0.0 }
 0x121   :  { %438 = vst [vmem:[%s1149_s3] sm:$0xff] %v437_v25 }

</bundles_post_ra>
